<compile_context>
chip_gen: v6e
topology: v6e:2x2x1
jax: 0.10.0
libtpu: 0.0.40
codegen_flags: <defaults>
</compile_context>

<pallas_src>
import jax
import jax.numpy as jnp
import numpy as np
from jax import lax
from jax.experimental import pallas as pl
from jax.experimental.pallas import tpu as pltpu

T = 8            # sequence length
B = 2            # batch size
E = 32           # embedding dim
H = 128          # LSTM hidden size per direction (keeps gate slices lane-aligned)
L = 8            # number of labels
VOCAB = 64       # vocabulary size
PAD_WORD_ID = 1
PAD_LABEL_ID = 0
TB = T * B


def bilstm_tagger_kernel(
    x_ref,      # [TB, E]   f32   embedded tokens (eval-mode dropout == identity)
    sent_ref,   # [TB, 1]   int32 token ids
    lab_ref,    # [TB, 1]   int32 label ids
    wih_ref,    # [E, 8H]   f32   [fwd (i,f,o,g) | bwd (i,f,o,g)] input weights
    whh_ref,    # [2H, 8H]  bf16  block-diagonal recurrent weights (same col layout)
    b_ref,      # [1, 8H]   f32   combined biases (b_ih + b_hh per direction)
    wtop_ref,   # [2H, L]   f32
    btop_ref,   # [1, L]    f32
    loss_ref,   # [1, 1]    f32   output: summed cross-entropy
    xg_ref,     # scratch [TB, 8H] f32 : precomputed input projections (all t, both dirs)
    h_ref,      # scratch [TB, 2H] f32 : fwd hidden in [:, :H], bwd hidden in [:, H:]
):
    f32 = jnp.float32
    G = 4 * H  # per-direction gate width

    # ---- Phase 1: input projection for every timestep / direction / gate at once.
    xg_ref[...] = (
        jnp.dot(x_ref[...], wih_ref[...], preferred_element_type=f32) + b_ref[...]
    )

    whh = whh_ref[...]  # [2H, 8H] bf16 (block-diagonal), held in vregs across the loop

    # ---- Phase 2: fused bidirectional recurrence, fully unrolled (T static steps).
    h_f = jnp.zeros((B, H), f32)
    h_b = jnp.zeros((B, H), f32)
    c_f = jnp.zeros((B, H), f32)
    c_b = jnp.zeros((B, H), f32)

    def cell_update(gates, c):
        # gates: [B, 4H] in (i, f, o, g) order; c: [B, H]
        sg = jax.nn.sigmoid(gates[:, 0:3 * H])   # one EUP pass for i, f, o
        i = sg[:, 0:H]
        f = sg[:, H:2 * H]
        o = sg[:, 2 * H:3 * H]
        g = jnp.tanh(gates[:, 3 * H:4 * H])
        c_new = f * c + i * g
        h_new = o * jnp.tanh(c_new)
        return h_new, c_new

    for s in range(T):
        rf = s * B                # rows of timestep s       (forward direction)
        rb = (T - 1 - s) * B      # rows of timestep T-1-s   (backward direction)

        h_cat = jnp.concatenate([h_f, h_b], axis=1).astype(jnp.bfloat16)  # [B, 2H]
        g_rec = jnp.dot(h_cat, whh, preferred_element_type=f32)           # [B, 8H]

        gates_f = g_rec[:, 0:G] + xg_ref[rf:rf + B, 0:G]
        gates_b = g_rec[:, G:2 * G] + xg_ref[rb:rb + B, G:2 * G]

        h_f, c_f = cell_update(gates_f, c_f)
        h_b, c_b = cell_update(gates_b, c_b)

        h_ref[rf:rf + B, 0:H] = h_f
        h_ref[rb:rb + B, H:2 * H] = h_b

    # ---- Phase 3: batched top layer + pad-logit bias + summed cross-entropy.
    logits = (
        jnp.dot(h_ref[...], wtop_ref[...], preferred_element_type=f32) + btop_ref[...]
    )                                                                      # [TB, L]
    col = lax.broadcasted_iota(jnp.int32, (TB, L), 1)
    pad_col = (col == PAD_LABEL_ID).astype(f32)                            # [TB, L]
    is_pad = (sent_ref[...] == PAD_WORD_ID).astype(f32)                    # [TB, 1]
    logits = logits + pad_col * (is_pad * 10000.0)                         # fused mul-add
    onehot = (col == lab_ref[...]).astype(f32)                             # [TB, L]
    m = jnp.max(logits, axis=1, keepdims=True)                             # [TB, 1]
    lse = m + jnp.log(jnp.sum(jnp.exp(logits - m), axis=1, keepdims=True))
    picked = jnp.sum(logits * onehot, axis=1, keepdims=True)               # [TB, 1]
    loss_ref[...] = jnp.sum(lse - picked, keepdims=True)                   # [1, 1]


def _reorder_ifog(w):
    """Reorder gate columns from PyTorch (i,f,g,o) to kernel (i,f,o,g). w: [D, 4H]."""
    return jnp.concatenate(
        [w[:, 0:2 * H], w[:, 3 * H:4 * H], w[:, 2 * H:3 * H]], axis=1)


def _pack_lstm_weights(params):
    """Build the fused weight layout: cols = [fwd i,f,o,g | bwd i,f,o,g]."""
    wih_f = _reorder_ifog(params["w_ih_f"].T)                              # [E, 4H]
    wih_b = _reorder_ifog(params["w_ih_b"].T)                              # [E, 4H]
    whh_f = _reorder_ifog(params["w_hh_f"].T)                              # [H, 4H]
    whh_b = _reorder_ifog(params["w_hh_b"].T)                              # [H, 4H]
    b_f = _reorder_ifog((params["b_ih_f"] + params["b_hh_f"])[None, :])    # [1, 4H]
    b_b = _reorder_ifog((params["b_ih_b"] + params["b_hh_b"])[None, :])    # [1, 4H]

    wih = jnp.concatenate([wih_f, wih_b], axis=1)                          # [E, 8H]
    b = jnp.concatenate([b_f, b_b], axis=1)                                # [1, 8H]
    z = jnp.zeros((H, 4 * H), jnp.float32)
    whh = jnp.concatenate(
        [jnp.concatenate([whh_f, z], axis=1),
         jnp.concatenate([z, whh_b], axis=1)], axis=0)                     # [2H, 8H]
    return wih, whh.astype(jnp.bfloat16), b


def init_params(key):
    ks = jax.random.split(key, 11)
    u = lambda k, shape: jax.random.uniform(k, shape, jnp.float32, -0.1, 0.1)
    return {
        # frozen embedding table (stand-in for text.vocab.vectors)
        "embedding": jax.random.normal(ks[0], (VOCAB, E), jnp.float32),
        # PyTorch nn.LSTM layout: weight_ih [4H, E], weight_hh [4H, H], biases [4H]
        "w_ih_f": u(ks[1], (4 * H, E)),
        "w_hh_f": u(ks[2], (4 * H, H)),
        "b_ih_f": u(ks[3], (4 * H,)),
        "b_hh_f": u(ks[4], (4 * H,)),
        "w_ih_b": u(ks[5], (4 * H, E)),
        "w_hh_b": u(ks[6], (4 * H, H)),
        "b_ih_b": u(ks[7], (4 * H,)),
        "b_hh_b": u(ks[8], (4 * H,)),
        # nn.Linear(2H, L): weight [L, 2H], bias [L]
        "w_top": u(ks[9], (L, 2 * H)),
        "b_top": u(ks[10], (L,)),
    }


@jax.jit
def bilstm_tagger_loss(params, sentence, labels):
    # glue: frozen embedding lookup + eval-mode dropout (identity)
    x = jnp.take(params["embedding"], sentence, axis=0).reshape(TB, E)     # [TB, E]
    wih, whh, b = _pack_lstm_weights(params)

    vmem = pl.BlockSpec(memory_space=pltpu.MemorySpace.VMEM)
    out = pl.pallas_call(
        bilstm_tagger_kernel,
        out_shape=jax.ShapeDtypeStruct((1, 1), jnp.float32),
        in_specs=[vmem] * 8,
        out_specs=vmem,
        scratch_shapes=[
            pltpu.VMEM((TB, 8 * H), jnp.float32),   # xg: input projections
            pltpu.VMEM((TB, 2 * H), jnp.float32),   # h_all: bi-directional hidden states
        ],
    )(
        x,
        sentence.reshape(TB, 1).astype(jnp.int32),
        labels.reshape(TB, 1).astype(jnp.int32),
        wih, whh, b,
        params["w_top"].T, params["b_top"][None, :],
    )
    return out[0, 0]


def reference_loss(params, sentence, labels):
    """Pure-JAX f32 reference matching the PyTorch forward (eval mode)."""
    x = jnp.take(params["embedding"], sentence, axis=0)

    def run_dir(wih, whh, bih, bhh, reverse):
        def step(carry, x_t):
            h, c = carry
            gates = x_t @ wih.T + h @ whh.T + bih + bhh
            i, f, g, o = jnp.split(gates, 4, axis=1)
            i = jax.nn.sigmoid(i)
            f = jax.nn.sigmoid(f)
            g = jnp.tanh(g)
            o = jax.nn.sigmoid(o)
            c = f * c + i * g
            h = o * jnp.tanh(c)
            return (h, c), h

        init = (jnp.zeros((B, H), jnp.float32), jnp.zeros((B, H), jnp.float32))
        _, hs = lax.scan(step, init, x, reverse=reverse)
        return hs

    hf = run_dir(params["w_ih_f"], params["w_hh_f"], params["b_ih_f"], params["b_hh_f"], False)
    hb = run_dir(params["w_ih_b"], params["w_hh_b"], params["b_ih_b"], params["b_hh_b"], True)
    out = jnp.concatenate([hf, hb], axis=-1) @ params["w_top"].T + params["b_top"]
    pad_mask = (sentence == PAD_WORD_ID).astype(jnp.float32)
    out = out.at[:, :, PAD_LABEL_ID].add(pad_mask * 10000.0)
    flat = out.reshape(-1, L)
    lab = labels.reshape(-1)
    logp = jax.nn.log_softmax(flat, axis=-1)
    return -jnp.sum(jnp.take_along_axis(logp, lab[:, None], axis=1))


if __name__ == "__main__":
    key = jax.random.PRNGKey(0)
    k_par, k_sent, k_lab = jax.random.split(key, 3)
    params = init_params(k_par)

    sentence = jax.random.randint(k_sent, (T, B), 2, VOCAB, dtype=jnp.int32)
    labels = jax.random.randint(k_lab, (T, B), 1, L, dtype=jnp.int32)
    # emulate torchtext padding at the tail of the shorter sequence
    sentence = sentence.at[T - 2:, 1].set(PAD_WORD_ID)
    labels = labels.at[T - 2:, 1].set(PAD_LABEL_ID)

    loss = bilstm_tagger_loss(params, sentence, labels)
    loss = jax.block_until_ready(loss)

    ref = reference_loss(params, sentence, labels)
    # bf16 recurrent-matmul operands (f32 accumulation) -> validate at 1e-2.
    np.testing.assert_allclose(np.asarray(loss), np.asarray(ref), rtol=1e-2, atol=1e-2)

    print("KERNEL_OK")
</pallas_src>

<mosaic_0001>
module attributes {stable_mosaic.version = 11 : i64} {
  func.func @bilstm_tagger_kernel(%arg0: memref<16x32xf32, #tpu.memory_space<vmem>>, %arg1: memref<16x1xi32, #tpu.memory_space<vmem>>, %arg2: memref<16x1xi32, #tpu.memory_space<vmem>>, %arg3: memref<32x1024xf32, #tpu.memory_space<vmem>>, %arg4: memref<256x1024xbf16, #tpu.memory_space<vmem>>, %arg5: memref<1x1024xf32, #tpu.memory_space<vmem>>, %arg6: memref<256x8xf32, #tpu.memory_space<vmem>>, %arg7: memref<1x8xf32, #tpu.memory_space<vmem>>, %arg8: memref<1x1xf32, #tpu.memory_space<vmem>>, %arg9: memref<16x1024xf32, #tpu.memory_space<vmem>>, %arg10: memref<16x256xf32, #tpu.memory_space<vmem>>) attributes {dimension_semantics = [], scalar_prefetch = 0 : i64, scratch_operands = 2 : i64, tpu.core_type = #tpu.core_type<tc>} {
    %c0 = arith.constant 0 : index
    %c0_0 = arith.constant 0 : index
    %0 = vector.load %arg0[%c0, %c0_0] : memref<16x32xf32, #tpu.memory_space<vmem>>, vector<16x32xf32>
    %c0_1 = arith.constant 0 : index
    %c0_2 = arith.constant 0 : index
    %1 = vector.load %arg3[%c0_1, %c0_2] : memref<32x1024xf32, #tpu.memory_space<vmem>>, vector<32x1024xf32>
    %cst = arith.constant dense<0.000000e+00> : vector<16x1024xf32>
    %2 = tpu.matmul %0, %1, %cst {dimension_numbers = #tpu.dot_dimension_numbers<[1], [0], [0], [1], [0, 0, 1, 1], [], []>} : vector<16x32xf32>, vector<32x1024xf32>, vector<16x1024xf32> -> vector<16x1024xf32>
    %c0_3 = arith.constant 0 : index
    %c0_4 = arith.constant 0 : index
    %3 = vector.load %arg5[%c0_3, %c0_4] : memref<1x1024xf32, #tpu.memory_space<vmem>>, vector<1x1024xf32>
    %4 = vector.broadcast %3 : vector<1x1024xf32> to vector<16x1024xf32>
    %5 = arith.addf %2, %4 : vector<16x1024xf32>
    %c0_5 = arith.constant 0 : index
    %c0_6 = arith.constant 0 : index
    %6 = vector.load %arg9[%c0_5, %c0_6] : memref<16x1024xf32, #tpu.memory_space<vmem>>, vector<16x1024xf32>
    tpu.vector_store %arg9[%c0_5, %c0_6], %5 {strides = array<i32>} : memref<16x1024xf32, #tpu.memory_space<vmem>>, vector<16x1024xf32>,
    %c0_7 = arith.constant 0 : index
    %c0_8 = arith.constant 0 : index
    %7 = vector.load %arg4[%c0_7, %c0_8] : memref<256x1024xbf16, #tpu.memory_space<vmem>>, vector<256x1024xbf16>
    %cst_9 = arith.constant 0.000000e+00 : f32
    %8 = vector.broadcast %cst_9 : f32 to vector<2x128xf32>
    %cst_10 = arith.constant 0.000000e+00 : f32
    %9 = vector.broadcast %cst_10 : f32 to vector<2x128xf32>
    %cst_11 = arith.constant 0.000000e+00 : f32
    %10 = vector.broadcast %cst_11 : f32 to vector<2x128xf32>
    %cst_12 = arith.constant 0.000000e+00 : f32
    %11 = vector.broadcast %cst_12 : f32 to vector<2x128xf32>
    %12 = tpu.concatenate %8, %9 in 1 : vector<2x128xf32>, vector<2x128xf32> -> vector<2x256xf32>
    %13 = arith.truncf %12 : vector<2x256xf32> to vector<2x256xbf16>
    %cst_13 = arith.constant dense<0.000000e+00> : vector<2x1024xf32>
    %14 = tpu.matmul %13, %7, %cst_13 {dimension_numbers = #tpu.dot_dimension_numbers<[1], [0], [0], [1], [0, 0, 1, 1], [], []>} : vector<2x256xbf16>, vector<256x1024xbf16>, vector<2x1024xf32> -> vector<2x1024xf32>
    %15 = vector.extract_strided_slice %14 {offsets = [0, 0], sizes = [2, 512], strides = [1, 1]} : vector<2x1024xf32> to vector<2x512xf32>
    %c0_14 = arith.constant 0 : index
    %c0_15 = arith.constant 0 : index
    %16 = vector.load %arg9[%c0_14, %c0_15] : memref<16x1024xf32, #tpu.memory_space<vmem>>, vector<2x512xf32>
    %17 = arith.addf %15, %16 : vector<2x512xf32>
    %18 = vector.extract_strided_slice %14 {offsets = [0, 512], sizes = [2, 512], strides = [1, 1]} : vector<2x1024xf32> to vector<2x512xf32>
    %c14 = arith.constant 14 : index
    %c512 = arith.constant 512 : index
    %19 = vector.load %arg9[%c14, %c512] : memref<16x1024xf32, #tpu.memory_space<vmem>>, vector<2x512xf32>
    %20 = arith.addf %18, %19 : vector<2x512xf32>
    %21 = vector.extract_strided_slice %17 {offsets = [0, 0], sizes = [2, 384], strides = [1, 1]} : vector<2x512xf32> to vector<2x384xf32>
    %22 = arith.negf %21 : vector<2x384xf32>
    %23 = math.exp %22 : vector<2x384xf32>
    %cst_16 = arith.constant 1.000000e+00 : f32
    %24 = vector.broadcast %cst_16 : f32 to vector<2x384xf32>
    %25 = arith.addf %24, %23 : vector<2x384xf32>
    %26 = arith.divf %24, %25 : vector<2x384xf32>
    %27 = vector.extract_strided_slice %26 {offsets = [0, 0], sizes = [2, 128], strides = [1, 1]} : vector<2x384xf32> to vector<2x128xf32>
    %28 = vector.extract_strided_slice %26 {offsets = [0, 128], sizes = [2, 128], strides = [1, 1]} : vector<2x384xf32> to vector<2x128xf32>
    %29 = vector.extract_strided_slice %26 {offsets = [0, 256], sizes = [2, 128], strides = [1, 1]} : vector<2x384xf32> to vector<2x128xf32>
    %30 = vector.extract_strided_slice %17 {offsets = [0, 384], sizes = [2, 128], strides = [1, 1]} : vector<2x512xf32> to vector<2x128xf32>
    %31 = math.tanh %30 : vector<2x128xf32>
    %32 = arith.mulf %28, %10 : vector<2x128xf32>
    %33 = arith.mulf %27, %31 : vector<2x128xf32>
    %34 = arith.addf %32, %33 : vector<2x128xf32>
    %35 = math.tanh %34 : vector<2x128xf32>
    %36 = arith.mulf %29, %35 : vector<2x128xf32>
    %37 = vector.extract_strided_slice %20 {offsets = [0, 0], sizes = [2, 384], strides = [1, 1]} : vector<2x512xf32> to vector<2x384xf32>
    %38 = arith.negf %37 : vector<2x384xf32>
    %39 = math.exp %38 : vector<2x384xf32>
    %cst_17 = arith.constant 1.000000e+00 : f32
    %40 = vector.broadcast %cst_17 : f32 to vector<2x384xf32>
    %41 = arith.addf %40, %39 : vector<2x384xf32>
    %42 = arith.divf %40, %41 : vector<2x384xf32>
    %43 = vector.extract_strided_slice %42 {offsets = [0, 0], sizes = [2, 128], strides = [1, 1]} : vector<2x384xf32> to vector<2x128xf32>
    %44 = vector.extract_strided_slice %42 {offsets = [0, 128], sizes = [2, 128], strides = [1, 1]} : vector<2x384xf32> to vector<2x128xf32>
    %45 = vector.extract_strided_slice %42 {offsets = [0, 256], sizes = [2, 128], strides = [1, 1]} : vector<2x384xf32> to vector<2x128xf32>
    %46 = vector.extract_strided_slice %20 {offsets = [0, 384], sizes = [2, 128], strides = [1, 1]} : vector<2x512xf32> to vector<2x128xf32>
    %47 = math.tanh %46 : vector<2x128xf32>
    %48 = arith.mulf %44, %11 : vector<2x128xf32>
    %49 = arith.mulf %43, %47 : vector<2x128xf32>
    %50 = arith.addf %48, %49 : vector<2x128xf32>
    %51 = math.tanh %50 : vector<2x128xf32>
    %52 = arith.mulf %45, %51 : vector<2x128xf32>
    %c0_18 = arith.constant 0 : index
    %c0_19 = arith.constant 0 : index
    %53 = vector.load %arg10[%c0_18, %c0_19] : memref<16x256xf32, #tpu.memory_space<vmem>>, vector<2x128xf32>
    tpu.vector_store %arg10[%c0_18, %c0_19], %36 {strides = array<i32>} : memref<16x256xf32, #tpu.memory_space<vmem>>, vector<2x128xf32>,
    %c14_20 = arith.constant 14 : index
    %c128 = arith.constant 128 : index
    %54 = vector.load %arg10[%c14_20, %c128] : memref<16x256xf32, #tpu.memory_space<vmem>>, vector<2x128xf32>
    tpu.vector_store %arg10[%c14_20, %c128], %52 {strides = array<i32>} : memref<16x256xf32, #tpu.memory_space<vmem>>, vector<2x128xf32>,
    %55 = tpu.concatenate %36, %52 in 1 : vector<2x128xf32>, vector<2x128xf32> -> vector<2x256xf32>
    %56 = arith.truncf %55 : vector<2x256xf32> to vector<2x256xbf16>
    %cst_21 = arith.constant dense<0.000000e+00> : vector<2x1024xf32>
    %57 = tpu.matmul %56, %7, %cst_21 {dimension_numbers = #tpu.dot_dimension_numbers<[1], [0], [0], [1], [0, 0, 1, 1], [], []>} : vector<2x256xbf16>, vector<256x1024xbf16>, vector<2x1024xf32> -> vector<2x1024xf32>
    %58 = vector.extract_strided_slice %57 {offsets = [0, 0], sizes = [2, 512], strides = [1, 1]} : vector<2x1024xf32> to vector<2x512xf32>
    %c2 = arith.constant 2 : index
    %c0_22 = arith.constant 0 : index
    %59 = vector.load %arg9[%c2, %c0_22] : memref<16x1024xf32, #tpu.memory_space<vmem>>, vector<2x512xf32>
    %60 = arith.addf %58, %59 : vector<2x512xf32>
    %61 = vector.extract_strided_slice %57 {offsets = [0, 512], sizes = [2, 512], strides = [1, 1]} : vector<2x1024xf32> to vector<2x512xf32>
    %c12 = arith.constant 12 : index
    %c512_23 = arith.constant 512 : index
    %62 = vector.load %arg9[%c12, %c512_23] : memref<16x1024xf32, #tpu.memory_space<vmem>>, vector<2x512xf32>
    %63 = arith.addf %61, %62 : vector<2x512xf32>
    %64 = vector.extract_strided_slice %60 {offsets = [0, 0], sizes = [2, 384], strides = [1, 1]} : vector<2x512xf32> to vector<2x384xf32>
    %65 = arith.negf %64 : vector<2x384xf32>
    %66 = math.exp %65 : vector<2x384xf32>
    %cst_24 = arith.constant 1.000000e+00 : f32
    %67 = vector.broadcast %cst_24 : f32 to vector<2x384xf32>
    %68 = arith.addf %67, %66 : vector<2x384xf32>
    %69 = arith.divf %67, %68 : vector<2x384xf32>
    %70 = vector.extract_strided_slice %69 {offsets = [0, 0], sizes = [2, 128], strides = [1, 1]} : vector<2x384xf32> to vector<2x128xf32>
    %71 = vector.extract_strided_slice %69 {offsets = [0, 128], sizes = [2, 128], strides = [1, 1]} : vector<2x384xf32> to vector<2x128xf32>
    %72 = vector.extract_strided_slice %69 {offsets = [0, 256], sizes = [2, 128], strides = [1, 1]} : vector<2x384xf32> to vector<2x128xf32>
    %73 = vector.extract_strided_slice %60 {offsets = [0, 384], sizes = [2, 128], strides = [1, 1]} : vector<2x512xf32> to vector<2x128xf32>
    %74 = math.tanh %73 : vector<2x128xf32>
    %75 = arith.mulf %71, %34 : vector<2x128xf32>
    %76 = arith.mulf %70, %74 : vector<2x128xf32>
    %77 = arith.addf %75, %76 : vector<2x128xf32>
    %78 = math.tanh %77 : vector<2x128xf32>
    %79 = arith.mulf %72, %78 : vector<2x128xf32>
    %80 = vector.extract_strided_slice %63 {offsets = [0, 0], sizes = [2, 384], strides = [1, 1]} : vector<2x512xf32> to vector<2x384xf32>
    %81 = arith.negf %80 : vector<2x384xf32>
    %82 = math.exp %81 : vector<2x384xf32>
    %cst_25 = arith.constant 1.000000e+00 : f32
    %83 = vector.broadcast %cst_25 : f32 to vector<2x384xf32>
    %84 = arith.addf %83, %82 : vector<2x384xf32>
    %85 = arith.divf %83, %84 : vector<2x384xf32>
    %86 = vector.extract_strided_slice %85 {offsets = [0, 0], sizes = [2, 128], strides = [1, 1]} : vector<2x384xf32> to vector<2x128xf32>
    %87 = vector.extract_strided_slice %85 {offsets = [0, 128], sizes = [2, 128], strides = [1, 1]} : vector<2x384xf32> to vector<2x128xf32>
    %88 = vector.extract_strided_slice %85 {offsets = [0, 256], sizes = [2, 128], strides = [1, 1]} : vector<2x384xf32> to vector<2x128xf32>
    %89 = vector.extract_strided_slice %63 {offsets = [0, 384], sizes = [2, 128], strides = [1, 1]} : vector<2x512xf32> to vector<2x128xf32>
    %90 = math.tanh %89 : vector<2x128xf32>
    %91 = arith.mulf %87, %50 : vector<2x128xf32>
    %92 = arith.mulf %86, %90 : vector<2x128xf32>
    %93 = arith.addf %91, %92 : vector<2x128xf32>
    %94 = math.tanh %93 : vector<2x128xf32>
    %95 = arith.mulf %88, %94 : vector<2x128xf32>
    %c2_26 = arith.constant 2 : index
    %c0_27 = arith.constant 0 : index
    %96 = vector.load %arg10[%c2_26, %c0_27] : memref<16x256xf32, #tpu.memory_space<vmem>>, vector<2x128xf32>
    tpu.vector_store %arg10[%c2_26, %c0_27], %79 {strides = array<i32>} : memref<16x256xf32, #tpu.memory_space<vmem>>, vector<2x128xf32>,
    %c12_28 = arith.constant 12 : index
    %c128_29 = arith.constant 128 : index
    %97 = vector.load %arg10[%c12_28, %c128_29] : memref<16x256xf32, #tpu.memory_space<vmem>>, vector<2x128xf32>
    tpu.vector_store %arg10[%c12_28, %c128_29], %95 {strides = array<i32>} : memref<16x256xf32, #tpu.memory_space<vmem>>, vector<2x128xf32>,
    %98 = tpu.concatenate %79, %95 in 1 : vector<2x128xf32>, vector<2x128xf32> -> vector<2x256xf32>
    %99 = arith.truncf %98 : vector<2x256xf32> to vector<2x256xbf16>
    %cst_30 = arith.constant dense<0.000000e+00> : vector<2x1024xf32>
    %100 = tpu.matmul %99, %7, %cst_30 {dimension_numbers = #tpu.dot_dimension_numbers<[1], [0], [0], [1], [0, 0, 1, 1], [], []>} : vector<2x256xbf16>, vector<256x1024xbf16>, vector<2x1024xf32> -> vector<2x1024xf32>
    %101 = vector.extract_strided_slice %100 {offsets = [0, 0], sizes = [2, 512], strides = [1, 1]} : vector<2x1024xf32> to vector<2x512xf32>
    %c4 = arith.constant 4 : index
    %c0_31 = arith.constant 0 : index
    %102 = vector.load %arg9[%c4, %c0_31] : memref<16x1024xf32, #tpu.memory_space<vmem>>, vector<2x512xf32>
    %103 = arith.addf %101, %102 : vector<2x512xf32>
    %104 = vector.extract_strided_slice %100 {offsets = [0, 512], sizes = [2, 512], strides = [1, 1]} : vector<2x1024xf32> to vector<2x512xf32>
    %c10 = arith.constant 10 : index
    %c512_32 = arith.constant 512 : index
    %105 = vector.load %arg9[%c10, %c512_32] : memref<16x1024xf32, #tpu.memory_space<vmem>>, vector<2x512xf32>
    %106 = arith.addf %104, %105 : vector<2x512xf32>
    %107 = vector.extract_strided_slice %103 {offsets = [0, 0], sizes = [2, 384], strides = [1, 1]} : vector<2x512xf32> to vector<2x384xf32>
    %108 = arith.negf %107 : vector<2x384xf32>
    %109 = math.exp %108 : vector<2x384xf32>
    %cst_33 = arith.constant 1.000000e+00 : f32
    %110 = vector.broadcast %cst_33 : f32 to vector<2x384xf32>
    %111 = arith.addf %110, %109 : vector<2x384xf32>
    %112 = arith.divf %110, %111 : vector<2x384xf32>
    %113 = vector.extract_strided_slice %112 {offsets = [0, 0], sizes = [2, 128], strides = [1, 1]} : vector<2x384xf32> to vector<2x128xf32>
    %114 = vector.extract_strided_slice %112 {offsets = [0, 128], sizes = [2, 128], strides = [1, 1]} : vector<2x384xf32> to vector<2x128xf32>
    %115 = vector.extract_strided_slice %112 {offsets = [0, 256], sizes = [2, 128], strides = [1, 1]} : vector<2x384xf32> to vector<2x128xf32>
    %116 = vector.extract_strided_slice %103 {offsets = [0, 384], sizes = [2, 128], strides = [1, 1]} : vector<2x512xf32> to vector<2x128xf32>
    %117 = math.tanh %116 : vector<2x128xf32>
    %118 = arith.mulf %114, %77 : vector<2x128xf32>
    %119 = arith.mulf %113, %117 : vector<2x128xf32>
    %120 = arith.addf %118, %119 : vector<2x128xf32>
    %121 = math.tanh %120 : vector<2x128xf32>
    %122 = arith.mulf %115, %121 : vector<2x128xf32>
    %123 = vector.extract_strided_slice %106 {offsets = [0, 0], sizes = [2, 384], strides = [1, 1]} : vector<2x512xf32> to vector<2x384xf32>
    %124 = arith.negf %123 : vector<2x384xf32>
    %125 = math.exp %124 : vector<2x384xf32>
    %cst_34 = arith.constant 1.000000e+00 : f32
    %126 = vector.broadcast %cst_34 : f32 to vector<2x384xf32>
    %127 = arith.addf %126, %125 : vector<2x384xf32>
    %128 = arith.divf %126, %127 : vector<2x384xf32>
    %129 = vector.extract_strided_slice %128 {offsets = [0, 0], sizes = [2, 128], strides = [1, 1]} : vector<2x384xf32> to vector<2x128xf32>
    %130 = vector.extract_strided_slice %128 {offsets = [0, 128], sizes = [2, 128], strides = [1, 1]} : vector<2x384xf32> to vector<2x128xf32>
    %131 = vector.extract_strided_slice %128 {offsets = [0, 256], sizes = [2, 128], strides = [1, 1]} : vector<2x384xf32> to vector<2x128xf32>
    %132 = vector.extract_strided_slice %106 {offsets = [0, 384], sizes = [2, 128], strides = [1, 1]} : vector<2x512xf32> to vector<2x128xf32>
    %133 = math.tanh %132 : vector<2x128xf32>
    %134 = arith.mulf %130, %93 : vector<2x128xf32>
    %135 = arith.mulf %129, %133 : vector<2x128xf32>
    %136 = arith.addf %134, %135 : vector<2x128xf32>
    %137 = math.tanh %136 : vector<2x128xf32>
    %138 = arith.mulf %131, %137 : vector<2x128xf32>
    %c4_35 = arith.constant 4 : index
    %c0_36 = arith.constant 0 : index
    %139 = vector.load %arg10[%c4_35, %c0_36] : memref<16x256xf32, #tpu.memory_space<vmem>>, vector<2x128xf32>
    tpu.vector_store %arg10[%c4_35, %c0_36], %122 {strides = array<i32>} : memref<16x256xf32, #tpu.memory_space<vmem>>, vector<2x128xf32>,
    %c10_37 = arith.constant 10 : index
    %c128_38 = arith.constant 128 : index
    %140 = vector.load %arg10[%c10_37, %c128_38] : memref<16x256xf32, #tpu.memory_space<vmem>>, vector<2x128xf32>
    tpu.vector_store %arg10[%c10_37, %c128_38], %138 {strides = array<i32>} : memref<16x256xf32, #tpu.memory_space<vmem>>, vector<2x128xf32>,
    %141 = tpu.concatenate %122, %138 in 1 : vector<2x128xf32>, vector<2x128xf32> -> vector<2x256xf32>
    %142 = arith.truncf %141 : vector<2x256xf32> to vector<2x256xbf16>
    %cst_39 = arith.constant dense<0.000000e+00> : vector<2x1024xf32>
    %143 = tpu.matmul %142, %7, %cst_39 {dimension_numbers = #tpu.dot_dimension_numbers<[1], [0], [0], [1], [0, 0, 1, 1], [], []>} : vector<2x256xbf16>, vector<256x1024xbf16>, vector<2x1024xf32> -> vector<2x1024xf32>
    %144 = vector.extract_strided_slice %143 {offsets = [0, 0], sizes = [2, 512], strides = [1, 1]} : vector<2x1024xf32> to vector<2x512xf32>
    %c6 = arith.constant 6 : index
    %c0_40 = arith.constant 0 : index
    %145 = vector.load %arg9[%c6, %c0_40] : memref<16x1024xf32, #tpu.memory_space<vmem>>, vector<2x512xf32>
    %146 = arith.addf %144, %145 : vector<2x512xf32>
    %147 = vector.extract_strided_slice %143 {offsets = [0, 512], sizes = [2, 512], strides = [1, 1]} : vector<2x1024xf32> to vector<2x512xf32>
    %c8 = arith.constant 8 : index
    %c512_41 = arith.constant 512 : index
    %148 = vector.load %arg9[%c8, %c512_41] : memref<16x1024xf32, #tpu.memory_space<vmem>>, vector<2x512xf32>
    %149 = arith.addf %147, %148 : vector<2x512xf32>
    %150 = vector.extract_strided_slice %146 {offsets = [0, 0], sizes = [2, 384], strides = [1, 1]} : vector<2x512xf32> to vector<2x384xf32>
    %151 = arith.negf %150 : vector<2x384xf32>
    %152 = math.exp %151 : vector<2x384xf32>
    %cst_42 = arith.constant 1.000000e+00 : f32
    %153 = vector.broadcast %cst_42 : f32 to vector<2x384xf32>
    %154 = arith.addf %153, %152 : vector<2x384xf32>
    %155 = arith.divf %153, %154 : vector<2x384xf32>
    %156 = vector.extract_strided_slice %155 {offsets = [0, 0], sizes = [2, 128], strides = [1, 1]} : vector<2x384xf32> to vector<2x128xf32>
    %157 = vector.extract_strided_slice %155 {offsets = [0, 128], sizes = [2, 128], strides = [1, 1]} : vector<2x384xf32> to vector<2x128xf32>
    %158 = vector.extract_strided_slice %155 {offsets = [0, 256], sizes = [2, 128], strides = [1, 1]} : vector<2x384xf32> to vector<2x128xf32>
    %159 = vector.extract_strided_slice %146 {offsets = [0, 384], sizes = [2, 128], strides = [1, 1]} : vector<2x512xf32> to vector<2x128xf32>
    %160 = math.tanh %159 : vector<2x128xf32>
    %161 = arith.mulf %157, %120 : vector<2x128xf32>
    %162 = arith.mulf %156, %160 : vector<2x128xf32>
    %163 = arith.addf %161, %162 : vector<2x128xf32>
    %164 = math.tanh %163 : vector<2x128xf32>
    %165 = arith.mulf %158, %164 : vector<2x128xf32>
    %166 = vector.extract_strided_slice %149 {offsets = [0, 0], sizes = [2, 384], strides = [1, 1]} : vector<2x512xf32> to vector<2x384xf32>
    %167 = arith.negf %166 : vector<2x384xf32>
    %168 = math.exp %167 : vector<2x384xf32>
    %cst_43 = arith.constant 1.000000e+00 : f32
    %169 = vector.broadcast %cst_43 : f32 to vector<2x384xf32>
    %170 = arith.addf %169, %168 : vector<2x384xf32>
    %171 = arith.divf %169, %170 : vector<2x384xf32>
    %172 = vector.extract_strided_slice %171 {offsets = [0, 0], sizes = [2, 128], strides = [1, 1]} : vector<2x384xf32> to vector<2x128xf32>
    %173 = vector.extract_strided_slice %171 {offsets = [0, 128], sizes = [2, 128], strides = [1, 1]} : vector<2x384xf32> to vector<2x128xf32>
    %174 = vector.extract_strided_slice %171 {offsets = [0, 256], sizes = [2, 128], strides = [1, 1]} : vector<2x384xf32> to vector<2x128xf32>
    %175 = vector.extract_strided_slice %149 {offsets = [0, 384], sizes = [2, 128], strides = [1, 1]} : vector<2x512xf32> to vector<2x128xf32>
    %176 = math.tanh %175 : vector<2x128xf32>
    %177 = arith.mulf %173, %136 : vector<2x128xf32>
    %178 = arith.mulf %172, %176 : vector<2x128xf32>
    %179 = arith.addf %177, %178 : vector<2x128xf32>
    %180 = math.tanh %179 : vector<2x128xf32>
    %181 = arith.mulf %174, %180 : vector<2x128xf32>
    %c6_44 = arith.constant 6 : index
    %c0_45 = arith.constant 0 : index
    %182 = vector.load %arg10[%c6_44, %c0_45] : memref<16x256xf32, #tpu.memory_space<vmem>>, vector<2x128xf32>
    tpu.vector_store %arg10[%c6_44, %c0_45], %165 {strides = array<i32>} : memref<16x256xf32, #tpu.memory_space<vmem>>, vector<2x128xf32>,
    %c8_46 = arith.constant 8 : index
    %c128_47 = arith.constant 128 : index
    %183 = vector.load %arg10[%c8_46, %c128_47] : memref<16x256xf32, #tpu.memory_space<vmem>>, vector<2x128xf32>
    tpu.vector_store %arg10[%c8_46, %c128_47], %181 {strides = array<i32>} : memref<16x256xf32, #tpu.memory_space<vmem>>, vector<2x128xf32>,
    %184 = tpu.concatenate %165, %181 in 1 : vector<2x128xf32>, vector<2x128xf32> -> vector<2x256xf32>
    %185 = arith.truncf %184 : vector<2x256xf32> to vector<2x256xbf16>
    %cst_48 = arith.constant dense<0.000000e+00> : vector<2x1024xf32>
    %186 = tpu.matmul %185, %7, %cst_48 {dimension_numbers = #tpu.dot_dimension_numbers<[1], [0], [0], [1], [0, 0, 1, 1], [], []>} : vector<2x256xbf16>, vector<256x1024xbf16>, vector<2x1024xf32> -> vector<2x1024xf32>
    %187 = vector.extract_strided_slice %186 {offsets = [0, 0], sizes = [2, 512], strides = [1, 1]} : vector<2x1024xf32> to vector<2x512xf32>
    %c8_49 = arith.constant 8 : index
    %c0_50 = arith.constant 0 : index
    %188 = vector.load %arg9[%c8_49, %c0_50] : memref<16x1024xf32, #tpu.memory_space<vmem>>, vector<2x512xf32>
    %189 = arith.addf %187, %188 : vector<2x512xf32>
    %190 = vector.extract_strided_slice %186 {offsets = [0, 512], sizes = [2, 512], strides = [1, 1]} : vector<2x1024xf32> to vector<2x512xf32>
    %c6_51 = arith.constant 6 : index
    %c512_52 = arith.constant 512 : index
    %191 = vector.load %arg9[%c6_51, %c512_52] : memref<16x1024xf32, #tpu.memory_space<vmem>>, vector<2x512xf32>
    %192 = arith.addf %190, %191 : vector<2x512xf32>
    %193 = vector.extract_strided_slice %189 {offsets = [0, 0], sizes = [2, 384], strides = [1, 1]} : vector<2x512xf32> to vector<2x384xf32>
    %194 = arith.negf %193 : vector<2x384xf32>
    %195 = math.exp %194 : vector<2x384xf32>
    %cst_53 = arith.constant 1.000000e+00 : f32
    %196 = vector.broadcast %cst_53 : f32 to vector<2x384xf32>
    %197 = arith.addf %196, %195 : vector<2x384xf32>
    %198 = arith.divf %196, %197 : vector<2x384xf32>
    %199 = vector.extract_strided_slice %198 {offsets = [0, 0], sizes = [2, 128], strides = [1, 1]} : vector<2x384xf32> to vector<2x128xf32>
    %200 = vector.extract_strided_slice %198 {offsets = [0, 128], sizes = [2, 128], strides = [1, 1]} : vector<2x384xf32> to vector<2x128xf32>
    %201 = vector.extract_strided_slice %198 {offsets = [0, 256], sizes = [2, 128], strides = [1, 1]} : vector<2x384xf32> to vector<2x128xf32>
    %202 = vector.extract_strided_slice %189 {offsets = [0, 384], sizes = [2, 128], strides = [1, 1]} : vector<2x512xf32> to vector<2x128xf32>
    %203 = math.tanh %202 : vector<2x128xf32>
    %204 = arith.mulf %200, %163 : vector<2x128xf32>
    %205 = arith.mulf %199, %203 : vector<2x128xf32>
    %206 = arith.addf %204, %205 : vector<2x128xf32>
    %207 = math.tanh %206 : vector<2x128xf32>
    %208 = arith.mulf %201, %207 : vector<2x128xf32>
    %209 = vector.extract_strided_slice %192 {offsets = [0, 0], sizes = [2, 384], strides = [1, 1]} : vector<2x512xf32> to vector<2x384xf32>
    %210 = arith.negf %209 : vector<2x384xf32>
    %211 = math.exp %210 : vector<2x384xf32>
    %cst_54 = arith.constant 1.000000e+00 : f32
    %212 = vector.broadcast %cst_54 : f32 to vector<2x384xf32>
    %213 = arith.addf %212, %211 : vector<2x384xf32>
    %214 = arith.divf %212, %213 : vector<2x384xf32>
    %215 = vector.extract_strided_slice %214 {offsets = [0, 0], sizes = [2, 128], strides = [1, 1]} : vector<2x384xf32> to vector<2x128xf32>
    %216 = vector.extract_strided_slice %214 {offsets = [0, 128], sizes = [2, 128], strides = [1, 1]} : vector<2x384xf32> to vector<2x128xf32>
    %217 = vector.extract_strided_slice %214 {offsets = [0, 256], sizes = [2, 128], strides = [1, 1]} : vector<2x384xf32> to vector<2x128xf32>
    %218 = vector.extract_strided_slice %192 {offsets = [0, 384], sizes = [2, 128], strides = [1, 1]} : vector<2x512xf32> to vector<2x128xf32>
    %219 = math.tanh %218 : vector<2x128xf32>
    %220 = arith.mulf %216, %179 : vector<2x128xf32>
    %221 = arith.mulf %215, %219 : vector<2x128xf32>
    %222 = arith.addf %220, %221 : vector<2x128xf32>
    %223 = math.tanh %222 : vector<2x128xf32>
    %224 = arith.mulf %217, %223 : vector<2x128xf32>
    %c8_55 = arith.constant 8 : index
    %c0_56 = arith.constant 0 : index
    %225 = vector.load %arg10[%c8_55, %c0_56] : memref<16x256xf32, #tpu.memory_space<vmem>>, vector<2x128xf32>
    tpu.vector_store %arg10[%c8_55, %c0_56], %208 {strides = array<i32>} : memref<16x256xf32, #tpu.memory_space<vmem>>, vector<2x128xf32>,
    %c6_57 = arith.constant 6 : index
    %c128_58 = arith.constant 128 : index
    %226 = vector.load %arg10[%c6_57, %c128_58] : memref<16x256xf32, #tpu.memory_space<vmem>>, vector<2x128xf32>
    tpu.vector_store %arg10[%c6_57, %c128_58], %224 {strides = array<i32>} : memref<16x256xf32, #tpu.memory_space<vmem>>, vector<2x128xf32>,
    %227 = tpu.concatenate %208, %224 in 1 : vector<2x128xf32>, vector<2x128xf32> -> vector<2x256xf32>
    %228 = arith.truncf %227 : vector<2x256xf32> to vector<2x256xbf16>
    %cst_59 = arith.constant dense<0.000000e+00> : vector<2x1024xf32>
    %229 = tpu.matmul %228, %7, %cst_59 {dimension_numbers = #tpu.dot_dimension_numbers<[1], [0], [0], [1], [0, 0, 1, 1], [], []>} : vector<2x256xbf16>, vector<256x1024xbf16>, vector<2x1024xf32> -> vector<2x1024xf32>
    %230 = vector.extract_strided_slice %229 {offsets = [0, 0], sizes = [2, 512], strides = [1, 1]} : vector<2x1024xf32> to vector<2x512xf32>
    %c10_60 = arith.constant 10 : index
    %c0_61 = arith.constant 0 : index
    %231 = vector.load %arg9[%c10_60, %c0_61] : memref<16x1024xf32, #tpu.memory_space<vmem>>, vector<2x512xf32>
    %232 = arith.addf %230, %231 : vector<2x512xf32>
    %233 = vector.extract_strided_slice %229 {offsets = [0, 512], sizes = [2, 512], strides = [1, 1]} : vector<2x1024xf32> to vector<2x512xf32>
    %c4_62 = arith.constant 4 : index
    %c512_63 = arith.constant 512 : index
    %234 = vector.load %arg9[%c4_62, %c512_63] : memref<16x1024xf32, #tpu.memory_space<vmem>>, vector<2x512xf32>
    %235 = arith.addf %233, %234 : vector<2x512xf32>
    %236 = vector.extract_strided_slice %232 {offsets = [0, 0], sizes = [2, 384], strides = [1, 1]} : vector<2x512xf32> to vector<2x384xf32>
    %237 = arith.negf %236 : vector<2x384xf32>
    %238 = math.exp %237 : vector<2x384xf32>
    %cst_64 = arith.constant 1.000000e+00 : f32
    %239 = vector.broadcast %cst_64 : f32 to vector<2x384xf32>
    %240 = arith.addf %239, %238 : vector<2x384xf32>
    %241 = arith.divf %239, %240 : vector<2x384xf32>
    %242 = vector.extract_strided_slice %241 {offsets = [0, 0], sizes = [2, 128], strides = [1, 1]} : vector<2x384xf32> to vector<2x128xf32>
    %243 = vector.extract_strided_slice %241 {offsets = [0, 128], sizes = [2, 128], strides = [1, 1]} : vector<2x384xf32> to vector<2x128xf32>
    %244 = vector.extract_strided_slice %241 {offsets = [0, 256], sizes = [2, 128], strides = [1, 1]} : vector<2x384xf32> to vector<2x128xf32>
    %245 = vector.extract_strided_slice %232 {offsets = [0, 384], sizes = [2, 128], strides = [1, 1]} : vector<2x512xf32> to vector<2x128xf32>
    %246 = math.tanh %245 : vector<2x128xf32>
    %247 = arith.mulf %243, %206 : vector<2x128xf32>
    %248 = arith.mulf %242, %246 : vector<2x128xf32>
    %249 = arith.addf %247, %248 : vector<2x128xf32>
    %250 = math.tanh %249 : vector<2x128xf32>
    %251 = arith.mulf %244, %250 : vector<2x128xf32>
    %252 = vector.extract_strided_slice %235 {offsets = [0, 0], sizes = [2, 384], strides = [1, 1]} : vector<2x512xf32> to vector<2x384xf32>
    %253 = arith.negf %252 : vector<2x384xf32>
    %254 = math.exp %253 : vector<2x384xf32>
    %cst_65 = arith.constant 1.000000e+00 : f32
    %255 = vector.broadcast %cst_65 : f32 to vector<2x384xf32>
    %256 = arith.addf %255, %254 : vector<2x384xf32>
    %257 = arith.divf %255, %256 : vector<2x384xf32>
    %258 = vector.extract_strided_slice %257 {offsets = [0, 0], sizes = [2, 128], strides = [1, 1]} : vector<2x384xf32> to vector<2x128xf32>
    %259 = vector.extract_strided_slice %257 {offsets = [0, 128], sizes = [2, 128], strides = [1, 1]} : vector<2x384xf32> to vector<2x128xf32>
    %260 = vector.extract_strided_slice %257 {offsets = [0, 256], sizes = [2, 128], strides = [1, 1]} : vector<2x384xf32> to vector<2x128xf32>
    %261 = vector.extract_strided_slice %235 {offsets = [0, 384], sizes = [2, 128], strides = [1, 1]} : vector<2x512xf32> to vector<2x128xf32>
    %262 = math.tanh %261 : vector<2x128xf32>
    %263 = arith.mulf %259, %222 : vector<2x128xf32>
    %264 = arith.mulf %258, %262 : vector<2x128xf32>
    %265 = arith.addf %263, %264 : vector<2x128xf32>
    %266 = math.tanh %265 : vector<2x128xf32>
    %267 = arith.mulf %260, %266 : vector<2x128xf32>
    %c10_66 = arith.constant 10 : index
    %c0_67 = arith.constant 0 : index
    %268 = vector.load %arg10[%c10_66, %c0_67] : memref<16x256xf32, #tpu.memory_space<vmem>>, vector<2x128xf32>
    tpu.vector_store %arg10[%c10_66, %c0_67], %251 {strides = array<i32>} : memref<16x256xf32, #tpu.memory_space<vmem>>, vector<2x128xf32>,
    %c4_68 = arith.constant 4 : index
    %c128_69 = arith.constant 128 : index
    %269 = vector.load %arg10[%c4_68, %c128_69] : memref<16x256xf32, #tpu.memory_space<vmem>>, vector<2x128xf32>
    tpu.vector_store %arg10[%c4_68, %c128_69], %267 {strides = array<i32>} : memref<16x256xf32, #tpu.memory_space<vmem>>, vector<2x128xf32>,
    %270 = tpu.concatenate %251, %267 in 1 : vector<2x128xf32>, vector<2x128xf32> -> vector<2x256xf32>
    %271 = arith.truncf %270 : vector<2x256xf32> to vector<2x256xbf16>
    %cst_70 = arith.constant dense<0.000000e+00> : vector<2x1024xf32>
    %272 = tpu.matmul %271, %7, %cst_70 {dimension_numbers = #tpu.dot_dimension_numbers<[1], [0], [0], [1], [0, 0, 1, 1], [], []>} : vector<2x256xbf16>, vector<256x1024xbf16>, vector<2x1024xf32> -> vector<2x1024xf32>
    %273 = vector.extract_strided_slice %272 {offsets = [0, 0], sizes = [2, 512], strides = [1, 1]} : vector<2x1024xf32> to vector<2x512xf32>
    %c12_71 = arith.constant 12 : index
    %c0_72 = arith.constant 0 : index
    %274 = vector.load %arg9[%c12_71, %c0_72] : memref<16x1024xf32, #tpu.memory_space<vmem>>, vector<2x512xf32>
    %275 = arith.addf %273, %274 : vector<2x512xf32>
    %276 = vector.extract_strided_slice %272 {offsets = [0, 512], sizes = [2, 512], strides = [1, 1]} : vector<2x1024xf32> to vector<2x512xf32>
    %c2_73 = arith.constant 2 : index
    %c512_74 = arith.constant 512 : index
    %277 = vector.load %arg9[%c2_73, %c512_74] : memref<16x1024xf32, #tpu.memory_space<vmem>>, vector<2x512xf32>
    %278 = arith.addf %276, %277 : vector<2x512xf32>
    %279 = vector.extract_strided_slice %275 {offsets = [0, 0], sizes = [2, 384], strides = [1, 1]} : vector<2x512xf32> to vector<2x384xf32>
    %280 = arith.negf %279 : vector<2x384xf32>
    %281 = math.exp %280 : vector<2x384xf32>
    %cst_75 = arith.constant 1.000000e+00 : f32
    %282 = vector.broadcast %cst_75 : f32 to vector<2x384xf32>
    %283 = arith.addf %282, %281 : vector<2x384xf32>
    %284 = arith.divf %282, %283 : vector<2x384xf32>
    %285 = vector.extract_strided_slice %284 {offsets = [0, 0], sizes = [2, 128], strides = [1, 1]} : vector<2x384xf32> to vector<2x128xf32>
    %286 = vector.extract_strided_slice %284 {offsets = [0, 128], sizes = [2, 128], strides = [1, 1]} : vector<2x384xf32> to vector<2x128xf32>
    %287 = vector.extract_strided_slice %284 {offsets = [0, 256], sizes = [2, 128], strides = [1, 1]} : vector<2x384xf32> to vector<2x128xf32>
    %288 = vector.extract_strided_slice %275 {offsets = [0, 384], sizes = [2, 128], strides = [1, 1]} : vector<2x512xf32> to vector<2x128xf32>
    %289 = math.tanh %288 : vector<2x128xf32>
    %290 = arith.mulf %286, %249 : vector<2x128xf32>
    %291 = arith.mulf %285, %289 : vector<2x128xf32>
    %292 = arith.addf %290, %291 : vector<2x128xf32>
    %293 = math.tanh %292 : vector<2x128xf32>
    %294 = arith.mulf %287, %293 : vector<2x128xf32>
    %295 = vector.extract_strided_slice %278 {offsets = [0, 0], sizes = [2, 384], strides = [1, 1]} : vector<2x512xf32> to vector<2x384xf32>
    %296 = arith.negf %295 : vector<2x384xf32>
    %297 = math.exp %296 : vector<2x384xf32>
    %cst_76 = arith.constant 1.000000e+00 : f32
    %298 = vector.broadcast %cst_76 : f32 to vector<2x384xf32>
    %299 = arith.addf %298, %297 : vector<2x384xf32>
    %300 = arith.divf %298, %299 : vector<2x384xf32>
    %301 = vector.extract_strided_slice %300 {offsets = [0, 0], sizes = [2, 128], strides = [1, 1]} : vector<2x384xf32> to vector<2x128xf32>
    %302 = vector.extract_strided_slice %300 {offsets = [0, 128], sizes = [2, 128], strides = [1, 1]} : vector<2x384xf32> to vector<2x128xf32>
    %303 = vector.extract_strided_slice %300 {offsets = [0, 256], sizes = [2, 128], strides = [1, 1]} : vector<2x384xf32> to vector<2x128xf32>
    %304 = vector.extract_strided_slice %278 {offsets = [0, 384], sizes = [2, 128], strides = [1, 1]} : vector<2x512xf32> to vector<2x128xf32>
    %305 = math.tanh %304 : vector<2x128xf32>
    %306 = arith.mulf %302, %265 : vector<2x128xf32>
    %307 = arith.mulf %301, %305 : vector<2x128xf32>
    %308 = arith.addf %306, %307 : vector<2x128xf32>
    %309 = math.tanh %308 : vector<2x128xf32>
    %310 = arith.mulf %303, %309 : vector<2x128xf32>
    %c12_77 = arith.constant 12 : index
    %c0_78 = arith.constant 0 : index
    %311 = vector.load %arg10[%c12_77, %c0_78] : memref<16x256xf32, #tpu.memory_space<vmem>>, vector<2x128xf32>
    tpu.vector_store %arg10[%c12_77, %c0_78], %294 {strides = array<i32>} : memref<16x256xf32, #tpu.memory_space<vmem>>, vector<2x128xf32>,
    %c2_79 = arith.constant 2 : index
    %c128_80 = arith.constant 128 : index
    %312 = vector.load %arg10[%c2_79, %c128_80] : memref<16x256xf32, #tpu.memory_space<vmem>>, vector<2x128xf32>
    tpu.vector_store %arg10[%c2_79, %c128_80], %310 {strides = array<i32>} : memref<16x256xf32, #tpu.memory_space<vmem>>, vector<2x128xf32>,
    %313 = tpu.concatenate %294, %310 in 1 : vector<2x128xf32>, vector<2x128xf32> -> vector<2x256xf32>
    %314 = arith.truncf %313 : vector<2x256xf32> to vector<2x256xbf16>
    %cst_81 = arith.constant dense<0.000000e+00> : vector<2x1024xf32>
    %315 = tpu.matmul %314, %7, %cst_81 {dimension_numbers = #tpu.dot_dimension_numbers<[1], [0], [0], [1], [0, 0, 1, 1], [], []>} : vector<2x256xbf16>, vector<256x1024xbf16>, vector<2x1024xf32> -> vector<2x1024xf32>
    %316 = vector.extract_strided_slice %315 {offsets = [0, 0], sizes = [2, 512], strides = [1, 1]} : vector<2x1024xf32> to vector<2x512xf32>
    %c14_82 = arith.constant 14 : index
    %c0_83 = arith.constant 0 : index
    %317 = vector.load %arg9[%c14_82, %c0_83] : memref<16x1024xf32, #tpu.memory_space<vmem>>, vector<2x512xf32>
    %318 = arith.addf %316, %317 : vector<2x512xf32>
    %319 = vector.extract_strided_slice %315 {offsets = [0, 512], sizes = [2, 512], strides = [1, 1]} : vector<2x1024xf32> to vector<2x512xf32>
    %c0_84 = arith.constant 0 : index
    %c512_85 = arith.constant 512 : index
    %320 = vector.load %arg9[%c0_84, %c512_85] : memref<16x1024xf32, #tpu.memory_space<vmem>>, vector<2x512xf32>
    %321 = arith.addf %319, %320 : vector<2x512xf32>
    %322 = vector.extract_strided_slice %318 {offsets = [0, 0], sizes = [2, 384], strides = [1, 1]} : vector<2x512xf32> to vector<2x384xf32>
    %323 = arith.negf %322 : vector<2x384xf32>
    %324 = math.exp %323 : vector<2x384xf32>
    %cst_86 = arith.constant 1.000000e+00 : f32
    %325 = vector.broadcast %cst_86 : f32 to vector<2x384xf32>
    %326 = arith.addf %325, %324 : vector<2x384xf32>
    %327 = arith.divf %325, %326 : vector<2x384xf32>
    %328 = vector.extract_strided_slice %327 {offsets = [0, 0], sizes = [2, 128], strides = [1, 1]} : vector<2x384xf32> to vector<2x128xf32>
    %329 = vector.extract_strided_slice %327 {offsets = [0, 128], sizes = [2, 128], strides = [1, 1]} : vector<2x384xf32> to vector<2x128xf32>
    %330 = vector.extract_strided_slice %327 {offsets = [0, 256], sizes = [2, 128], strides = [1, 1]} : vector<2x384xf32> to vector<2x128xf32>
    %331 = vector.extract_strided_slice %318 {offsets = [0, 384], sizes = [2, 128], strides = [1, 1]} : vector<2x512xf32> to vector<2x128xf32>
    %332 = math.tanh %331 : vector<2x128xf32>
    %333 = arith.mulf %329, %292 : vector<2x128xf32>
    %334 = arith.mulf %328, %332 : vector<2x128xf32>
    %335 = arith.addf %333, %334 : vector<2x128xf32>
    %336 = math.tanh %335 : vector<2x128xf32>
    %337 = arith.mulf %330, %336 : vector<2x128xf32>
    %338 = vector.extract_strided_slice %321 {offsets = [0, 0], sizes = [2, 384], strides = [1, 1]} : vector<2x512xf32> to vector<2x384xf32>
    %339 = arith.negf %338 : vector<2x384xf32>
    %340 = math.exp %339 : vector<2x384xf32>
    %cst_87 = arith.constant 1.000000e+00 : f32
    %341 = vector.broadcast %cst_87 : f32 to vector<2x384xf32>
    %342 = arith.addf %341, %340 : vector<2x384xf32>
    %343 = arith.divf %341, %342 : vector<2x384xf32>
    %344 = vector.extract_strided_slice %343 {offsets = [0, 0], sizes = [2, 128], strides = [1, 1]} : vector<2x384xf32> to vector<2x128xf32>
    %345 = vector.extract_strided_slice %343 {offsets = [0, 128], sizes = [2, 128], strides = [1, 1]} : vector<2x384xf32> to vector<2x128xf32>
    %346 = vector.extract_strided_slice %343 {offsets = [0, 256], sizes = [2, 128], strides = [1, 1]} : vector<2x384xf32> to vector<2x128xf32>
    %347 = vector.extract_strided_slice %321 {offsets = [0, 384], sizes = [2, 128], strides = [1, 1]} : vector<2x512xf32> to vector<2x128xf32>
    %348 = math.tanh %347 : vector<2x128xf32>
    %349 = arith.mulf %345, %308 : vector<2x128xf32>
    %350 = arith.mulf %344, %348 : vector<2x128xf32>
    %351 = arith.addf %349, %350 : vector<2x128xf32>
    %352 = math.tanh %351 : vector<2x128xf32>
    %353 = arith.mulf %346, %352 : vector<2x128xf32>
    %c14_88 = arith.constant 14 : index
    %c0_89 = arith.constant 0 : index
    %354 = vector.load %arg10[%c14_88, %c0_89] : memref<16x256xf32, #tpu.memory_space<vmem>>, vector<2x128xf32>
    tpu.vector_store %arg10[%c14_88, %c0_89], %337 {strides = array<i32>} : memref<16x256xf32, #tpu.memory_space<vmem>>, vector<2x128xf32>,
    %c0_90 = arith.constant 0 : index
    %c128_91 = arith.constant 128 : index
    %355 = vector.load %arg10[%c0_90, %c128_91] : memref<16x256xf32, #tpu.memory_space<vmem>>, vector<2x128xf32>
    tpu.vector_store %arg10[%c0_90, %c128_91], %353 {strides = array<i32>} : memref<16x256xf32, #tpu.memory_space<vmem>>, vector<2x128xf32>,
    %c0_92 = arith.constant 0 : index
    %c0_93 = arith.constant 0 : index
    %356 = vector.load %arg10[%c0_92, %c0_93] : memref<16x256xf32, #tpu.memory_space<vmem>>, vector<16x256xf32>
    %c0_94 = arith.constant 0 : index
    %c0_95 = arith.constant 0 : index
    %357 = vector.load %arg6[%c0_94, %c0_95] : memref<256x8xf32, #tpu.memory_space<vmem>>, vector<256x8xf32>
    %cst_96 = arith.constant dense<0.000000e+00> : vector<16x8xf32>
    %358 = tpu.matmul %356, %357, %cst_96 {dimension_numbers = #tpu.dot_dimension_numbers<[1], [0], [0], [1], [0, 0, 1, 1], [], []>} : vector<16x256xf32>, vector<256x8xf32>, vector<16x8xf32> -> vector<16x8xf32>
    %c0_97 = arith.constant 0 : index
    %c0_98 = arith.constant 0 : index
    %359 = vector.load %arg7[%c0_97, %c0_98] : memref<1x8xf32, #tpu.memory_space<vmem>>, vector<1x8xf32>
    %360 = vector.broadcast %359 : vector<1x8xf32> to vector<16x8xf32>
    %361 = arith.addf %358, %360 : vector<16x8xf32>
    %362 = tpu.iota {dimensions = array<i32: 1>} : vector<16x8xi32>
    %c0_i32 = arith.constant 0 : i32
    %363 = vector.broadcast %c0_i32 : i32 to vector<16x8xi32>
    %364 = arith.cmpi eq, %362, %363 : vector<16x8xi32>
    %365 = arith.extui %364 : vector<16x8xi1> to vector<16x8xi32>
    %366 = arith.sitofp %365 : vector<16x8xi32> to vector<16x8xf32>
    %c0_99 = arith.constant 0 : index
    %c0_100 = arith.constant 0 : index
    %367 = vector.load %arg1[%c0_99, %c0_100] : memref<16x1xi32, #tpu.memory_space<vmem>>, vector<16x1xi32>
    %c1_i32 = arith.constant 1 : i32
    %368 = vector.broadcast %c1_i32 : i32 to vector<16x1xi32>
    %369 = arith.cmpi eq, %367, %368 : vector<16x1xi32>
    %370 = arith.extui %369 : vector<16x1xi1> to vector<16x1xi32>
    %371 = arith.sitofp %370 : vector<16x1xi32> to vector<16x1xf32>
    %cst_101 = arith.constant 1.000000e+04 : f32
    %372 = vector.broadcast %cst_101 : f32 to vector<16x1xf32>
    %373 = arith.mulf %371, %372 : vector<16x1xf32>
    %374 = vector.broadcast %373 : vector<16x1xf32> to vector<16x8xf32>
    %375 = arith.mulf %366, %374 : vector<16x8xf32>
    %376 = arith.addf %361, %375 : vector<16x8xf32>
    %c0_102 = arith.constant 0 : index
    %c0_103 = arith.constant 0 : index
    %377 = vector.load %arg2[%c0_102, %c0_103] : memref<16x1xi32, #tpu.memory_space<vmem>>, vector<16x1xi32>
    %378 = vector.broadcast %377 : vector<16x1xi32> to vector<16x8xi32>
    %379 = arith.cmpi eq, %362, %378 : vector<16x8xi32>
    %380 = arith.extui %379 : vector<16x8xi1> to vector<16x8xi32>
    %381 = arith.sitofp %380 : vector<16x8xi32> to vector<16x8xf32>
    %cst_104 = arith.constant dense<0xFF800000> : vector<16xf32>
    %382 = vector.multi_reduction <maximumf>, %376, %cst_104 [1] : vector<16x8xf32> to vector<16xf32>
    %383 = vector.shape_cast %382 : vector<16xf32> to vector<16x1xf32>
    %384 = vector.broadcast %383 : vector<16x1xf32> to vector<16x8xf32>
    %385 = arith.subf %376, %384 : vector<16x8xf32>
    %386 = math.exp %385 : vector<16x8xf32>
    %cst_105 = arith.constant dense<0.000000e+00> : vector<16xf32>
    %387 = vector.multi_reduction <add>, %386, %cst_105 [1] : vector<16x8xf32> to vector<16xf32>
    %388 = vector.shape_cast %387 : vector<16xf32> to vector<16x1xf32>
    %389 = math.log %388 : vector<16x1xf32>
    %390 = arith.addf %383, %389 : vector<16x1xf32>
    %391 = arith.mulf %376, %381 : vector<16x8xf32>
    %cst_106 = arith.constant dense<0.000000e+00> : vector<16xf32>
    %392 = vector.multi_reduction <add>, %391, %cst_106 [1] : vector<16x8xf32> to vector<16xf32>
    %393 = vector.shape_cast %392 : vector<16xf32> to vector<16x1xf32>
    %394 = arith.subf %390, %393 : vector<16x1xf32>
    %395 = vector.shape_cast %394 : vector<16x1xf32> to vector<1x16x1xf32>
    %cst_107 = arith.constant dense<0.000000e+00> : vector<1xf32>
    %396 = vector.multi_reduction <add>, %395, %cst_107 [1, 2] : vector<1x16x1xf32> to vector<1xf32>
    %397 = vector.shape_cast %396 : vector<1xf32> to vector<1x1x1xf32>
    %398 = vector.extract %397[0, 0, 0] : f32 from vector<1x1x1xf32>
    %399 = vector.broadcast %398 : f32 to vector<1x1xf32>
    %c0_108 = arith.constant 0 : index
    %c0_109 = arith.constant 0 : index
    %400 = vector.load %arg8[%c0_108, %c0_109] : memref<1x1xf32, #tpu.memory_space<vmem>>, vector<1x1xf32>
    tpu.vector_store %arg8[%c0_108, %c0_109], %399 {strides = array<i32>} : memref<1x1xf32, #tpu.memory_space<vmem>>, vector<1x1xf32>,
    return
  }
}

</mosaic_0001>

<bundles_post_ra>
// kernel: bilstm_tagger_loss.1
= control target key start
LH: loop header
LB: loop body
LE: loop exit
PB: predicated region body
PF: predicated region fallthrough
CT: control target
= control target key end

     0   :  { %v6096_v6 = vmov 0.0   ;;  %v6108_v10 = vmov 0.0|0.0   ;;  %vm106_vm0 = vcmask 261120   ;;  %s6087_s0 = inlined_call_operand.vmem [shape: f32[16,32], index: 0, kind: input, shape index: {}]   ;;  %s6088_s1 = inlined_call_operand.vmem [shape: s32[16,1], index: 1, kind: input, shape index: {}]   ;;  %s6089_s2 = inlined_call_operand.vmem [shape: s32[16,1], index: 2, kind: input, shape index: {}]   ;;  %s6090_s3 = inlined_call_operand.vmem [shape: f32[32,1024], index: 3, kind: input, shape index: {}]   ;;  %s6091_s4 = inlined_call_operand.vmem [shape: bf16[256,1024], index: 4, kind: input, shape index: {}]   ;;  %s6092_s5 = inlined_call_operand.vmem [shape: f32[1,1024], index: 5, kind: input, shape index: {}]   ;;  %s6093_s6 = inlined_call_operand.vmem [shape: f32[256,8], index: 6, kind: input, shape index: {}]   ;;  %s6094_s7 = inlined_call_operand.vmem [shape: f32[1,8], index: 7, kind: input, shape index: {}]   ;;  %s6095_s8 = inlined_call_operand.hbm [shape: f32[1,1], index: 8, kind: output, shape index: {}]  }
   0x1   :  { %v57_v0 = vld [vmem:[%s6090_s3 + $0xc8] sm:$0xff]  ;;  %v56_v1 = vld [vmem:[%s6090_s3 + $0xc0] sm:$0xff]  ;;  %177 = vmatprep.mubr.f32.mxu1 %v6096_v6  ;;  %1238 = vmatprep.mubr.bf16.mxu0 %v6108_v10  ;;  %v59_v22 = vld [vmem:[%s6090_s3 + $0xd8] sm:$0xff] }
   0x2   :  { %v49_v2 = vld [vmem:[%s6090_s3 + $0x88] sm:$0xff]  ;;  %137 = vmatprep.subr.mxu1 %v57_v0  ;;  %v493_v3 = vld [vmem:[%s6091_s4 + $0x1c0] sm:$0xff]  ;;  %v58_v23 = vld [vmem:[%s6090_s3 + $0xd0] sm:$0xff] }
   0x3   :  { %v497_v4 = vld [vmem:[%s6091_s4 + $0x1e0] sm:$0xff]  ;;  %138 = vmatpush1.msra.mxu1 %v56_v1  ;;  %v41_v9 = vld [vmem:[%s6090_s3 + $0x48] sm:$0xff]  ;;  %v51_v26 = vld [vmem:[%s6090_s3 + $0x98] sm:$0xff] }
   0x4   :  { %v48_v5 = vld [vmem:[%s6090_s3 + $0x80] sm:$0xff]  ;;  %v4056_v7 = vcombine.high %v493_v3, %v497_v4  ;;  %v4058_v8 = vcombine.low %v493_v3, %v497_v4  ;;  %139 = vmatprep.subr.mxu1 %v49_v2  ;;  %v33_v14 = vld [vmem:[%s6090_s3 + $0x8] sm:$0xff]  ;;  %v50_v28 = vld [vmem:[%s6090_s3 + $0x90] sm:$0xff] }
   0x5   :  { %v40_v11 = vld [vmem:[%s6090_s3 + $0x40] sm:$0xff]  ;;  %140 = vmatpush1.msra.mxu1 %v48_v5  ;;  %v4127_v29 = vld [vmem:[%s6087_s0 + $0x8] sm:$0xff]  ;;  %v43_v30 = vld [vmem:[%s6090_s3 + $0x58] sm:$0xff] }
   0x6   :  { %6380 = vst [vmem:[#allocation7_spill] sm:$0xff] %v4056_v7  ;;  %6381 = vst [vmem:[#allocation8_spill] sm:$0xff] %v4058_v8  ;;  %v485_v12 = vld [vmem:[%s6091_s4 + $0x180] sm:$0xff]  ;;  %1206 = vmatprep.subr.bf16.mxu0 %v4056_v7  ;;  %141 = vmatprep.subr.mxu1 %v41_v9  ;;  %v42_v32 = vld [vmem:[%s6090_s3 + $0x50] sm:$0xff] }
   0x7   :  { %v489_v13 = vld [vmem:[%s6091_s4 + $0x1a0] sm:$0xff]  ;;  %1207 = vmatpush1.bf16.msra.mxu0 %v4058_v8  ;;  %142 = vmatpush1.msra.mxu1 %v40_v11  ;;  %v35_v35 = vld [vmem:[%s6090_s3 + $0x18] sm:$0xff]  ;;  %v34_v37 = vld [vmem:[%s6090_s3 + $0x10] sm:$0xff] }
   0x8   :  { %v4077_v15 = vcombine.high %v485_v12, %v489_v13  ;;  %v32_v16 = vld [vmem:[%s6090_s3] sm:$0xff]  ;;  %v4083_v17 = vcombine.low %v485_v12, %v489_v13  ;;  %143 = vmatprep.subr.mxu1 %v33_v14  ;;  %v61_v38 = vld [vmem:[%s6090_s3 + $0xe8] sm:$0xff]  ;;  %v63_v54 = vld [vmem:[%s6090_s3 + $0xf8] sm:$0xff] }
   0x9   :  { %v477_v18 = vld [vmem:[%s6091_s4 + $0x140] sm:$0xff]  ;;  %144 = vmatpush1.msra.mxu1 %v32_v16  ;;  %v53_v43 = vld [vmem:[%s6090_s3 + $0xa8] sm:$0xff]  ;;  %v62_v56 = vld [vmem:[%s6090_s3 + $0xf0] sm:$0xff] }
   0xa   :  { %6382 = vst [vmem:[#allocation9_spill] sm:$0xff] %v4077_v15  ;;  %6383 = vst [vmem:[#allocation10_spill] sm:$0xff] %v4083_v17  ;;  %v481_v19 = vld [vmem:[%s6091_s4 + $0x160] sm:$0xff]  ;;  %1208 = vmatprep.subr.bf16.mxu0 %v4077_v15  ;;  %214 = vmatprep.subr.mxu1 %v59_v22  ;;  %v45_v46 = vld [vmem:[%s6090_s3 + $0x68] sm:$0xff] }
   0xb   :  { %v4095_v20 = vld [vmem:[%s6087_s0] sm:$0xff]  ;;  %v4097_v21 = vcombine.high %v477_v18, %v481_v19  ;;  %1209 = vmatpush1.bf16.msra.mxu0 %v4083_v17  ;;  %v4117_v27 = vcombine.low %v477_v18, %v481_v19  ;;  %v37_v51 = vld [vmem:[%s6090_s3 + $0x28] sm:$0xff]  ;;  %v55_v59 = vld [vmem:[%s6090_s3 + $0xb8] sm:$0xff] }
   0xc   :  { %v469_v24 = vld [vmem:[%s6091_s4 + $0x100] sm:$0xff]  ;;  %3466 = vmatmul.mubr.msk.f32.vlgmr.msra.gmra.mxu1 %vm106_vm0, %v4095_v20  ;;  %v54_v61 = vld [vmem:[%s6090_s3 + $0xb0] sm:$0xff]  ;;  %v47_v62 = vld [vmem:[%s6090_s3 + $0x78] sm:$0xff] }
   0xd   :  { %6384 = vst [vmem:[#allocation11_spill] sm:$0xff] %v4097_v21  ;;  %v473_v25 = vld [vmem:[%s6091_s4 + $0x120] sm:$0xff]  ;;  %6385 = vst [vmem:[#allocation12_spill] sm:$0xff] %v4117_v27  ;;  %1210 = vmatprep.subr.bf16.mxu0 %v4097_v21  ;;  %215 = vmatpush1.msra.mxu1 %v58_v23  ;;  %v494_v0 = vld [vmem:[%s6091_s4 + $0x1c8] sm:$0xff] }
   0xe   :  { %183 = vmatprep.mubr.f32.mxu1 %v6096_v6  ;;  %v4132_v31 = vcombine.high %v469_v24, %v473_v25  ;;  %216 = vmatprep.subr.mxu1 %v51_v26  ;;  %v461_v33 = vld [vmem:[%s6091_s4 + $0xc0] sm:$0xff]  ;;  %v4147_v36 = vcombine.low %v469_v24, %v473_v25  ;;  %v498_v1 = vld [vmem:[%s6091_s4 + $0x1e8] sm:$0xff]  ;;  %v46_v2 = vld [vmem:[%s6090_s3 + $0x70] sm:$0xff] }
   0xf   :  { %v465_v34 = vld [vmem:[%s6091_s4 + $0xe0] sm:$0xff]  ;;  %217 = vmatpush1.msra.mxu1 %v50_v28  ;;  %1211 = vmatpush1.bf16.msra.mxu0 %v4117_v27  ;;  %v39_v5 = vld [vmem:[%s6090_s3 + $0x38] sm:$0xff]  ;;  %v486_v11 = vld [vmem:[%s6091_s4 + $0x188] sm:$0xff]  ;;  %v4274_v14 = vcombine.high %v494_v0, %v498_v1  ;;  %v4277_v16 = vcombine.low %v494_v0, %v498_v1 }
  0x10   :  { %6386 = vst [vmem:[#allocation13_spill] sm:$0xff] %v4132_v31  ;;  %6387 = vst [vmem:[#allocation14_spill] sm:$0xff] %v4147_v36  ;;  %3467 = vmatmul.mubr.msk.f32.gmra.mxu1 %vm106_vm0, %v4127_v29  ;;  %218 = vmatprep.subr.mxu1 %v43_v30  ;;  %v4158_v39 = vcombine.high %v461_v33, %v465_v34  ;;  %v60_v40 = vld [vmem:[%s6090_s3 + $0xe0] sm:$0xff]  ;;  %v4174_v44 = vcombine.low %v461_v33, %v465_v34  ;;  %v490_v12 = vld [vmem:[%s6091_s4 + $0x1a8] sm:$0xff] }
  0x11   :  { %219 = vmatpush1.msra.mxu1 %v42_v32  ;;  %1212 = vmatprep.subr.bf16.mxu0 %v4132_v31  ;;  %v453_v41 = vld [vmem:[%s6091_s4 + $0x80] sm:$0xff]  ;;  %v38_v13 = vld [vmem:[%s6090_s3 + $0x30] sm:$0xff]  ;;  %6396 = vst [vmem:[#allocation23_spill] sm:$0xff] %v4274_v14  ;;  %6397 = vst [vmem:[#allocation24_spill] sm:$0xff] %v4277_v16  ;;  %v4288_v23 = vcombine.high %v486_v11, %v490_v12  ;;  %v4306_v30 = vcombine.low %v486_v11, %v490_v12 }
  0x12   :  { %6388 = vst [vmem:[#allocation15_spill] sm:$0xff] %v4158_v39  ;;  %220 = vmatprep.subr.mxu1 %v35_v35  ;;  %254 = vmatprep.mubr.f32.mxu1 %v6096_v6  ;;  %v457_v42 = vld [vmem:[%s6091_s4 + $0xa0] sm:$0xff]  ;;  %6389 = vst [vmem:[#allocation16_spill] sm:$0xff] %v4174_v44  ;;  %v478_v25 = vld [vmem:[%s6091_s4 + $0x148] sm:$0xff] }
  0x13   :  { %221 = vmatpush1.msra.mxu1 %v34_v37  ;;  %1213 = vmatpush1.bf16.msra.mxu0 %v4147_v36  ;;  %v52_v45 = vld [vmem:[%s6090_s3 + $0xa0] sm:$0xff]  ;;  %v4185_v47 = vcombine.high %v453_v41, %v457_v42  ;;  %v4201_v52 = vcombine.low %v453_v41, %v457_v42  ;;  %6399 = vst [vmem:[#allocation26_spill] sm:$0xff] %v4288_v23  ;;  %v482_v26 = vld [vmem:[%s6091_s4 + $0x168] sm:$0xff]  ;;  %6402 = vst [vmem:[#allocation29_spill] sm:$0xff] %v4306_v30 }
  0x14   :  { %3468 = vmatmul.mubr.msk.f32.vlgmr.msra.gmra.mxu1 %vm106_vm0, %v4095_v20  ;;  %291 = vmatprep.subr.mxu1 %v61_v38  ;;  %v44_v48 = vld [vmem:[%s6090_s3 + $0x60] sm:$0xff]  ;;  %v470_v35 = vld [vmem:[%s6091_s4 + $0x108] sm:$0xff] }
  0x15   :  { %292 = vmatpush1.msra.mxu1 %v60_v40  ;;  %1214 = vmatprep.subr.bf16.mxu0 %v4158_v39  ;;  %6390 = vst [vmem:[#allocation17_spill] sm:$0xff] %v4185_v47  ;;  %v445_v49 = vld [vmem:[%s6091_s4 + $0x40] sm:$0xff]  ;;  %6391 = vst [vmem:[#allocation18_spill] sm:$0xff] %v4201_v52  ;;  %v474_v37 = vld [vmem:[%s6091_s4 + $0x128] sm:$0xff]  ;;  %v4333_v40 = vcombine.low %v478_v25, %v482_v26 }
  0x16   :  { %293 = vmatprep.subr.mxu1 %v53_v43  ;;  %260 = vmatprep.mubr.f32.mxu1 %v6096_v6  ;;  %v449_v50 = vld [vmem:[%s6091_s4 + $0x60] sm:$0xff]  ;;  %v4343_v43 = vcombine.high %v470_v35, %v474_v37 }
  0x17   :  { %294 = vmatpush1.msra.mxu1 %v52_v45  ;;  %1215 = vmatpush1.bf16.msra.mxu0 %v4174_v44  ;;  %v36_v53 = vld [vmem:[%s6090_s3 + $0x20] sm:$0xff]  ;;  %v4212_v55 = vcombine.high %v445_v49, %v449_v50  ;;  %v4228_v60 = vcombine.low %v445_v49, %v449_v50  ;;  %6406 = vst [vmem:[#allocation33_spill] sm:$0xff] %v4333_v40  ;;  %v462_v45 = vld [vmem:[%s6091_s4 + $0xc8] sm:$0xff] }
  0x18   :  { %3469 = vmatmul.mubr.msk.f32.gmra.mxu1 %vm106_vm0, %v4127_v29  ;;  %295 = vmatprep.subr.mxu1 %v45_v46  ;;  %v437_v57 = vld [vmem:[%s6091_s4] sm:$0xff]  ;;  %6407 = vst [vmem:[#allocation34_spill] sm:$0xff] %v4343_v43  ;;  %v466_v46 = vld [vmem:[%s6091_s4 + $0xe8] sm:$0xff]  ;;  %v4358_v49 = vcombine.low %v470_v35, %v474_v37 }
  0x19   :  { %296 = vmatpush1.msra.mxu1 %v44_v48  ;;  %1216 = vmatprep.subr.bf16.mxu0 %v4185_v47  ;;  %6392 = vst [vmem:[#allocation19_spill] sm:$0xff] %v4212_v55  ;;  %v441_v58 = vld [vmem:[%s6091_s4 + $0x20] sm:$0xff]  ;;  %6393 = vst [vmem:[#allocation20_spill] sm:$0xff] %v4228_v60 }
  0x1a   :  { %297 = vmatprep.subr.mxu1 %v37_v51  ;;  %331 = vmatprep.mubr.f32.mxu1 %v6096_v6  ;;  %v4239_v63 = vcombine.high %v437_v57, %v441_v58  ;;  %v557_v3 = vld [vmem:[%s6091_s4 + $0x3c0] sm:$0xff]  ;;  %v4261_v9 = vcombine.low %v437_v57, %v441_v58  ;;  %6410 = vst [vmem:[#allocation37_spill] sm:$0xff] %v4358_v49  ;;  %v458_v57 = vld [vmem:[%s6091_s4 + $0xa8] sm:$0xff] }
  0x1b   :  { %298 = vmatpush1.msra.mxu1 %v36_v53  ;;  %1217 = vmatpush1.bf16.msra.mxu0 %v4201_v52  ;;  %v561_v4 = vld [vmem:[%s6091_s4 + $0x3e0] sm:$0xff]  ;;  %v4367_v53 = vcombine.high %v462_v45, %v466_v46 }
  0x1c   :  { %3470 = vmatmul.mubr.msk.f32.vlgmr.msra.gmra.mxu1 %vm106_vm0, %v4095_v20  ;;  %368 = vmatprep.subr.mxu1 %v63_v54  ;;  %6394 = vst [vmem:[#allocation21_spill] sm:$0xff] %v4239_v63  ;;  %6395 = vst [vmem:[#allocation22_spill] sm:$0xff] %v4261_v9  ;;  %v4279_v18 = vcombine.high %v557_v3, %v561_v4  ;;  %v549_v19 = vld [vmem:[%s6091_s4 + $0x380] sm:$0xff]  ;;  %v4291_v24 = vcombine.low %v557_v3, %v561_v4  ;;  %v450_v3 = vld [vmem:[%s6091_s4 + $0x68] sm:$0xff] }
  0x1d   :  { %369 = vmatpush1.msra.mxu1 %v62_v56  ;;  %1218 = vmatprep.subr.bf16.mxu0 %v4212_v55  ;;  %v553_v22 = vld [vmem:[%s6091_s4 + $0x3a0] sm:$0xff]  ;;  %6411 = vst [vmem:[#allocation38_spill] sm:$0xff] %v4367_v53  ;;  %v454_v56 = vld [vmem:[%s6091_s4 + $0x88] sm:$0xff] }
  0x1e   :  { %370 = vmatprep.subr.mxu1 %v55_v59  ;;  %337 = vmatprep.mubr.f32.mxu1 %v6096_v6  ;;  %6398 = vst [vmem:[#allocation25_spill] sm:$0xff] %v4279_v18  ;;  %6400 = vst [vmem:[#allocation27_spill] sm:$0xff] %v4291_v24  ;;  %v4302_v28 = vcombine.high %v549_v19, %v553_v22  ;;  %v541_v32 = vld [vmem:[%s6091_s4 + $0x340] sm:$0xff]  ;;  %v4318_v34 = vcombine.low %v549_v19, %v553_v22  ;;  %v438_v22 = vld [vmem:[%s6091_s4 + $0x8] sm:$0xff] }
  0x1f   :  { %371 = vmatpush1.msra.mxu1 %v54_v61  ;;  %1219 = vmatpush1.bf16.msra.mxu0 %v4228_v60  ;;  %v545_v33 = vld [vmem:[%s6091_s4 + $0x360] sm:$0xff]  ;;  %v4382_v59 = vcombine.low %v462_v45, %v466_v46  ;;  %v4391_v0 = vcombine.high %v454_v56, %v458_v57 }
  0x20   :  { %3471 = vmatmul.mubr.msk.f32.gmra.mxu1 %vm106_vm0, %v4127_v29  ;;  %372 = vmatprep.subr.mxu1 %v47_v62  ;;  %6401 = vst [vmem:[#allocation28_spill] sm:$0xff] %v4302_v28  ;;  %6404 = vst [vmem:[#allocation31_spill] sm:$0xff] %v4318_v34  ;;  %v4328_v38 = vcombine.high %v541_v32, %v545_v33  ;;  %v533_v41 = vld [vmem:[%s6091_s4 + $0x300] sm:$0xff] }
  0x21   :  { %373 = vmatpush1.msra.mxu1 %v46_v2  ;;  %1220 = vmatprep.subr.bf16.mxu0 %v4239_v63  ;;  %v537_v42 = vld [vmem:[%s6091_s4 + $0x320] sm:$0xff]  ;;  %6414 = vst [vmem:[#allocation41_spill] sm:$0xff] %v4382_v59  ;;  %6415 = vst [vmem:[#allocation42_spill] sm:$0xff] %v4391_v0  ;;  %v446_v2 = vld [vmem:[%s6091_s4 + $0x48] sm:$0xff] }
  0x22   :  { %374 = vmatprep.subr.mxu1 %v39_v5  ;;  %408 = vmatprep.mubr.f32.mxu1 %v6096_v6  ;;  %6405 = vst [vmem:[#allocation32_spill] sm:$0xff] %v4328_v38  ;;  %v4355_v48 = vcombine.high %v533_v41, %v537_v42  ;;  %v525_v50 = vld [vmem:[%s6091_s4 + $0x2c0] sm:$0xff]  ;;  %v4370_v54 = vcombine.low %v533_v41, %v537_v42 }
  0x23   :  { %375 = vmatpush1.msra.mxu1 %v38_v13  ;;  %1221 = vmatpush1.bf16.msra.mxu0 %v4261_v9  ;;  %v529_v51 = vld [vmem:[%s6091_s4 + $0x2e0] sm:$0xff]  ;;  %v4406_v5 = vcombine.low %v454_v56, %v458_v57  ;;  %v4415_v13 = vcombine.high %v446_v2, %v450_v3 }
  0x24   :  { %3472 = vmatmul.mubr.msk.f32.vlgmr.msra.gmra.mxu1 %vm106_vm0, %v4095_v20  ;;  %1247 = vmatprep.subr.bf16.mxu1 %v4274_v14  ;;  %v4315_v20 = vcombine.high %v478_v25, %v482_v26  ;;  %6409 = vst [vmem:[#allocation36_spill] sm:$0xff] %v4355_v48  ;;  %6412 = vst [vmem:[#allocation39_spill] sm:$0xff] %v4370_v54  ;;  %v4379_v58 = vcombine.high %v525_v50, %v529_v51  ;;  %v517_v61 = vld [vmem:[%s6091_s4 + $0x280] sm:$0xff]  ;;  %v442_v25 = vld [vmem:[%s6091_s4 + $0x28] sm:$0xff] }
  0x25   :  { %1248 = vmatpush1.bf16.msra.mxu1 %v4277_v16  ;;  %1222 = vmatprep.subr.bf16.mxu0 %v4279_v18  ;;  %v521_v62 = vld [vmem:[%s6091_s4 + $0x2a0] sm:$0xff]  ;;  %v4394_v1 = vcombine.low %v525_v50, %v529_v51  ;;  %6418 = vst [vmem:[#allocation45_spill] sm:$0xff] %v4406_v5  ;;  %6419 = vst [vmem:[#allocation46_spill] sm:$0xff] %v4415_v13 }
  0x26   :  { %1249 = vmatprep.subr.bf16.mxu1 %v4288_v23  ;;  %6403 = vst [vmem:[#allocation30_spill] sm:$0xff] %v4315_v20  ;;  %414 = vmatprep.mubr.f32.mxu1 %v6096_v6  ;;  %6413 = vst [vmem:[#allocation40_spill] sm:$0xff] %v4379_v58  ;;  %v4403_v4 = vcombine.high %v517_v61, %v521_v62  ;;  %v509_v11 = vld [vmem:[%s6091_s4 + $0x240] sm:$0xff]  ;;  %v4418_v19 = vcombine.low %v517_v61, %v521_v62 }
  0x27   :  { %1223 = vmatpush2.bf16.msra.mxu0 %v4291_v24  ;;  %6416 = vst [vmem:[#allocation43_spill] sm:$0xff] %v4394_v1  ;;  %v513_v12 = vld [vmem:[%s6091_s4 + $0x260] sm:$0xff] }
  0x28   :  { %1224 = vmatprep.subr.bf16.mxu0 %v4302_v28  ;;  %3473 = vmatmul.mubr.msk.f32.gmra.mxu1 %vm106_vm0, %v4127_v29  ;;  %v4346_v29 = vcombine.low %v541_v32, %v545_v33  ;;  %6417 = vst [vmem:[#allocation44_spill] sm:$0xff] %v4403_v4  ;;  %6420 = vst [vmem:[#allocation47_spill] sm:$0xff] %v4418_v19  ;;  %v4427_v26 = vcombine.high %v509_v11, %v513_v12 }
  0x29   :  { %1250 = vmatpush1.bf16.msra.mxu1 %v4306_v30  ;;  %1279 = vmatprep.mubr.bf16.mxu1 %v6108_v10 }
  0x2a   :  { %1251 = vmatprep.subr.bf16.mxu1 %v4315_v20  ;;  %6408 = vst [vmem:[#allocation35_spill] sm:$0xff] %v4346_v29  ;;  %6421 = vst [vmem:[#allocation48_spill] sm:$0xff] %v4427_v26 }
  0x2b   :  { %1225 = vmatpush2.bf16.msra.mxu0 %v4318_v34 }
  0x2c   :  { %1226 = vmatprep.subr.bf16.mxu0 %v4328_v38 }
  0x2d   :  { %1252 = vmatpush1.bf16.msra.mxu1 %v4333_v40 }
  0x2e   :  { %1253 = vmatprep.subr.bf16.mxu1 %v4343_v43 }
  0x2f   :  { %1227 = vmatpush2.bf16.msra.mxu0 %v4346_v29 }
  0x30   :  { %1228 = vmatprep.subr.bf16.mxu0 %v4355_v48 }
  0x31   :  { %1254 = vmatpush1.bf16.msra.mxu1 %v4358_v49 }
  0x32   :  { %1255 = vmatprep.subr.bf16.mxu1 %v4367_v53 }
  0x33   :  { %1229 = vmatpush2.bf16.msra.mxu0 %v4370_v54 }
  0x34   :  { %1230 = vmatprep.subr.bf16.mxu0 %v4379_v58 }
  0x35   :  { %1256 = vmatpush1.bf16.msra.mxu1 %v4382_v59 }
  0x36   :  { %1257 = vmatprep.subr.bf16.mxu1 %v4391_v0 }
  0x37   :  { %1231 = vmatpush2.bf16.msra.mxu0 %v4394_v1 }
  0x38   :  { %1232 = vmatprep.subr.bf16.mxu0 %v4403_v4 }
  0x39   :  { %13 = vsyncpa [#allocation5], 0  ;;  %1258 = vmatpush1.bf16.msra.mxu1 %v4406_v5  ;;  %v4430_v32 = vcombine.low %v446_v2, %v450_v3  ;;  %v501_v33 = vld [vmem:[%s6091_s4 + $0x200] sm:$0xff]  ;;  %v4439_v37 = vcombine.high %v438_v22, %v442_v25  ;;  %v4442_v41 = vcombine.low %v509_v11, %v513_v12  ;;  %v558_v42 = vld [vmem:[%s6091_s4 + $0x3c8] sm:$0xff]  ;;  %v4454_v50 = vcombine.low %v438_v22, %v442_v25 }
  0x3a   :  { %v505_v35 = vld [vmem:[%s6091_s4 + $0x220] sm:$0xff]  ;;  %1259 = vmatprep.subr.bf16.mxu1 %v4415_v13  ;;  %v562_v45 = vld [vmem:[%s6091_s4 + $0x3e8] sm:$0xff]  ;;  %v495_v51 = vld [vmem:[%s6091_s4 + $0x1d0] sm:$0xff]  ;;  %vm3401_vm4 = vcmask 64512   ;;  %vm3436_vm7 = vcmask 7168   ;;  %vm3450_vm8 = vcmask 0  }
  0x3b   :  { %6422 = vst [vmem:[#allocation49_spill] sm:$0xff] %v4430_v32  ;;  %6423 = vst [vmem:[#allocation50_spill] sm:$0xff] %v4439_v37  ;;  %1233 = vmatpush2.bf16.msra.mxu0 %v4418_v19  ;;  %v4451_v46 = vcombine.high %v501_v33, %v505_v35  ;;  %v499_v56 = vld [vmem:[%s6091_s4 + $0x1f0] sm:$0xff]  ;;  %v4463_v57 = vcombine.high %v558_v42, %v562_v45  ;;  %v4466_v61 = vcombine.low %v501_v33, %v505_v35  ;;  %v550_v62 = vld [vmem:[%s6091_s4 + $0x388] sm:$0xff] }
  0x3c   :  { %6424 = vst [vmem:[#allocation51_spill] sm:$0xff] %v4442_v41  ;;  %1234 = vmatprep.subr.bf16.mxu0 %v4427_v26  ;;  %6426 = vst [vmem:[#allocation53_spill] sm:$0xff] %v4454_v50  ;;  %v554_v2 = vld [vmem:[%s6091_s4 + $0x3a8] sm:$0xff]  ;;  %v4475_v3 = vcombine.high %v495_v51, %v499_v56  ;;  %v4478_v11 = vcombine.low %v558_v42, %v562_v45  ;;  %v487_v12 = vld [vmem:[%s6091_s4 + $0x190] sm:$0xff]  ;;  %v4490_v33 = vcombine.low %v495_v51, %v499_v56 }
  0x3d   :  { %6425 = vst [vmem:[#allocation52_spill] sm:$0xff] %v4451_v46  ;;  %1260 = vmatpush1.bf16.msra.mxu1 %v4430_v32  ;;  %6427 = vst [vmem:[#allocation54_spill] sm:$0xff] %v4463_v57  ;;  %v491_v22 = vld [vmem:[%s6091_s4 + $0x1b0] sm:$0xff]  ;;  %v4487_v25 = vcombine.high %v550_v62, %v554_v2  ;;  %v542_v35 = vld [vmem:[%s6091_s4 + $0x348] sm:$0xff]  ;;  %v4502_v6 = vcombine.low %v550_v62, %v554_v2 }
  0x3e   :  { %1261 = vmatprep.subr.bf16.mxu1 %v4439_v37  ;;  %6428 = vst [vmem:[#allocation55_spill] sm:$0xff] %v4466_v61  ;;  %6429 = vst [vmem:[#allocation56_spill] sm:$0xff] %v4475_v3  ;;  %v546_v42 = vld [vmem:[%s6091_s4 + $0x368] sm:$0xff]  ;;  %v4499_v45 = vcombine.high %v487_v12, %v491_v22  ;;  %v479_v51 = vld [vmem:[%s6091_s4 + $0x150] sm:$0xff] }
  0x3f   :  { %1235 = vmatpush2.bf16.msra.mxu0 %v4442_v41  ;;  %6430 = vst [vmem:[#allocation57_spill] sm:$0xff] %v4478_v11  ;;  %6431 = vst [vmem:[#allocation58_spill] sm:$0xff] %v4487_v25  ;;  %v483_v56 = vld [vmem:[%s6091_s4 + $0x170] sm:$0xff]  ;;  %v534_v62 = vld [vmem:[%s6091_s4 + $0x308] sm:$0xff] }
  0x40   :  { %1236 = vmatprep.subr.bf16.mxu0 %v4451_v46  ;;  %6432 = vst [vmem:[#allocation59_spill] sm:$0xff] %v4490_v33  ;;  %6433 = vst [vmem:[#allocation60_spill] sm:$0xff] %v4499_v45  ;;  %v538_v2 = vld [vmem:[%s6091_s4 + $0x328] sm:$0xff] }
  0x41   :  { %1262 = vmatpush1.bf16.msra.mxu1 %v4454_v50  ;;  %6434 = vst [vmem:[#allocation61_spill] sm:$0xff] %v4502_v6 }
  0x42   :  { %1263 = vmatprep.subr.bf16.mxu1 %v4463_v57 }
  0x43   :  { %1237 = vmatpush2.bf16.msra.mxu0 %v4466_v61  ;;  %v4512_v61 = vcombine.high %v542_v35, %v546_v42 }
  0x44   :  { %1288 = vmatprep.subr.bf16.mxu0 %v4475_v3  ;;  %v4515_v3 = vcombine.low %v487_v12, %v491_v22  ;;  %v471_v12 = vld [vmem:[%s6091_s4 + $0x110] sm:$0xff] }
  0x45   :  { %1264 = vmatpush2.bf16.msra.mxu1 %v4478_v11  ;;  %6435 = vst [vmem:[#allocation62_spill] sm:$0xff] %v4512_v61  ;;  %v4525_v11 = vcombine.high %v479_v51, %v483_v56  ;;  %v475_v22 = vld [vmem:[%s6091_s4 + $0x130] sm:$0xff] }
  0x46   :  { %1239 = vmatmul.mubr.bf16.vlgmr.msra.gmra.mxu0 %v6108_v10  ;;  %1265 = vmatprep.subr.bf16.mxu1 %v4487_v25  ;;  %6436 = vst [vmem:[#allocation63_spill] sm:$0xff] %v4515_v3  ;;  %v4528_v25 = vcombine.low %v542_v35, %v546_v42  ;;  %v526_v35 = vld [vmem:[%s6091_s4 + $0x2c8] sm:$0xff] }
  0x47   :  { %1289 = vmatpush1.bf16.msra.mxu0 %v4490_v33  ;;  %1320 = vmatprep.mubr.bf16.mxu0 %v6108_v10  ;;  %6437 = vst [vmem:[#allocation64_spill] sm:$0xff] %v4525_v11  ;;  %v4537_v33 = vcombine.high %v534_v62, %v538_v2  ;;  %v4540_v10 = vcombine.low %v479_v51, %v483_v56  ;;  %v530_v42 = vld [vmem:[%s6091_s4 + $0x2e8] sm:$0xff]  ;;  %v463_v51 = vld [vmem:[%s6091_s4 + $0xd0] sm:$0xff] }
  0x48   :  { %1290 = vmatprep.subr.bf16.mxu0 %v4499_v45  ;;  %6438 = vst [vmem:[#allocation65_spill] sm:$0xff] %v4528_v25  ;;  %v4549_v45 = vcombine.high %v471_v12, %v475_v22  ;;  %v467_v56 = vld [vmem:[%s6091_s4 + $0xf0] sm:$0xff] }
  0x49   :  { %1266 = vmatpush2.bf16.msra.mxu1 %v4502_v6  ;;  %6439 = vst [vmem:[#allocation66_spill] sm:$0xff] %v4537_v33  ;;  %6440 = vst [vmem:[#allocation67_spill] sm:$0xff] %v4540_v10 }
  0x4a   :  { %1267 = vmatprep.subr.bf16.mxu1 %v4512_v61  ;;  %6441 = vst [vmem:[#allocation68_spill] sm:$0xff] %v4549_v45  ;;  %v4552_v61 = vcombine.low %v534_v62, %v538_v2  ;;  %v518_v62 = vld [vmem:[%s6091_s4 + $0x288] sm:$0xff] }
  0x4b   :  { %1291 = vmatpush1.bf16.msra.mxu0 %v4515_v3  ;;  %v4561_v3 = vcombine.high %v526_v35, %v530_v42  ;;  %v522_v2 = vld [vmem:[%s6091_s4 + $0x2a8] sm:$0xff] }
  0x4c   :  { %1292 = vmatprep.subr.bf16.mxu0 %v4525_v11  ;;  %6442 = vst [vmem:[#allocation69_spill] sm:$0xff] %v4552_v61  ;;  %v4564_v11 = vcombine.low %v471_v12, %v475_v22  ;;  %v455_v12 = vld [vmem:[%s6091_s4 + $0x90] sm:$0xff] }
  0x4d   :  { %1268 = vmatpush2.bf16.msra.mxu1 %v4528_v25  ;;  %6443 = vst [vmem:[#allocation70_spill] sm:$0xff] %v4561_v3  ;;  %v4573_v25 = vcombine.high %v463_v51, %v467_v56  ;;  %v459_v22 = vld [vmem:[%s6091_s4 + $0xb0] sm:$0xff] }
  0x4e   :  { %1269 = vmatprep.subr.bf16.mxu1 %v4537_v33  ;;  %6444 = vst [vmem:[#allocation71_spill] sm:$0xff] %v4564_v11  ;;  %v4576_v33 = vcombine.low %v526_v35, %v530_v42  ;;  %v510_v35 = vld [vmem:[%s6091_s4 + $0x248] sm:$0xff] }
  0x4f   :  { %1293 = vmatpush1.bf16.msra.mxu0 %v4540_v10  ;;  %6445 = vst [vmem:[#allocation72_spill] sm:$0xff] %v4573_v25  ;;  %v4585_v10 = vcombine.high %v518_v62, %v522_v2  ;;  %v514_v42 = vld [vmem:[%s6091_s4 + $0x268] sm:$0xff] }
  0x50   :  { %1294 = vmatprep.subr.bf16.mxu0 %v4549_v45  ;;  %6446 = vst [vmem:[#allocation73_spill] sm:$0xff] %v4576_v33  ;;  %v4588_v45 = vcombine.low %v463_v51, %v467_v56  ;;  %v447_v51 = vld [vmem:[%s6091_s4 + $0x50] sm:$0xff] }
  0x51   :  { %1270 = vmatpush2.bf16.msra.mxu1 %v4552_v61  ;;  %6447 = vst [vmem:[#allocation74_spill] sm:$0xff] %v4585_v10  ;;  %v4597_v61 = vcombine.high %v455_v12, %v459_v22  ;;  %v451_v56 = vld [vmem:[%s6091_s4 + $0x70] sm:$0xff] }
  0x52   :  { %1271 = vmatprep.subr.bf16.mxu1 %v4561_v3  ;;  %6448 = vst [vmem:[#allocation75_spill] sm:$0xff] %v4588_v45  ;;  %v4600_v3 = vcombine.low %v518_v62, %v522_v2  ;;  %v502_v62 = vld [vmem:[%s6091_s4 + $0x208] sm:$0xff] }
  0x53   :  { %1295 = vmatpush1.bf16.msra.mxu0 %v4564_v11  ;;  %6449 = vst [vmem:[#allocation76_spill] sm:$0xff] %v4597_v61  ;;  %v4609_v11 = vcombine.high %v510_v35, %v514_v42  ;;  %v506_v2 = vld [vmem:[%s6091_s4 + $0x228] sm:$0xff] }
  0x54   :  { %1296 = vmatprep.subr.bf16.mxu0 %v4573_v25  ;;  %6450 = vst [vmem:[#allocation77_spill] sm:$0xff] %v4600_v3  ;;  %v4612_v25 = vcombine.low %v455_v12, %v459_v22  ;;  %v439_v12 = vld [vmem:[%s6091_s4 + $0x10] sm:$0xff] }
  0x55   :  { %1272 = vmatpush2.bf16.msra.mxu1 %v4576_v33  ;;  %6451 = vst [vmem:[#allocation78_spill] sm:$0xff] %v4609_v11  ;;  %v4621_v33 = vcombine.high %v447_v51, %v451_v56  ;;  %v443_v22 = vld [vmem:[%s6091_s4 + $0x30] sm:$0xff] }
  0x56   :  { %1273 = vmatprep.subr.bf16.mxu1 %v4585_v10  ;;  %6452 = vst [vmem:[#allocation79_spill] sm:$0xff] %v4612_v25  ;;  %v4624_v10 = vcombine.low %v510_v35, %v514_v42  ;;  %v496_v35 = vld [vmem:[%s6091_s4 + $0x1d8] sm:$0xff] }
  0x57   :  { %1297 = vmatpush1.bf16.msra.mxu0 %v4588_v45  ;;  %6453 = vst [vmem:[#allocation80_spill] sm:$0xff] %v4621_v33  ;;  %v4633_v45 = vcombine.high %v502_v62, %v506_v2  ;;  %v500_v42 = vld [vmem:[%s6091_s4 + $0x1f8] sm:$0xff] }
  0x58   :  { %1298 = vmatprep.subr.bf16.mxu0 %v4597_v61  ;;  %6454 = vst [vmem:[#allocation81_spill] sm:$0xff] %v4624_v10  ;;  %v4636_v61 = vcombine.low %v447_v51, %v451_v56  ;;  %v559_v51 = vld [vmem:[%s6091_s4 + $0x3d0] sm:$0xff] }
  0x59   :  { %1274 = vmatpush2.bf16.msra.mxu1 %v4600_v3  ;;  %6455 = vst [vmem:[#allocation82_spill] sm:$0xff] %v4633_v45  ;;  %v4645_v3 = vcombine.high %v439_v12, %v443_v22  ;;  %v563_v56 = vld [vmem:[%s6091_s4 + $0x3f0] sm:$0xff] }
  0x5a   :  { %1275 = vmatprep.subr.bf16.mxu1 %v4609_v11  ;;  %6456 = vst [vmem:[#allocation83_spill] sm:$0xff] %v4636_v61  ;;  %v4648_v11 = vcombine.low %v502_v62, %v506_v2  ;;  %v488_v62 = vld [vmem:[%s6091_s4 + $0x198] sm:$0xff] }
  0x5b   :  { %1299 = vmatpush1.bf16.msra.mxu0 %v4612_v25  ;;  %6457 = vst [vmem:[#allocation84_spill] sm:$0xff] %v4645_v3  ;;  %v4657_v25 = vcombine.high %v496_v35, %v500_v42  ;;  %v492_v2 = vld [vmem:[%s6091_s4 + $0x1b8] sm:$0xff] }
  0x5c   :  { %1300 = vmatprep.subr.bf16.mxu0 %v4621_v33  ;;  %6458 = vst [vmem:[#allocation85_spill] sm:$0xff] %v4648_v11  ;;  %v4660_v33 = vcombine.low %v439_v12, %v443_v22  ;;  %v551_v12 = vld [vmem:[%s6091_s4 + $0x390] sm:$0xff] }
  0x5d   :  { %1276 = vmatpush2.bf16.msra.mxu1 %v4624_v10  ;;  %6459 = vst [vmem:[#allocation86_spill] sm:$0xff] %v4657_v25  ;;  %v4669_v10 = vcombine.high %v559_v51, %v563_v56  ;;  %v555_v22 = vld [vmem:[%s6091_s4 + $0x3b0] sm:$0xff] }
  0x5e   :  { %1277 = vmatprep.subr.bf16.mxu1 %v4633_v45  ;;  %6460 = vst [vmem:[#allocation87_spill] sm:$0xff] %v4660_v33  ;;  %v4672_v45 = vcombine.low %v496_v35, %v500_v42  ;;  %v480_v35 = vld [vmem:[%s6091_s4 + $0x158] sm:$0xff]  ;;  %v4694_v6 = vcombine.high %v551_v12, %v555_v22 }
  0x5f   :  { %1301 = vmatpush1.bf16.msra.mxu0 %v4636_v61  ;;  %6461 = vst [vmem:[#allocation88_spill] sm:$0xff] %v4669_v10  ;;  %v4681_v61 = vcombine.high %v488_v62, %v492_v2  ;;  %v484_v42 = vld [vmem:[%s6091_s4 + $0x178] sm:$0xff] }
  0x60   :  { %1302 = vmatprep.subr.bf16.mxu0 %v4645_v3  ;;  %6462 = vst [vmem:[#allocation89_spill] sm:$0xff] %v4672_v45  ;;  %v4684_v3 = vcombine.low %v559_v51, %v563_v56  ;;  %6466 = vst [vmem:[#allocation92_spill] sm:$0xff] %v4694_v6  ;;  %v543_v51 = vld [vmem:[%s6091_s4 + $0x350] sm:$0xff] }
  0x61   :  { %1278 = vmatpush2.bf16.msra.mxu1 %v4648_v11  ;;  %6463 = vst [vmem:[#allocation90_spill] sm:$0xff] %v4681_v61  ;;  %v6465_v11 = vmov 0.0|0.0   ;;  %v547_v56 = vld [vmem:[%s6091_s4 + $0x370] sm:$0xff] }
  0x62   :  { %1329 = vmatprep.subr.bf16.mxu1 %v4657_v25  ;;  %6464 = vst [vmem:[#allocation91_spill] sm:$0xff] %v4684_v3  ;;  %v4697_v25 = vcombine.low %v488_v62, %v492_v2  ;;  %v472_v62 = vld [vmem:[%s6091_s4 + $0x118] sm:$0xff] }
  0x63   :  { %1303 = vmatpush1.bf16.msra.mxu0 %v4660_v33  ;;  %v4707_v33 = vcombine.high %v480_v35, %v484_v42  ;;  %v476_v2 = vld [vmem:[%s6091_s4 + $0x138] sm:$0xff] }
  0x64   :  { %1280 = vmatmul.mubr.bf16.vlgmr.msra.gmra.mxu1 %v6465_v11  ;;  %1304 = vmatprep.subr.bf16.mxu0 %v4669_v10  ;;  %6467 = vst [vmem:[#allocation93_spill] sm:$0xff] %v4697_v25  ;;  %v4710_v10 = vcombine.low %v551_v12, %v555_v22  ;;  %v535_v12 = vld [vmem:[%s6091_s4 + $0x310] sm:$0xff] }
  0x65   :  { %1330 = vmatpush1.bf16.msra.mxu1 %v4672_v45  ;;  %1361 = vmatprep.mubr.bf16.mxu1 %v6465_v11  ;;  %6468 = vst [vmem:[#allocation94_spill] sm:$0xff] %v4707_v33  ;;  %v4719_v45 = vcombine.high %v543_v51, %v547_v56  ;;  %v539_v22 = vld [vmem:[%s6091_s4 + $0x330] sm:$0xff] }
  0x66   :  { %1331 = vmatprep.subr.bf16.mxu1 %v4681_v61  ;;  %6469 = vst [vmem:[#allocation95_spill] sm:$0xff] %v4710_v10  ;;  %v4722_v61 = vcombine.low %v480_v35, %v484_v42  ;;  %v464_v35 = vld [vmem:[%s6091_s4 + $0xd8] sm:$0xff] }
  0x67   :  { %1305 = vmatpush2.bf16.msra.mxu0 %v4684_v3  ;;  %6470 = vst [vmem:[#allocation96_spill] sm:$0xff] %v4719_v45  ;;  %v4731_v3 = vcombine.high %v472_v62, %v476_v2  ;;  %v468_v42 = vld [vmem:[%s6091_s4 + $0xf8] sm:$0xff] }
  0x68   :  { %1306 = vmatprep.subr.bf16.mxu0 %v4694_v6  ;;  %6471 = vst [vmem:[#allocation97_spill] sm:$0xff] %v4722_v61  ;;  %v4734_v6 = vcombine.low %v543_v51, %v547_v56  ;;  %v527_v51 = vld [vmem:[%s6091_s4 + $0x2d0] sm:$0xff] }
  0x69   :  { %1332 = vmatpush1.bf16.msra.mxu1 %v4697_v25  ;;  %6472 = vst [vmem:[#allocation98_spill] sm:$0xff] %v4731_v3  ;;  %v4743_v25 = vcombine.high %v535_v12, %v539_v22  ;;  %v531_v56 = vld [vmem:[%s6091_s4 + $0x2f0] sm:$0xff] }
  0x6a   :  { %1333 = vmatprep.subr.bf16.mxu1 %v4707_v33  ;;  %6473 = vst [vmem:[#allocation99_spill] sm:$0xff] %v4734_v6  ;;  %v4746_v33 = vcombine.low %v472_v62, %v476_v2  ;;  %v456_v62 = vld [vmem:[%s6091_s4 + $0x98] sm:$0xff] }
  0x6b   :  { %1307 = vmatpush2.bf16.msra.mxu0 %v4710_v10  ;;  %6474 = vst [vmem:[#allocation100_spill] sm:$0xff] %v4743_v25  ;;  %v4755_v10 = vcombine.high %v464_v35, %v468_v42  ;;  %v460_v2 = vld [vmem:[%s6091_s4 + $0xb8] sm:$0xff] }
  0x6c   :  { %1308 = vmatprep.subr.bf16.mxu0 %v4719_v45  ;;  %6475 = vst [vmem:[#allocation101_spill] sm:$0xff] %v4746_v33  ;;  %v4758_v45 = vcombine.low %v535_v12, %v539_v22  ;;  %v519_v12 = vld [vmem:[%s6091_s4 + $0x290] sm:$0xff] }
  0x6d   :  { %1334 = vmatpush1.bf16.msra.mxu1 %v4722_v61  ;;  %6476 = vst [vmem:[#allocation102_spill] sm:$0xff] %v4755_v10  ;;  %v4767_v61 = vcombine.high %v527_v51, %v531_v56  ;;  %v523_v22 = vld [vmem:[%s6091_s4 + $0x2b0] sm:$0xff] }
  0x6e   :  { %1335 = vmatprep.subr.bf16.mxu1 %v4731_v3  ;;  %6477 = vst [vmem:[#allocation103_spill] sm:$0xff] %v4758_v45  ;;  %v4770_v3 = vcombine.low %v464_v35, %v468_v42  ;;  %v448_v35 = vld [vmem:[%s6091_s4 + $0x58] sm:$0xff] }
  0x6f   :  { %1309 = vmatpush2.bf16.msra.mxu0 %v4734_v6  ;;  %6478 = vst [vmem:[#allocation104_spill] sm:$0xff] %v4767_v61  ;;  %v4779_v6 = vcombine.high %v456_v62, %v460_v2  ;;  %v452_v42 = vld [vmem:[%s6091_s4 + $0x78] sm:$0xff] }
  0x70   :  { %1310 = vmatprep.subr.bf16.mxu0 %v4743_v25  ;;  %6479 = vst [vmem:[#allocation105_spill] sm:$0xff] %v4770_v3  ;;  %v4782_v25 = vcombine.low %v527_v51, %v531_v56  ;;  %v511_v51 = vld [vmem:[%s6091_s4 + $0x250] sm:$0xff] }
  0x71   :  { %1336 = vmatpush1.bf16.msra.mxu1 %v4746_v33  ;;  %6480 = vst [vmem:[#allocation106_spill] sm:$0xff] %v4779_v6  ;;  %v4791_v33 = vcombine.high %v519_v12, %v523_v22  ;;  %v515_v56 = vld [vmem:[%s6091_s4 + $0x270] sm:$0xff] }
  0x72   :  { %1337 = vmatprep.subr.bf16.mxu1 %v4755_v10  ;;  %6481 = vst [vmem:[#allocation107_spill] sm:$0xff] %v4782_v25  ;;  %v4794_v10 = vcombine.low %v456_v62, %v460_v2  ;;  %v440_v62 = vld [vmem:[%s6091_s4 + $0x18] sm:$0xff] }
  0x73   :  { %1311 = vmatpush2.bf16.msra.mxu0 %v4758_v45  ;;  %6482 = vst [vmem:[#allocation108_spill] sm:$0xff] %v4791_v33  ;;  %v4803_v45 = vcombine.high %v448_v35, %v452_v42  ;;  %v444_v2 = vld [vmem:[%s6091_s4 + $0x38] sm:$0xff] }
  0x74   :  { %1312 = vmatprep.subr.bf16.mxu0 %v4767_v61  ;;  %6483 = vst [vmem:[#allocation109_spill] sm:$0xff] %v4794_v10  ;;  %v4806_v61 = vcombine.low %v519_v12, %v523_v22  ;;  %v503_v12 = vld [vmem:[%s6091_s4 + $0x210] sm:$0xff] }
  0x75   :  { %1338 = vmatpush1.bf16.msra.mxu1 %v4770_v3  ;;  %6484 = vst [vmem:[#allocation110_spill] sm:$0xff] %v4803_v45  ;;  %v4815_v3 = vcombine.high %v511_v51, %v515_v56  ;;  %v507_v22 = vld [vmem:[%s6091_s4 + $0x230] sm:$0xff] }
  0x76   :  { %1339 = vmatprep.subr.bf16.mxu1 %v4779_v6  ;;  %6485 = vst [vmem:[#allocation111_spill] sm:$0xff] %v4806_v61  ;;  %v4818_v6 = vcombine.low %v448_v35, %v452_v42  ;;  %v560_v35 = vld [vmem:[%s6091_s4 + $0x3d8] sm:$0xff] }
  0x77   :  { %1313 = vmatpush2.bf16.msra.mxu0 %v4782_v25  ;;  %6486 = vst [vmem:[#allocation112_spill] sm:$0xff] %v4815_v3  ;;  %v4827_v25 = vcombine.high %v440_v62, %v444_v2  ;;  %v564_v42 = vld [vmem:[%s6091_s4 + $0x3f8] sm:$0xff] }
  0x78   :  { %1314 = vmatprep.subr.bf16.mxu0 %v4791_v33  ;;  %6487 = vst [vmem:[#allocation113_spill] sm:$0xff] %v4818_v6  ;;  %v4830_v33 = vcombine.low %v511_v51, %v515_v56  ;;  %v4845_v51 = vcombine.high %v560_v35, %v564_v42  ;;  %v4848_v56 = vcombine.low %v503_v12, %v507_v22 }
  0x79   :  { %1340 = vmatpush1.bf16.msra.mxu1 %v4794_v10  ;;  %6488 = vst [vmem:[#allocation114_spill] sm:$0xff] %v4827_v25  ;;  %v4839_v10 = vcombine.high %v503_v12, %v507_v22  ;;  %v544_v12 = vld [vmem:[%s6091_s4 + $0x358] sm:$0xff] }
  0x7a   :  { %1341 = vmatprep.subr.bf16.mxu1 %v4803_v45  ;;  %6489 = vst [vmem:[#allocation115_spill] sm:$0xff] %v4830_v33  ;;  %v4842_v45 = vcombine.low %v440_v62, %v444_v2  ;;  %6492 = vst [vmem:[#allocation118_spill] sm:$0xff] %v4845_v51  ;;  %v4858_v62 = vcombine.low %v560_v35, %v564_v42  ;;  %v548_v22 = vld [vmem:[%s6091_s4 + $0x378] sm:$0xff] }
  0x7b   :  { %1315 = vmatpush2.bf16.msra.mxu0 %v4806_v61  ;;  %6490 = vst [vmem:[#allocation116_spill] sm:$0xff] %v4839_v10  ;;  %6493 = vst [vmem:[#allocation119_spill] sm:$0xff] %v4848_v56  ;;  %v552_v61 = vld [vmem:[%s6091_s4 + $0x398] sm:$0xff]  ;;  %v4876_v42 = vcombine.high %v544_v12, %v548_v22 }
  0x7c   :  { %1316 = vmatprep.subr.bf16.mxu0 %v4815_v3  ;;  %6491 = vst [vmem:[#allocation117_spill] sm:$0xff] %v4842_v45  ;;  %v556_v3 = vld [vmem:[%s6091_s4 + $0x3b8] sm:$0xff]  ;;  %6494 = vst [vmem:[#allocation120_spill] sm:$0xff] %v4858_v62 }
  0x7d   :  { %1342 = vmatpush1.bf16.msra.mxu1 %v4818_v6  ;;  %v4861_v2 = vcombine.high %v552_v61, %v556_v3  ;;  %v4872_v35 = vcombine.low %v552_v61, %v556_v3  ;;  %6497 = vst [vmem:[#allocation123_spill] sm:$0xff] %v4876_v42  ;;  %v4887_v61 = vcombine.low %v544_v12, %v548_v22 }
  0x7e   :  { %1343 = vmatprep.subr.bf16.mxu1 %v4827_v25 }
  0x7f   :  { %1317 = vmatpush2.bf16.msra.mxu0 %v4830_v33  ;;  %6495 = vst [vmem:[#allocation121_spill] sm:$0xff] %v4861_v2  ;;  %6496 = vst [vmem:[#allocation122_spill] sm:$0xff] %v4872_v35  ;;  %v532_v33 = vld [vmem:[%s6091_s4 + $0x2f8] sm:$0xff] }
  0x80   :  { %1318 = vmatprep.subr.bf16.mxu0 %v4839_v10  ;;  %v540_v10 = vld [vmem:[%s6091_s4 + $0x338] sm:$0xff]  ;;  %6498 = vst [vmem:[#allocation124_spill] sm:$0xff] %v4887_v61 }
  0x81   :  { %1344 = vmatpush1.bf16.msra.mxu1 %v4842_v45 }
  0x82   :  { %1345 = vmatprep.subr.bf16.mxu1 %v4845_v51 }
  0x83   :  { %1319 = vmatpush2.bf16.msra.mxu0 %v4848_v56  ;;  %v536_v56 = vld [vmem:[%s6091_s4 + $0x318] sm:$0xff] }
  0x84   :  { %1453 = vmatprep.subr.bf16.mxu0 %v4056_v7  ;;  %v4890_v3 = vcombine.high %v536_v56, %v540_v10  ;;  %v528_v7 = vld [vmem:[%s6091_s4 + $0x2d8] sm:$0xff]  ;;  %v4901_v12 = vcombine.low %v536_v56, %v540_v10 }
  0x85   :  { %1346 = vmatpush2.bf16.msra.mxu1 %v4858_v62  ;;  %v4904_v22 = vcombine.high %v528_v7, %v532_v33  ;;  %v4915_v10 = vcombine.low %v528_v7, %v532_v33 }
  0x86   :  { %1321 = vmatmul.mubr.bf16.vlgmr.msra.gmra.mxu0 %v6465_v11  ;;  %1347 = vmatprep.subr.bf16.mxu1 %v4861_v2  ;;  %6499 = vst [vmem:[#allocation125_spill] sm:$0xff] %v4890_v3  ;;  %6500 = vst [vmem:[#allocation126_spill] sm:$0xff] %v4901_v12 }
  0x87   :  { %1454 = vmatpush1.bf16.msra.mxu0 %v4058_v8  ;;  %6501 = vst [vmem:[#allocation127_spill] sm:$0xff] %v4904_v22  ;;  %v524_v8 = vld [vmem:[%s6091_s4 + $0x2b8] sm:$0xff]  ;;  %6502 = vst [vmem:[#allocation128_spill] sm:$0xff] %v4915_v10 }
  0x88   :  { %1455 = vmatprep.subr.bf16.mxu0 %v4077_v15  ;;  %v520_v15 = vld [vmem:[%s6091_s4 + $0x298] sm:$0xff] }
  0x89   :  { %1348 = vmatpush2.bf16.msra.mxu1 %v4872_v35  ;;  %v4918_v56 = vcombine.high %v520_v15, %v524_v8  ;;  %v4929_v7 = vcombine.low %v520_v15, %v524_v8 }
  0x8a   :  { %1349 = vmatprep.subr.bf16.mxu1 %v4876_v42 }
  0x8b   :  { %1456 = vmatpush1.bf16.msra.mxu0 %v4083_v17  ;;  %6503 = vst [vmem:[#allocation129_spill] sm:$0xff] %v4918_v56  ;;  %v516_v17 = vld [vmem:[%s6091_s4 + $0x278] sm:$0xff]  ;;  %6504 = vst [vmem:[#allocation130_spill] sm:$0xff] %v4929_v7 }
  0x8c   :  { %1457 = vmatprep.subr.bf16.mxu0 %v4097_v21  ;;  %v512_v21 = vld [vmem:[%s6091_s4 + $0x258] sm:$0xff] }
  0x8d   :  { %1350 = vmatpush2.bf16.msra.mxu1 %v4887_v61  ;;  %v4932_v33 = vcombine.high %v512_v21, %v516_v17  ;;  %v4943_v8 = vcombine.low %v512_v21, %v516_v17  ;;  %v6242_v17 = vlaneseq }
  0x8e   :  { %1351 = vmatprep.subr.bf16.mxu1 %v4890_v3 }
  0x8f   :  { %1458 = vmatpush1.bf16.msra.mxu0 %v4117_v27  ;;  %6505 = vst [vmem:[#allocation131_spill] sm:$0xff] %v4932_v33  ;;  %v508_v27 = vld [vmem:[%s6091_s4 + $0x238] sm:$0xff]  ;;  %6506 = vst [vmem:[#allocation132_spill] sm:$0xff] %v4943_v8  ;;  %v4989_v21 = vshrl.u32 %v6242_v17, 7 }
  0x90   :  { %1459 = vmatprep.subr.bf16.mxu0 %v4132_v31  ;;  %v504_v31 = vld [vmem:[%s6091_s4 + $0x218] sm:$0xff] }
  0x91   :  { %1352 = vmatpush2.bf16.msra.mxu1 %v4901_v12  ;;  %v4946_v15 = vcombine.high %v504_v31, %v508_v27  ;;  %v72_v17 = vsub.s32 1, %v4989_v21 }
  0x92   :  { %1353 = vmatprep.subr.bf16.mxu1 %v4904_v22 }
  0x93   :  { %1460 = vmatpush1.bf16.msra.mxu0 %v4147_v36  ;;  %6507 = vst [vmem:[#allocation133_spill] sm:$0xff] %v4946_v15 }
  0x94   :  { %1461 = vmatprep.subr.bf16.mxu0 %v4158_v39  ;;  %v4951_v39 = vcombine.low %v504_v31, %v508_v27  ;;  %v6509_v27 = vld [vmem:[#allocation55_spill] sm:$0xff]  ;;  %v68_v31 = vsub.s32 0, %v4989_v21 }
  0x95   :  { %1354 = vmatpush2.bf16.msra.mxu1 %v4915_v10 }
  0x96   :  { %1355 = vmatprep.subr.bf16.mxu1 %v4918_v56  ;;  %6508 = vst [vmem:[#allocation134_spill] sm:$0xff] %v4951_v39 }
  0x97   :  { %1462 = vmatpush1.bf16.msra.mxu0 %v4174_v44 }
  0x98   :  { %1463 = vmatprep.subr.bf16.mxu0 %v4185_v47 }
  0x99   :  { %1356 = vmatpush2.bf16.msra.mxu1 %v4929_v7 }
  0x9a   :  { %1357 = vmatprep.subr.bf16.mxu1 %v4932_v33 }
  0x9b   :  { %1464 = vmatpush1.bf16.msra.mxu0 %v4201_v52 }
  0x9c   :  { %1465 = vmatprep.subr.bf16.mxu0 %v4212_v55 }
  0x9d   :  { %1358 = vmatpush2.bf16.msra.mxu1 %v4943_v8 }
  0x9e   :  { %1359 = vmatprep.subr.bf16.mxu1 %v4946_v15 }
  0x9f   :  { %1466 = vmatpush1.bf16.msra.mxu0 %v4228_v60 }
  0xa0   :  { %1467 = vmatprep.subr.bf16.mxu0 %v4239_v63 }
  0xa1   :  { %1360 = vmatpush2.bf16.msra.mxu1 %v4951_v39 }
  0xa2   :  { %1494 = vmatprep.subr.bf16.mxu1 %v4274_v14 }
  0xa3   :  { %1468 = vmatpush1.bf16.msra.mxu0 %v4261_v9 }
  0xa4   :  { %1362 = vmatmul.mubr.bf16.vlgmr.msra.gmra.mxu1 %v6465_v11  ;;  %1469 = vmatprep.subr.bf16.mxu0 %v4279_v18  ;;  %v6510_v11 = vld [vmem:[#allocation56_spill] sm:$0xff] }
  0xa5   :  { %1495 = vmatpush1.bf16.msra.mxu1 %v4277_v16 }
  0xa6   :  { %1496 = vmatprep.subr.bf16.mxu1 %v4288_v23 }
  0xa7   :  { %1470 = vmatpush2.bf16.msra.mxu0 %v4291_v24  ;;  %v6519_v24 = vld [vmem:[#allocation73_spill] sm:$0xff] }
  0xa8   :  { %1471 = vmatprep.subr.bf16.mxu0 %v4302_v28  ;;  %v6517_v28 = vld [vmem:[#allocation69_spill] sm:$0xff] }
  0xa9   :  { %1497 = vmatpush1.bf16.msra.mxu1 %v4306_v30 }
  0xaa   :  { %1498 = vmatprep.subr.bf16.mxu1 %v4315_v20 }
  0xab   :  { %1472 = vmatpush2.bf16.msra.mxu0 %v4318_v34  ;;  %v6516_v34 = vld [vmem:[#allocation66_spill] sm:$0xff] }
  0xac   :  { %1473 = vmatprep.subr.bf16.mxu0 %v4328_v38 }
  0xad   :  { %1499 = vmatpush1.bf16.msra.mxu1 %v4333_v40 }
  0xae   :  { %1500 = vmatprep.subr.bf16.mxu1 %v4343_v43 }
  0xaf   :  { %1474 = vmatpush2.bf16.msra.mxu0 %v4346_v29  ;;  %v6515_v29 = vld [vmem:[#allocation65_spill] sm:$0xff] }
  0xb0   :  { %1475 = vmatprep.subr.bf16.mxu0 %v4355_v48  ;;  %v76_v48 = vsub.s32 2, %v4989_v21 }
  0xb1   :  { %1501 = vmatpush1.bf16.msra.mxu1 %v4358_v49 }
  0xb2   :  { %1502 = vmatprep.subr.bf16.mxu1 %v4367_v53 }
  0xb3   :  { %1476 = vmatpush2.bf16.msra.mxu0 %v4370_v54 }
  0xb4   :  { %1477 = vmatprep.subr.bf16.mxu0 %v4379_v58 }
  0xb5   :  { %1503 = vmatpush1.bf16.msra.mxu1 %v4382_v59 }
  0xb6   :  { %1504 = vmatprep.subr.bf16.mxu1 %v4391_v0 }
  0xb7   :  { %1478 = vmatpush2.bf16.msra.mxu0 %v4394_v1  ;;  %v6514_v1 = vld [vmem:[#allocation62_spill] sm:$0xff] }
  0xb8   :  { %1479 = vmatprep.subr.bf16.mxu0 %v4403_v4  ;;  %v6513_v4 = vld [vmem:[#allocation61_spill] sm:$0xff] }
  0xb9   :  { %1505 = vmatpush1.bf16.msra.mxu1 %v4406_v5 }
  0xba   :  { %1506 = vmatprep.subr.bf16.mxu1 %v4415_v13 }
  0xbb   :  { %1480 = vmatpush2.bf16.msra.mxu0 %v4418_v19 }
  0xbc   :  { %1481 = vmatprep.subr.bf16.mxu0 %v4427_v26  ;;  %v5000_v26 = vld [vmem:[%s6092_s5] sm:$0xff] }
  0xbd   :  { %1507 = vmatpush1.bf16.msra.mxu1 %v4430_v32  ;;  %v69_v19 = vrot.slane %v5000_v26, %v68_v31 }
  0xbe   :  { %1508 = vmatprep.subr.bf16.mxu1 %v4439_v37 }
  0xbf   :  { %1482 = vmatpush2.bf16.msra.mxu0 %v4442_v41  ;;  %v6511_v41 = vld [vmem:[#allocation57_spill] sm:$0xff] }
  0xc0   :  { %1483 = vmatprep.subr.bf16.mxu0 %v4451_v46  ;;  %v6512_v46 = vld [vmem:[#allocation58_spill] sm:$0xff] }
  0xc1   :  { %1509 = vmatpush1.bf16.msra.mxu1 %v4454_v50 }
  0xc2   :  { %1510 = vmatprep.subr.bf16.mxu1 %v4463_v57 }
  0xc3   :  { %1484 = vmatpush2.bf16.msra.mxu0 %v6509_v27  ;;  %v73_v27 = vrot.slane %v5000_v26, %v72_v17  ;;  %v77_v17 = vrot.slane %v5000_v26, %v76_v48 }
  0xc4   :  { %1535 = vmatprep.subr.bf16.mxu0 %v6510_v11 }
  0xc5   :  { %1511 = vmatpush2.bf16.msra.mxu1 %v6511_v41 }
  0xc6   :  { %1512 = vmatprep.subr.bf16.mxu1 %v6512_v46  ;;  %v80_v46 = vsub.s32 3, %v4989_v21 }
  0xc9   :  { %1513 = vmatpush2.bf16.msra.mxu1 %v6513_v4 }
  0xca   :  { %1514 = vmatprep.subr.bf16.mxu1 %v6514_v1 }
  0xcc   :  { %v179_v11 = vpop.f32.mrf.mxu1 }
  0xcd   :  { %v180_v58 = vadd.f32 %v179_v11, %v69_v19  ;;  %1515 = vmatpush2.bf16.msra.mxu1 %v6515_v29  ;;  %v6518_v11 = vld [vmem:[#allocation70_spill] sm:$0xff]  ;;  %v81_v29 = vrot.slane %v5000_v26, %v80_v46  ;;  %v6521_v46 = vld [vmem:[#allocation77_spill] sm:$0xff] }
  0xce   :  { %v181_v54 = vpop.f32.mrf.mxu1  ;;  %1516 = vmatprep.subr.bf16.mxu1 %v6516_v34  ;;  %v84_v34 = vsub.s32 4, %v4989_v21 }
  0xcf   :  { %421 = vst [vmem:[#allocation2 + $0x30] sm:$0xff] %v180_v58  ;;  %v182_v38 = vadd.f32 %v181_v54, %v73_v27 }
  0xd0   :  { %v185_v31 = vpop.f32.mrf.mxu1 }
  0xd1   :  { %422 = vst [vmem:[#allocation2] sm:$0xff] %v182_v38  ;;  %v186_v4 = vadd.f32 %v185_v31, %v69_v19  ;;  %1517 = vmatpush2.bf16.msra.mxu1 %v6517_v28  ;;  %v6520_v19 = vld [vmem:[#allocation74_spill] sm:$0xff]  ;;  %v88_v31 = vsub.s32 5, %v4989_v21 }
  0xd2   :  { %v187_v1 = vpop.f32.mrf.mxu1  ;;  %1518 = vmatprep.subr.bf16.mxu1 %v6518_v11 }
  0xd3   :  { %429 = vst [vmem:[#allocation2 + $0x40] sm:$0xff] %v186_v4  ;;  %v188_v41 = vadd.f32 %v187_v1, %v73_v27  ;;  %v85_v1 = vrot.slane %v5000_v26, %v84_v34  ;;  %v6522_v27 = vld [vmem:[#allocation78_spill] sm:$0xff] }
  0xd4   :  { %v256_v58 = vpop.f32.mrf.mxu1 }
  0xd5   :  { %430 = vst [vmem:[#allocation2 + $0x20] sm:$0xff] %v188_v41  ;;  %v257_v54 = vadd.f32 %v256_v58, %v77_v17  ;;  %1519 = vmatpush2.bf16.msra.mxu1 %v6519_v24  ;;  %v89_v24 = vrot.slane %v5000_v26, %v88_v31  ;;  %v6525_v31 = vld [vmem:[#allocation85_spill] sm:$0xff] }
  0xd6   :  { %v258_v38 = vpop.f32.mrf.mxu1  ;;  %1520 = vmatprep.subr.bf16.mxu1 %v6520_v19  ;;  %v6523_v19 = vld [vmem:[#allocation81_spill] sm:$0xff] }
  0xd7   :  { %423 = vst [vmem:[#allocation2 + $0x58] sm:$0xff] %v257_v54  ;;  %v259_v48 = vadd.f32 %v258_v38, %v81_v29  ;;  %v92_v38 = vsub.s32 6, %v4989_v21 }
  0xd8   :  { %v262_v28 = vpop.f32.mrf.mxu1 }
  0xd9   :  { %424 = vst [vmem:[#allocation2 + $0x18] sm:$0xff] %v259_v48  ;;  %v263_v4 = vadd.f32 %v262_v28, %v77_v17  ;;  %1521 = vmatpush2.bf16.msra.mxu1 %v6521_v46  ;;  %v6524_v28 = vld [vmem:[#allocation82_spill] sm:$0xff]  ;;  %v96_v17 = vsub.s32 7, %v4989_v21 }
  0xda   :  { %v264_v41 = vpop.f32.mrf.mxu1  ;;  %1522 = vmatprep.subr.bf16.mxu1 %v6522_v27 }
  0xdb   :  { %431 = vst [vmem:[#allocation2 + $0x10] sm:$0xff] %v263_v4  ;;  %v265_v58 = vadd.f32 %v264_v41, %v81_v29  ;;  %v93_v29 = vrot.slane %v5000_v26, %v92_v38 }
  0xdc   :  { %v333_v11 = vpop.f32.mrf.mxu1 }
  0xdd   :  { %432 = vst [vmem:[#allocation2 + $0x38] sm:$0xff] %v265_v58  ;;  %v334_v54 = vadd.f32 %v333_v11, %v85_v1  ;;  %1523 = vmatpush2.bf16.msra.mxu1 %v6523_v19  ;;  %v6526_v11 = vld [vmem:[#allocation86_spill] sm:$0xff]  ;;  %v97_v19 = vrot.slane %v5000_v26, %v96_v17 }
  0xde   :  { %v335_v48 = vpop.f32.mrf.mxu1  ;;  %1524 = vmatprep.subr.bf16.mxu1 %v6524_v28 }
  0xdf   :  { %425 = vst [vmem:[#allocation2 + $0x50] sm:$0xff] %v334_v54  ;;  %v336_v34 = vadd.f32 %v335_v48, %v89_v24 }
  0xe0   :  { %v339_v46 = vpop.f32.mrf.mxu1 }
  0xe1   :  { %426 = vst [vmem:[#allocation2 + $0x68] sm:$0xff] %v336_v34  ;;  %v340_v4 = vadd.f32 %v339_v46, %v85_v1  ;;  %1525 = vmatpush2.bf16.msra.mxu1 %v6525_v31 }
  0xe2   :  { %v341_v41 = vpop.f32.mrf.mxu1  ;;  %1576 = vmatprep.subr.bf16.mxu1 %v6526_v11  ;;  %v1370_v11 = vld [vmem:[#allocation2 + $0x30] sm:$0x3] }
  0xe3   :  { %433 = vst [vmem:[#allocation2 + $0x60] sm:$0xff] %v340_v4  ;;  %v342_v58 = vadd.f32 %v341_v41, %v89_v24  ;;  %v1371_v41 = vld [vmem:[#allocation2] sm:$0x3] }
  0xe4   :  { %v410_v27 = vpop.f32.mrf.mxu1 }
  0xe5   :  { %434 = vst [vmem:[#allocation2 + $0x70] sm:$0xff] %v342_v58  ;;  %v411_v54 = vadd.f32 %v410_v27, %v93_v29 }
  0xe6   :  { %v412_v48 = vpop.f32.mrf.mxu1 }
  0xe7   :  { %427 = vst [vmem:[#allocation2 + $0x8] sm:$0xff] %v411_v54  ;;  %v413_v21 = vadd.f32 %v412_v48, %v97_v19 }
  0xe8   :  { %v416_v28 = vpop.f32.mrf.mxu1 }
  0xe9   :  { %428 = vst [vmem:[#allocation2 + $0x48] sm:$0xff] %v413_v21  ;;  %v417_v1 = vadd.f32 %v416_v28, %v93_v29 }
  0xea   :  { %v418_v46 = vpop.f32.mrf.mxu1 }
  0xeb   :  { %435 = vst [vmem:[#allocation2 + $0x78] sm:$0xff] %v417_v1  ;;  %v419_v38 = vadd.f32 %v418_v46, %v97_v19  ;;  %v1372_v1 = vld [vmem:[#allocation2 + $0x58] sm:$0x3] }
  0xed   :  { %436 = vst [vmem:[#allocation2 + $0x28] sm:$0xff] %v419_v38  ;;  %v1373_v38 = vld [vmem:[#allocation2 + $0x18] sm:$0x3] }
 0x106   :  { %v1240_v34 = vpop.f32.mrf.mxu0 }
 0x107   :  { %v1374_v24 = vadd.f32 %v1370_v11, %v1240_v34 }
 0x108   :  { %v1242_v31 = vpop.f32.mrf.mxu0 }
 0x109   :  { %v1375_v26 = vadd.f32 %v1371_v41, %v1242_v31  ;;  %v3602_v58 = vmul.f32 -1.442695, %v1374_v24 }
 0x10a   :  { %v1244_v4 = vpop.f32.mrf.mxu0 }
 0x10b   :  { %v3603_v27 = vmul.f32 -1.442695, %v1375_v26  ;;  %3702 = vpow2.f32 %v3602_v58 }
 0x10c   :  { %v1245_v17 = vpop.f32.mrf.mxu0 }
 0x10d   :  { %3704 = vpow2.f32 %v3603_v27 }
 0x118   :  { %v3703_v54 = vpop.eup %3702 }
 0x119   :  { %v1407_v21 = vadd.f32 1.0, %v3703_v54 }
 0x11a   :  { %v3705_v48 = vpop.eup %3704 }
 0x11b   :  { %v1408_v28 = vadd.f32 1.0, %v3705_v48  ;;  %3706 = vrcp.f32 %v1407_v21  ;;  %v1378_v21 = vld [vmem:[#allocation2 + $0x60] sm:$0xc0] }
 0x11d   :  { %3708 = vrcp.f32 %v1408_v28 }
 0x124   :  { %v1281_v29 = vpop.f32.mrf.mxu1 }
 0x125   :  { %v1376_v19 = vadd.f32 %v1372_v1, %v1281_v29  ;;  %v1379_v29 = vld [vmem:[#allocation2 + $0x70] sm:$0xc0] }
 0x126   :  { %v1283_v46 = vpop.f32.mrf.mxu1 }
 0x127   :  { %v3604_v57 = vmul.f32 -1.442695, %v1376_v19  ;;  %v1377_v4 = vadd.f32 %v1373_v38, %v1283_v46  ;;  %v1386_v19 = vrot.slane %v1378_v21, 6  ;;  %v1387_v46 = vrot.slane %v1379_v29, 6 }
 0x128   :  { %v1285_v11 = vpop.f32.mrf.mxu1  ;;  %v3707_v34 = vpop.eup %3706 }
 0x129   :  { %3710 = vpow2.f32 %v3604_v57 }
 0x12a   :  { %3712 = vtanh.f32 %v1377_v4  ;;  %v1286_v31 = vpop.f32.mrf.mxu1  ;;  %v3709_v24 = vpop.eup %3708 }
 0x12b   :  { %v1417_v58 = vmul.f32 0.0, %v3709_v24 }
 0x136   :  { %v3711_v41 = vpop.eup %3710 }
 0x137   :  { %v3713_v26 = vpop.eup %3712  ;;  %v1409_v17 = vadd.f32 1.0, %v3711_v41 }
 0x138   :  { %v1418_v27 = vmul.f32 %v3713_v26, %v3707_v34 }
 0x139   :  { %3714 = vrcp.f32 %v1409_v17  ;;  %v1380_v17 = vld [vmem:[#allocation2 + $0x78] sm:$0xc0] }
 0x13a   :  { %v5033_v54 = vadd.f32 %v1418_v27, %v1417_v58  ;;  %v1381_v27 = vld [vmem:[#allocation2 + $0x28] sm:$0xc0]  ;;  %v1388_v18 = vrot.slane %v1380_v17, 6 }
 0x13b   :  { %v1389_v29 = vrot.slane %v1381_v27, 6  ;;  %v6528_v27 = vld [vmem:[#allocation59_spill] sm:$0xff] }
 0x13c   :  { %6527 = vst [vmem:[#allocation135_spill] sm:$0xff] %v5033_v54  ;;  %3716 = vtanh.f32 %v5033_v54 }
 0x146   :  { %v1322_v48 = vpop.f32.mrf.mxu0  ;;  %v3715_v28 = vpop.eup %3714 }
 0x147   :  { %v1394_v11 = vadd.f32 %v1386_v19, %v1322_v48 }
 0x148   :  { %v1324_v1 = vpop.f32.mrf.mxu0 }
 0x149   :  { %v3717_v57 = vpop.eup %3716  ;;  %v1395_v31 = vadd.f32 %v1387_v46, %v1324_v1  ;;  %v3605_v34 = vmul.f32 -1.442695, %v1394_v11 }
 0x14a   :  { %v1326_v38 = vpop.f32.mrf.mxu0  ;;  %v1421_v4 = vmul.f32 %v3717_v57, %v3715_v28 }
 0x14b   :  { %v3606_v24 = vmul.f32 -1.442695, %v1395_v31  ;;  %3718 = vpow2.f32 %v3605_v34 }
 0x14c   :  { %v1327_v41 = vpop.f32.mrf.mxu0  ;;  %1446 = vst [vmem:[#allocation3 + $0x18] sm:$0x3] %v1421_v4 }
 0x14d   :  { %3720 = vpow2.f32 %v3606_v24 }
 0x158   :  { %v3719_v26 = vpop.eup %3718 }
 0x159   :  { %v1431_v54 = vadd.f32 1.0, %v3719_v26 }
 0x15a   :  { %v3721_v58 = vpop.eup %3720 }
 0x15b   :  { %v1432_v50 = vadd.f32 1.0, %v3721_v58  ;;  %3722 = vrcp.f32 %v1431_v54  ;;  %v5039_v58 = vpack.c.bf16 %v1421_v4, %v1421_v4  ;;  %v6533_v4 = vld [vmem:[#allocation93_spill] sm:$0xff] }
 0x15d   :  { %3724 = vrcp.f32 %v1432_v50 }
 0x164   :  { %v1363_v9 = vpop.f32.mrf.mxu1 }
 0x165   :  { %v1396_v21 = vadd.f32 %v1388_v18, %v1363_v9 }
 0x166   :  { %v1365_v38 = vpop.f32.mrf.mxu1 }
 0x167   :  { %v3607_v48 = vmul.f32 -1.442695, %v1396_v21  ;;  %v1397_v28 = vadd.f32 %v1389_v29, %v1365_v38  ;;  %v6529_v21 = vld [vmem:[#allocation89_spill] sm:$0xff]  ;;  %v6530_v29 = vld [vmem:[#allocation60_spill] sm:$0xff]  ;;  %v6531_v38 = vld [vmem:[#allocation90_spill] sm:$0xff] }
 0x168   :  { %v1367_v1 = vpop.f32.mrf.mxu1  ;;  %v3723_v19 = vpop.eup %3722 }
 0x169   :  { %3726 = vpow2.f32 %v3607_v48  ;;  %v6532_v48 = vld [vmem:[#allocation63_spill] sm:$0xff]  ;;  %v6535_v1 = vld [vmem:[#allocation94_spill] sm:$0xff] }
 0x16a   :  { %3728 = vtanh.f32 %v1397_v28  ;;  %v1368_v57 = vpop.f32.mrf.mxu1  ;;  %v3725_v46 = vpop.eup %3724  ;;  %v6534_v28 = vld [vmem:[#allocation64_spill] sm:$0xff] }
 0x16b   :  { %v1441_v34 = vmul.f32 0.0, %v3725_v46  ;;  %v6536_v57 = vld [vmem:[#allocation67_spill] sm:$0xff]  ;;  %v6538_v46 = vld [vmem:[#allocation68_spill] sm:$0xff] }
 0x176   :  { %v3727_v11 = vpop.eup %3726 }
 0x177   :  { %v3729_v31 = vpop.eup %3728  ;;  %v1433_v41 = vadd.f32 1.0, %v3727_v11  ;;  %v6539_v11 = vld [vmem:[#allocation98_spill] sm:$0xff] }
 0x178   :  { %v1442_v24 = vmul.f32 %v3729_v31, %v3723_v19  ;;  %v6537_v19 = vld [vmem:[#allocation97_spill] sm:$0xff]  ;;  %v6540_v31 = vld [vmem:[#allocation71_spill] sm:$0xff] }
 0x179   :  { %3730 = vrcp.f32 %v1433_v41  ;;  %v6541_v41 = vld [vmem:[#allocation101_spill] sm:$0xff] }
 0x17a   :  { %v5036_v26 = vadd.f32 %v1442_v24, %v1441_v34  ;;  %v6542_v34 = vld [vmem:[#allocation72_spill] sm:$0xff]  ;;  %v6543_v24 = vld [vmem:[#allocation102_spill] sm:$0xff] }
 0x17c   :  { %3732 = vtanh.f32 %v5036_v26 }
 0x186   :  { %v3731_v9 = vpop.eup %3730 }
 0x189   :  { %v3733_v18 = vpop.eup %3732 }
 0x18a   :  { %v1445_v54 = vmul.f32 %v3733_v18, %v3731_v9  ;;  %v6544_v9 = vld [vmem:[#allocation75_spill] sm:$0xff]  ;;  %v6545_v18 = vld [vmem:[#allocation105_spill] sm:$0xff] }
 0x18c   :  { %v1448_v50 = vrot.slane %v1445_v54, 2  ;;  %v1452_v17 = vpack.c.bf16 %v1445_v54, %v1445_v54  ;;  %v6546_v54 = vld [vmem:[#allocation76_spill] sm:$0xff] }
 0x18e   :  { %1450 = vst [vmem:[#allocation3] sm:$0xc0] %v1448_v50  ;;  %1485 = vmatprep.mubr.bf16.mxu0 %v1452_v17  ;;  %1526 = vmatprep.mubr.bf16.mxu1 %v1452_v17  ;;  %v6547_v50 = vld [vmem:[#allocation106_spill] sm:$0xff] }
 0x18f   :  { %1486 = vmatmul.mubr.bf16.vlgmr.msra.gmra.mxu0 %v5039_v58  ;;  %1527 = vmatmul.mubr.bf16.vlgmr.msra.gmra.mxu1 %v5039_v58 }
 0x190   :  { %1536 = vmatpush1.bf16.msra.mxu0 %v6528_v27  ;;  %1577 = vmatpush1.bf16.msra.mxu1 %v6529_v21 }
 0x191   :  { %1567 = vmatprep.mubr.bf16.mxu0 %v1452_v17  ;;  %1608 = vmatprep.mubr.bf16.mxu1 %v1452_v17  ;;  %v6548_v17 = vld [vmem:[#allocation79_spill] sm:$0xff] }
 0x192   :  { %1537 = vmatprep.subr.bf16.mxu0 %v6530_v29  ;;  %1578 = vmatprep.subr.bf16.mxu1 %v6531_v38 }
 0x194   :  { %1538 = vmatpush1.bf16.msra.mxu0 %v6532_v48  ;;  %1579 = vmatpush1.bf16.msra.mxu1 %v6533_v4 }
 0x195   :  { %1539 = vmatprep.subr.bf16.mxu0 %v6534_v28  ;;  %1580 = vmatprep.subr.bf16.mxu1 %v6535_v1 }
 0x198   :  { %1540 = vmatpush1.bf16.msra.mxu0 %v6536_v57  ;;  %1581 = vmatpush1.bf16.msra.mxu1 %v6537_v19 }
 0x199   :  { %1541 = vmatprep.subr.bf16.mxu0 %v6538_v46  ;;  %1582 = vmatprep.subr.bf16.mxu1 %v6539_v11  ;;  %v6549_v46 = vld [vmem:[#allocation109_spill] sm:$0xff]  ;;  %v6550_v11 = vld [vmem:[#allocation80_spill] sm:$0xff] }
 0x19c   :  { %1542 = vmatpush1.bf16.msra.mxu0 %v6540_v31  ;;  %1583 = vmatpush1.bf16.msra.mxu1 %v6541_v41  ;;  %v6551_v31 = vld [vmem:[#allocation110_spill] sm:$0xff]  ;;  %v6552_v41 = vld [vmem:[#allocation83_spill] sm:$0xff] }
 0x19d   :  { %1543 = vmatprep.subr.bf16.mxu0 %v6542_v34  ;;  %1584 = vmatprep.subr.bf16.mxu1 %v6543_v24  ;;  %v6553_v24 = vld [vmem:[#allocation84_spill] sm:$0xff] }
 0x1a0   :  { %1544 = vmatpush1.bf16.msra.mxu0 %v6544_v9  ;;  %1585 = vmatpush1.bf16.msra.mxu1 %v6545_v18  ;;  %v6554_v18 = vld [vmem:[#allocation87_spill] sm:$0xff] }
 0x1a1   :  { %1545 = vmatprep.subr.bf16.mxu0 %v6546_v54  ;;  %1586 = vmatprep.subr.bf16.mxu1 %v6547_v50  ;;  %v6555_v50 = vld [vmem:[#allocation88_spill] sm:$0xff] }
 0x1a4   :  { %1546 = vmatpush1.bf16.msra.mxu0 %v6548_v17  ;;  %1587 = vmatpush1.bf16.msra.mxu1 %v6549_v46  ;;  %v6556_v46 = vld [vmem:[#allocation91_spill] sm:$0xff] }
 0x1a5   :  { %1547 = vmatprep.subr.bf16.mxu0 %v6550_v11  ;;  %1588 = vmatprep.subr.bf16.mxu1 %v6551_v31  ;;  %v6557_v31 = vld [vmem:[#allocation92_spill] sm:$0xff] }
 0x1a8   :  { %1548 = vmatpush1.bf16.msra.mxu0 %v6552_v41  ;;  %1589 = vmatpush1.bf16.msra.mxu1 %v4818_v6  ;;  %v6558_v6 = vld [vmem:[#allocation95_spill] sm:$0xff] }
 0x1a9   :  { %1549 = vmatprep.subr.bf16.mxu0 %v6553_v24  ;;  %1590 = vmatprep.subr.bf16.mxu1 %v4827_v25  ;;  %v6559_v25 = vld [vmem:[#allocation96_spill] sm:$0xff] }
 0x1ac   :  { %1550 = vmatpush1.bf16.msra.mxu0 %v6554_v18  ;;  %1591 = vmatpush1.bf16.msra.mxu1 %v4842_v45  ;;  %v6560_v45 = vld [vmem:[#allocation99_spill] sm:$0xff] }
 0x1ad   :  { %1551 = vmatprep.subr.bf16.mxu0 %v6555_v50  ;;  %1592 = vmatprep.subr.bf16.mxu1 %v4845_v51  ;;  %v6561_v51 = vld [vmem:[#allocation100_spill] sm:$0xff] }
 0x1b0   :  { %1552 = vmatpush2.bf16.msra.mxu0 %v6556_v46  ;;  %1593 = vmatpush2.bf16.msra.mxu1 %v4858_v62  ;;  %v6562_v62 = vld [vmem:[#allocation103_spill] sm:$0xff] }
 0x1b1   :  { %1553 = vmatprep.subr.bf16.mxu0 %v6557_v31  ;;  %1594 = vmatprep.subr.bf16.mxu1 %v4861_v2  ;;  %v6563_v2 = vld [vmem:[#allocation104_spill] sm:$0xff] }
 0x1b4   :  { %1554 = vmatpush2.bf16.msra.mxu0 %v6558_v6  ;;  %1595 = vmatpush2.bf16.msra.mxu1 %v4872_v35  ;;  %v6564_v35 = vld [vmem:[#allocation107_spill] sm:$0xff] }
 0x1b5   :  { %1555 = vmatprep.subr.bf16.mxu0 %v6559_v25  ;;  %1596 = vmatprep.subr.bf16.mxu1 %v4876_v42  ;;  %v6565_v42 = vld [vmem:[#allocation108_spill] sm:$0xff] }
 0x1b8   :  { %1556 = vmatpush2.bf16.msra.mxu0 %v6560_v45  ;;  %1597 = vmatpush2.bf16.msra.mxu1 %v4887_v61  ;;  %v6566_v61 = vld [vmem:[#allocation111_spill] sm:$0xff] }
 0x1b9   :  { %1557 = vmatprep.subr.bf16.mxu0 %v6561_v51  ;;  %1598 = vmatprep.subr.bf16.mxu1 %v4890_v3  ;;  %v6567_v3 = vld [vmem:[#allocation112_spill] sm:$0xff] }
 0x1bc   :  { %1558 = vmatpush2.bf16.msra.mxu0 %v6562_v62  ;;  %1599 = vmatpush2.bf16.msra.mxu1 %v4901_v12  ;;  %v6568_v12 = vld [vmem:[#allocation115_spill] sm:$0xff] }
 0x1bd   :  { %1559 = vmatprep.subr.bf16.mxu0 %v6563_v2  ;;  %1600 = vmatprep.subr.bf16.mxu1 %v4904_v22  ;;  %v6569_v22 = vld [vmem:[#allocation116_spill] sm:$0xff] }
 0x1c0   :  { %1560 = vmatpush2.bf16.msra.mxu0 %v6564_v35  ;;  %1601 = vmatpush2.bf16.msra.mxu1 %v4915_v10  ;;  %v6570_v10 = vld [vmem:[#allocation119_spill] sm:$0xff] }
 0x1c1   :  { %1561 = vmatprep.subr.bf16.mxu0 %v6565_v42  ;;  %1602 = vmatprep.subr.bf16.mxu1 %v4918_v56  ;;  %v6571_v56 = vld [vmem:[#allocation7_spill] sm:$0xff] }
 0x1c4   :  { %1562 = vmatpush2.bf16.msra.mxu0 %v6566_v61  ;;  %1603 = vmatpush2.bf16.msra.mxu1 %v4929_v7 }
 0x1c5   :  { %1563 = vmatprep.subr.bf16.mxu0 %v6567_v3  ;;  %1604 = vmatprep.subr.bf16.mxu1 %v4932_v33  ;;  %v6572_v33 = vld [vmem:[#allocation8_spill] sm:$0xff] }
 0x1c8   :  { %1564 = vmatpush2.bf16.msra.mxu0 %v6568_v12  ;;  %1605 = vmatpush2.bf16.msra.mxu1 %v4943_v8  ;;  %v6573_v8 = vld [vmem:[#allocation9_spill] sm:$0xff] }
 0x1c9   :  { %1565 = vmatprep.subr.bf16.mxu0 %v6569_v22  ;;  %1606 = vmatprep.subr.bf16.mxu1 %v4946_v15  ;;  %v6574_v15 = vld [vmem:[#allocation10_spill] sm:$0xff] }
 0x1cc   :  { %1566 = vmatpush2.bf16.msra.mxu0 %v6570_v10  ;;  %1607 = vmatpush2.bf16.msra.mxu1 %v4951_v39  ;;  %v6575_v39 = vld [vmem:[#allocation11_spill] sm:$0xff] }
 0x1cd   :  { %1715 = vmatprep.subr.bf16.mxu0 %v6571_v56  ;;  %1756 = vmatprep.subr.bf16.mxu1 %v4274_v14  ;;  %v6576_v14 = vld [vmem:[#allocation12_spill] sm:$0xff] }
 0x1cf   :  { %1568 = vmatmul.mubr.bf16.vlgmr.msra.gmra.mxu0 %v5039_v58  ;;  %1609 = vmatmul.mubr.bf16.vlgmr.msra.gmra.mxu1 %v5039_v58  ;;  %v6577_v58 = vld [vmem:[#allocation13_spill] sm:$0xff] }
 0x1d0   :  { %1716 = vmatpush1.bf16.msra.mxu0 %v6572_v33  ;;  %1757 = vmatpush1.bf16.msra.mxu1 %v4277_v16 }
 0x1d1   :  { %1717 = vmatprep.subr.bf16.mxu0 %v6573_v8  ;;  %1758 = vmatprep.subr.bf16.mxu1 %v4288_v23  ;;  %v6578_v23 = vld [vmem:[#allocation15_spill] sm:$0xff] }
 0x1d4   :  { %1718 = vmatpush1.bf16.msra.mxu0 %v6574_v15  ;;  %1759 = vmatpush1.bf16.msra.mxu1 %v4306_v30 }
 0x1d5   :  { %1719 = vmatprep.subr.bf16.mxu0 %v6575_v39  ;;  %1760 = vmatprep.subr.bf16.mxu1 %v4315_v20 }
 0x1d8   :  { %1720 = vmatpush1.bf16.msra.mxu0 %v6576_v14  ;;  %1761 = vmatpush1.bf16.msra.mxu1 %v4333_v40  ;;  %v1620_v14 = vld [vmem:[#allocation2 + $0x18] sm:$0xc] }
 0x1d9   :  { %1721 = vmatprep.subr.bf16.mxu0 %v6577_v58  ;;  %1762 = vmatprep.subr.bf16.mxu1 %v4343_v43  ;;  %v1628_v20 = vrot.slane %v1620_v14, 2 }
 0x1dc   :  { %1722 = vmatpush1.bf16.msra.mxu0 %v4147_v36  ;;  %1763 = vmatpush1.bf16.msra.mxu1 %v4358_v49 }
 0x1dd   :  { %1723 = vmatprep.subr.bf16.mxu0 %v6578_v23  ;;  %1764 = vmatprep.subr.bf16.mxu1 %v4367_v53 }
 0x1e0   :  { %1724 = vmatpush1.bf16.msra.mxu0 %v4174_v44  ;;  %1765 = vmatpush1.bf16.msra.mxu1 %v4382_v59  ;;  %v6579_v59 = vld [vmem:[#allocation22_spill] sm:$0xff] }
 0x1e1   :  { %1725 = vmatprep.subr.bf16.mxu0 %v4185_v47  ;;  %1766 = vmatprep.subr.bf16.mxu1 %v4391_v0  ;;  %v6580_v47 = vld [vmem:[#allocation53_spill] sm:$0xff] }
 0x1e2   :  { %v6581_v0 = vld [vmem:[#allocation25_spill] sm:$0xff] }
 0x1e4   :  { %1726 = vmatpush1.bf16.msra.mxu0 %v4201_v52  ;;  %1767 = vmatpush1.bf16.msra.mxu1 %v4406_v5  ;;  %v6582_v52 = vld [vmem:[#allocation54_spill] sm:$0xff]  ;;  %v6583_v5 = vld [vmem:[#allocation27_spill] sm:$0xff] }
 0x1e5   :  { %1727 = vmatprep.subr.bf16.mxu0 %v4212_v55  ;;  %1768 = vmatprep.subr.bf16.mxu1 %v4415_v13  ;;  %v6584_v55 = vld [vmem:[#allocation57_spill] sm:$0xff]  ;;  %v6585_v13 = vld [vmem:[#allocation28_spill] sm:$0xff] }
 0x1e8   :  { %1728 = vmatpush1.bf16.msra.mxu0 %v4228_v60  ;;  %1769 = vmatpush1.bf16.msra.mxu1 %v4430_v32  ;;  %v6586_v60 = vld [vmem:[#allocation58_spill] sm:$0xff]  ;;  %v6587_v32 = vld [vmem:[#allocation31_spill] sm:$0xff] }
 0x1e9   :  { %1729 = vmatprep.subr.bf16.mxu0 %v4239_v63  ;;  %1770 = vmatprep.subr.bf16.mxu1 %v4439_v37  ;;  %v6588_v63 = vld [vmem:[#allocation61_spill] sm:$0xff]  ;;  %v6589_v37 = vld [vmem:[#allocation32_spill] sm:$0xff] }
 0x1ec   :  { %1730 = vmatpush1.bf16.msra.mxu0 %v6579_v59  ;;  %1771 = vmatpush1.bf16.msra.mxu1 %v6580_v47  ;;  %v6590_v59 = vld [vmem:[#allocation62_spill] sm:$0xff]  ;;  %v6591_v47 = vld [vmem:[#allocation35_spill] sm:$0xff] }
 0x1ed   :  { %1731 = vmatprep.subr.bf16.mxu0 %v6581_v0  ;;  %1772 = vmatprep.subr.bf16.mxu1 %v6582_v52  ;;  %v6592_v0 = vld [vmem:[#allocation65_spill] sm:$0xff]  ;;  %v6593_v52 = vld [vmem:[#allocation36_spill] sm:$0xff] }
 0x1f0   :  { %1732 = vmatpush2.bf16.msra.mxu0 %v6583_v5  ;;  %1773 = vmatpush2.bf16.msra.mxu1 %v6584_v55  ;;  %v6594_v5 = vld [vmem:[#allocation66_spill] sm:$0xff]  ;;  %v6595_v55 = vld [vmem:[#allocation39_spill] sm:$0xff] }
 0x1f1   :  { %1733 = vmatprep.subr.bf16.mxu0 %v6585_v13  ;;  %1774 = vmatprep.subr.bf16.mxu1 %v6586_v60  ;;  %v6596_v13 = vld [vmem:[#allocation69_spill] sm:$0xff]  ;;  %v6597_v60 = vld [vmem:[#allocation40_spill] sm:$0xff] }
 0x1f4   :  { %1734 = vmatpush2.bf16.msra.mxu0 %v6587_v32  ;;  %1775 = vmatpush2.bf16.msra.mxu1 %v6588_v63  ;;  %v6598_v32 = vld [vmem:[#allocation70_spill] sm:$0xff]  ;;  %v6599_v63 = vld [vmem:[#allocation43_spill] sm:$0xff] }
 0x1f5   :  { %1735 = vmatprep.subr.bf16.mxu0 %v6589_v37  ;;  %1776 = vmatprep.subr.bf16.mxu1 %v6590_v59  ;;  %v6600_v37 = vld [vmem:[#allocation73_spill] sm:$0xff]  ;;  %v6601_v59 = vld [vmem:[#allocation44_spill] sm:$0xff] }
 0x1f8   :  { %1736 = vmatpush2.bf16.msra.mxu0 %v6591_v47  ;;  %1777 = vmatpush2.bf16.msra.mxu1 %v6592_v0  ;;  %v6602_v47 = vld [vmem:[#allocation74_spill] sm:$0xff]  ;;  %v6603_v0 = vld [vmem:[#allocation47_spill] sm:$0xff] }
 0x1f9   :  { %1737 = vmatprep.subr.bf16.mxu0 %v6593_v52  ;;  %1778 = vmatprep.subr.bf16.mxu1 %v6594_v5  ;;  %v6604_v52 = vld [vmem:[#allocation77_spill] sm:$0xff]  ;;  %v6605_v5 = vld [vmem:[#allocation48_spill] sm:$0xff] }
 0x1fc   :  { %1738 = vmatpush2.bf16.msra.mxu0 %v6595_v55  ;;  %1779 = vmatpush2.bf16.msra.mxu1 %v6596_v13  ;;  %v6606_v55 = vld [vmem:[#allocation78_spill] sm:$0xff]  ;;  %v6607_v13 = vld [vmem:[#allocation51_spill] sm:$0xff] }
 0x1fd   :  { %1739 = vmatprep.subr.bf16.mxu0 %v6597_v60  ;;  %1780 = vmatprep.subr.bf16.mxu1 %v6598_v32  ;;  %v6608_v60 = vld [vmem:[#allocation81_spill] sm:$0xff]  ;;  %v6609_v32 = vld [vmem:[#allocation52_spill] sm:$0xff] }
 0x200   :  { %1740 = vmatpush2.bf16.msra.mxu0 %v6599_v63  ;;  %1781 = vmatpush2.bf16.msra.mxu1 %v6600_v37  ;;  %v6610_v63 = vld [vmem:[#allocation82_spill] sm:$0xff]  ;;  %v6611_v37 = vld [vmem:[#allocation55_spill] sm:$0xff] }
 0x201   :  { %1741 = vmatprep.subr.bf16.mxu0 %v6601_v59  ;;  %1782 = vmatprep.subr.bf16.mxu1 %v6602_v47  ;;  %v6612_v59 = vld [vmem:[#allocation85_spill] sm:$0xff]  ;;  %v6613_v47 = vld [vmem:[#allocation56_spill] sm:$0xff] }
 0x204   :  { %1742 = vmatpush2.bf16.msra.mxu0 %v6603_v0  ;;  %1783 = vmatpush2.bf16.msra.mxu1 %v6604_v52  ;;  %v6614_v0 = vld [vmem:[#allocation86_spill] sm:$0xff]  ;;  %v1617_v52 = vld [vmem:[#allocation2 + $0x30] sm:$0xc] }
 0x205   :  { %1743 = vmatprep.subr.bf16.mxu0 %v6605_v5  ;;  %1784 = vmatprep.subr.bf16.mxu1 %v6606_v55  ;;  %v1618_v5 = vld [vmem:[#allocation2] sm:$0xc]  ;;  %v1625_v44 = vrot.slane %v1617_v52, 2 }
 0x206   :  { %v1626_v23 = vrot.slane %v1618_v5, 2 }
 0x208   :  { %1744 = vmatpush2.bf16.msra.mxu0 %v6607_v13  ;;  %1785 = vmatpush2.bf16.msra.mxu1 %v6608_v60 }
 0x209   :  { %1745 = vmatprep.subr.bf16.mxu0 %v6609_v32  ;;  %1786 = vmatprep.subr.bf16.mxu1 %v6610_v63 }
 0x20c   :  { %1746 = vmatpush2.bf16.msra.mxu0 %v6611_v37  ;;  %1787 = vmatpush2.bf16.msra.mxu1 %v6612_v59 }
 0x20d   :  { %1797 = vmatprep.subr.bf16.mxu0 %v6613_v47  ;;  %1838 = vmatprep.subr.bf16.mxu1 %v6614_v0  ;;  %v1619_v47 = vld [vmem:[#allocation2 + $0x58] sm:$0xc] }
 0x20e   :  { %v1627_v0 = vrot.slane %v1619_v47, 2 }
 0x24f   :  { %v1487_v55 = vpop.f32.mrf.mxu0  ;;  %v1528_v53 = vpop.f32.mrf.mxu1 }
 0x250   :  { %v1633_v13 = vadd.f32 %v1625_v44, %v1487_v55  ;;  %v1635_v40 = vadd.f32 %v1627_v0, %v1528_v53 }
 0x251   :  { %v1489_v60 = vpop.f32.mrf.mxu0  ;;  %v1530_v49 = vpop.f32.mrf.mxu1 }
 0x252   :  { %v3608_v32 = vmul.f32 -1.442695, %v1633_v13  ;;  %v1634_v36 = vadd.f32 %v1626_v23, %v1489_v60  ;;  %v3610_v52 = vmul.f32 -1.442695, %v1635_v40  ;;  %v1636_v44 = vadd.f32 %v1628_v20, %v1530_v49  ;;  %v6615_v13 = vld [vmem:[#allocation135_spill] sm:$0xff] }
 0x253   :  { %v1491_v63 = vpop.f32.mrf.mxu0  ;;  %v1532_v43 = vpop.f32.mrf.mxu1  ;;  %v1637_v49 = vld [vmem:[#allocation2 + $0x60] sm:$0x30] }
 0x254   :  { %3734 = vpow2.f32 %v3608_v32  ;;  %v3609_v37 = vmul.f32 -1.442695, %v1634_v36  ;;  %v1638_v32 = vld [vmem:[#allocation2 + $0x70] sm:$0x30] }
 0x255   :  { %v1492_v59 = vpop.f32.mrf.mxu0  ;;  %v1533_v58 = vpop.f32.mrf.mxu1 }
 0x256   :  { %3736 = vpow2.f32 %v3609_v37  ;;  %v1645_v37 = vrot.slane %v1637_v49, 4 }
 0x257   :  { %3738 = vpow2.f32 %v3610_v52 }
 0x261   :  { %v3735_v39 = vpop.eup %3734 }
 0x262   :  { %v1666_v55 = vadd.f32 1.0, %v3735_v39 }
 0x263   :  { %v3737_v5 = vpop.eup %3736 }
 0x264   :  { %3740 = vrcp.f32 %v1666_v55  ;;  %v1667_v60 = vadd.f32 1.0, %v3737_v5  ;;  %v3739_v63 = vpop.eup %3738  ;;  %v1646_v55 = vrot.slane %v1638_v32, 4 }
 0x265   :  { %3742 = vtanh.f32 %v1636_v44  ;;  %v1668_v59 = vadd.f32 1.0, %v3739_v63 }
 0x266   :  { %3744 = vrcp.f32 %v1667_v60 }
 0x267   :  { %3746 = vrcp.f32 %v1668_v59 }
 0x271   :  { %v3741_v36 = vpop.eup %3740 }
 0x272   :  { %v3743_v23 = vpop.eup %3742 }
 0x273   :  { %v3745_v43 = vpop.eup %3744  ;;  %v1677_v53 = vmul.f32 %v3743_v23, %v3741_v36 }
 0x274   :  { %v1676_v47 = vmul.f32 %v3745_v43, %v6615_v13  ;;  %v3747_v39 = vpop.eup %3746 }
 0x276   :  { %v5174_v0 = vadd.f32 %v1677_v53, %v1676_v47  ;;  %v1639_v53 = vld [vmem:[#allocation2 + $0x78] sm:$0x30] }
 0x278   :  { %6616 = vst [vmem:[#allocation59_spill] sm:$0xff] %v5174_v0  ;;  %3748 = vtanh.f32 %v5174_v0 }
 0x285   :  { %v3749_v14 = vpop.eup %3748 }
 0x286   :  { %v1680_v20 = vmul.f32 %v3749_v14, %v3747_v39  ;;  %v1647_v39 = vrot.slane %v1639_v53, 4 }
 0x288   :  { %v1706_v40 = vrot.slane %v1680_v20, 6  ;;  %v5181_v53 = vpack.c.bf16 %v1680_v20, %v1680_v20  ;;  %v6618_v20 = vld [vmem:[#allocation98_spill] sm:$0xff] }
 0x28a   :  { %1708 = vst [vmem:[#allocation3 + $0x18] sm:$0xc] %v1706_v40  ;;  %v1640_v40 = vld [vmem:[#allocation2 + $0x28] sm:$0x30] }
 0x28b   :  { %v1648_v0 = vrot.slane %v1640_v40, 4  ;;  %v6621_v40 = vld [vmem:[#allocation102_spill] sm:$0xff] }
 0x28f   :  { %v1569_v58 = vpop.f32.mrf.mxu0  ;;  %v1610_v52 = vpop.f32.mrf.mxu1 }
 0x290   :  { %v1653_v44 = vadd.f32 %v1645_v37, %v1569_v58  ;;  %v1655_v14 = vadd.f32 %v1647_v39, %v1610_v52  ;;  %v6619_v39 = vld [vmem:[#allocation71_spill] sm:$0xff] }
 0x291   :  { %v1571_v5 = vpop.f32.mrf.mxu0  ;;  %v1612_v60 = vpop.f32.mrf.mxu1 }
 0x292   :  { %v3611_v63 = vmul.f32 -1.442695, %v1653_v44  ;;  %v1654_v36 = vadd.f32 %v1646_v55, %v1571_v5  ;;  %v3613_v49 = vmul.f32 -1.442695, %v1655_v14  ;;  %v1656_v37 = vadd.f32 %v1648_v0, %v1612_v60  ;;  %v6620_v14 = vld [vmem:[#allocation101_spill] sm:$0xff] }
 0x293   :  { %v1573_v23 = vpop.f32.mrf.mxu0  ;;  %v1614_v43 = vpop.f32.mrf.mxu1 }
 0x294   :  { %3750 = vpow2.f32 %v3611_v63  ;;  %v3612_v59 = vmul.f32 -1.442695, %v1654_v36 }
 0x295   :  { %v1574_v13 = vpop.f32.mrf.mxu0  ;;  %v1615_v47 = vpop.f32.mrf.mxu1 }
 0x296   :  { %3752 = vpow2.f32 %v3612_v59 }
 0x297   :  { %3754 = vpow2.f32 %v3613_v49  ;;  %v6622_v49 = vld [vmem:[#allocation105_spill] sm:$0xff] }
 0x2a1   :  { %v3751_v30 = vpop.eup %3750 }
 0x2a2   :  { %v1690_v32 = vadd.f32 1.0, %v3751_v30 }
 0x2a3   :  { %v3753_v58 = vpop.eup %3752 }
 0x2a4   :  { %3756 = vrcp.f32 %v1690_v32  ;;  %v1691_v44 = vadd.f32 1.0, %v3753_v58  ;;  %v3755_v55 = vpop.eup %3754  ;;  %v6624_v32 = vld [vmem:[#allocation109_spill] sm:$0xff]  ;;  %v6625_v58 = vld [vmem:[#allocation110_spill] sm:$0xff] }
 0x2a5   :  { %3758 = vtanh.f32 %v1656_v37  ;;  %v1692_v23 = vadd.f32 1.0, %v3755_v55  ;;  %v6623_v37 = vld [vmem:[#allocation106_spill] sm:$0xff] }
 0x2a6   :  { %3760 = vrcp.f32 %v1691_v44  ;;  %v6626_v44 = vld [vmem:[#allocation113_spill] sm:$0xff]  ;;  %v6627_v55 = vld [vmem:[#allocation114_spill] sm:$0xff] }
 0x2a7   :  { %3762 = vrcp.f32 %v1692_v23  ;;  %v6631_v23 = vld [vmem:[#allocation121_spill] sm:$0xff] }
 0x2b1   :  { %v3757_v5 = vpop.eup %3756 }
 0x2b2   :  { %v3759_v63 = vpop.eup %3758 }
 0x2b3   :  { %v3761_v36 = vpop.eup %3760  ;;  %v1701_v52 = vmul.f32 %v3759_v63, %v3757_v5  ;;  %v6628_v5 = vld [vmem:[#allocation117_spill] sm:$0xff]  ;;  %v6629_v63 = vld [vmem:[#allocation118_spill] sm:$0xff] }
 0x2b4   :  { %v1700_v43 = vmul.f32 %v3761_v36, %v5036_v26  ;;  %v3763_v30 = vpop.eup %3762  ;;  %v6617_v26 = vld [vmem:[#allocation68_spill] sm:$0xff] }
 0x2b5   :  { %v6630_v36 = vld [vmem:[#allocation120_spill] sm:$0xff] }
 0x2b6   :  { %v5178_v59 = vadd.f32 %v1701_v52, %v1700_v43  ;;  %v6632_v43 = vld [vmem:[#allocation122_spill] sm:$0xff]  ;;  %v6633_v52 = vld [vmem:[#allocation123_spill] sm:$0xff] }
 0x2b8   :  { %3764 = vtanh.f32 %v5178_v59 }
 0x2c5   :  { %v3765_v0 = vpop.eup %3764 }
 0x2c6   :  { %v1704_v60 = vmul.f32 %v3765_v0, %v3763_v30  ;;  %v6634_v30 = vld [vmem:[#allocation124_spill] sm:$0xff]  ;;  %v6635_v0 = vld [vmem:[#allocation125_spill] sm:$0xff] }
 0x2c8   :  { %v1710_v13 = vrot.slane %v1704_v60, 4  ;;  %v1714_v47 = vpack.c.bf16 %v1704_v60, %v1704_v60  ;;  %v6636_v60 = vld [vmem:[#allocation126_spill] sm:$0xff] }
 0x2ca   :  { %1712 = vst [vmem:[#allocation3] sm:$0x30] %v1710_v13  ;;  %1747 = vmatprep.mubr.bf16.mxu0 %v1714_v47  ;;  %1788 = vmatprep.mubr.bf16.mxu1 %v1714_v47  ;;  %v6637_v13 = vld [vmem:[#allocation127_spill] sm:$0xff] }
 0x2cb   :  { %1748 = vmatmul.mubr.bf16.vlgmr.msra.gmra.mxu0 %v5181_v53  ;;  %1789 = vmatmul.mubr.bf16.vlgmr.msra.gmra.mxu1 %v5181_v53 }
 0x2cc   :  { %1798 = vmatpush1.bf16.msra.mxu0 %v6528_v27  ;;  %1839 = vmatpush1.bf16.msra.mxu1 %v6529_v21 }
 0x2cd   :  { %1829 = vmatprep.mubr.bf16.mxu0 %v1714_v47  ;;  %1870 = vmatprep.mubr.bf16.mxu1 %v1714_v47  ;;  %v6638_v47 = vld [vmem:[#allocation128_spill] sm:$0xff] }
 0x2ce   :  { %1799 = vmatprep.subr.bf16.mxu0 %v6530_v29  ;;  %1840 = vmatprep.subr.bf16.mxu1 %v6531_v38 }
 0x2d0   :  { %1800 = vmatpush1.bf16.msra.mxu0 %v6532_v48  ;;  %1841 = vmatpush1.bf16.msra.mxu1 %v6533_v4 }
 0x2d1   :  { %1801 = vmatprep.subr.bf16.mxu0 %v6534_v28  ;;  %1842 = vmatprep.subr.bf16.mxu1 %v6535_v1 }
 0x2d4   :  { %1802 = vmatpush1.bf16.msra.mxu0 %v6536_v57  ;;  %1843 = vmatpush1.bf16.msra.mxu1 %v6537_v19 }
 0x2d5   :  { %1803 = vmatprep.subr.bf16.mxu0 %v6617_v26  ;;  %1844 = vmatprep.subr.bf16.mxu1 %v6618_v20 }
 0x2d8   :  { %1804 = vmatpush1.bf16.msra.mxu0 %v6619_v39  ;;  %1845 = vmatpush1.bf16.msra.mxu1 %v6620_v14 }
 0x2d9   :  { %1805 = vmatprep.subr.bf16.mxu0 %v6542_v34  ;;  %1846 = vmatprep.subr.bf16.mxu1 %v6621_v40 }
 0x2dc   :  { %1806 = vmatpush1.bf16.msra.mxu0 %v6544_v9  ;;  %1847 = vmatpush1.bf16.msra.mxu1 %v6622_v49 }
 0x2dd   :  { %1807 = vmatprep.subr.bf16.mxu0 %v6546_v54  ;;  %1848 = vmatprep.subr.bf16.mxu1 %v6623_v37 }
 0x2e0   :  { %1808 = vmatpush1.bf16.msra.mxu0 %v6548_v17  ;;  %1849 = vmatpush1.bf16.msra.mxu1 %v6624_v32 }
 0x2e1   :  { %1809 = vmatprep.subr.bf16.mxu0 %v6550_v11  ;;  %1850 = vmatprep.subr.bf16.mxu1 %v6625_v58 }
 0x2e4   :  { %1810 = vmatpush1.bf16.msra.mxu0 %v6552_v41  ;;  %1851 = vmatpush1.bf16.msra.mxu1 %v6626_v44 }
 0x2e5   :  { %1811 = vmatprep.subr.bf16.mxu0 %v6553_v24  ;;  %1852 = vmatprep.subr.bf16.mxu1 %v6627_v55 }
 0x2e8   :  { %1812 = vmatpush1.bf16.msra.mxu0 %v6554_v18  ;;  %1853 = vmatpush1.bf16.msra.mxu1 %v6628_v5 }
 0x2e9   :  { %1813 = vmatprep.subr.bf16.mxu0 %v6555_v50  ;;  %1854 = vmatprep.subr.bf16.mxu1 %v6629_v63 }
 0x2ec   :  { %1814 = vmatpush2.bf16.msra.mxu0 %v6556_v46  ;;  %1855 = vmatpush2.bf16.msra.mxu1 %v6630_v36 }
 0x2ed   :  { %1815 = vmatprep.subr.bf16.mxu0 %v6557_v31  ;;  %1856 = vmatprep.subr.bf16.mxu1 %v6631_v23 }
 0x2f0   :  { %1816 = vmatpush2.bf16.msra.mxu0 %v6558_v6  ;;  %1857 = vmatpush2.bf16.msra.mxu1 %v6632_v43 }
 0x2f1   :  { %1817 = vmatprep.subr.bf16.mxu0 %v6559_v25  ;;  %1858 = vmatprep.subr.bf16.mxu1 %v6633_v52 }
 0x2f4   :  { %1818 = vmatpush2.bf16.msra.mxu0 %v6560_v45  ;;  %1859 = vmatpush2.bf16.msra.mxu1 %v6634_v30  ;;  %v6639_v45 = vld [vmem:[#allocation129_spill] sm:$0xff] }
 0x2f5   :  { %1819 = vmatprep.subr.bf16.mxu0 %v6561_v51  ;;  %1860 = vmatprep.subr.bf16.mxu1 %v6635_v0 }
 0x2f8   :  { %1820 = vmatpush2.bf16.msra.mxu0 %v6562_v62  ;;  %1861 = vmatpush2.bf16.msra.mxu1 %v6636_v60  ;;  %v6640_v62 = vld [vmem:[#allocation131_spill] sm:$0xff]  ;;  %v1882_v60 = vld [vmem:[#allocation2 + $0x18] sm:$0x30] }
 0x2f9   :  { %1821 = vmatprep.subr.bf16.mxu0 %v6563_v2  ;;  %1862 = vmatprep.subr.bf16.mxu1 %v6637_v13  ;;  %v6641_v2 = vld [vmem:[#allocation132_spill] sm:$0xff]  ;;  %v1890_v0 = vrot.slane %v1882_v60, 4  ;;  %v1900_v60 = vld [vmem:[#allocation2 + $0x70] sm:$0xc] }
 0x2fc   :  { %1822 = vmatpush2.bf16.msra.mxu0 %v6564_v35  ;;  %1863 = vmatpush2.bf16.msra.mxu1 %v6638_v47  ;;  %v6642_v35 = vld [vmem:[#allocation133_spill] sm:$0xff] }
 0x2fd   :  { %1823 = vmatprep.subr.bf16.mxu0 %v6565_v42  ;;  %1864 = vmatprep.subr.bf16.mxu1 %v6639_v45  ;;  %v6643_v42 = vld [vmem:[#allocation134_spill] sm:$0xff] }
 0x300   :  { %1824 = vmatpush2.bf16.msra.mxu0 %v6566_v61  ;;  %1865 = vmatpush2.bf16.msra.mxu1 %v4929_v7  ;;  %v6644_v61 = vld [vmem:[#allocation23_spill] sm:$0xff] }
 0x301   :  { %1825 = vmatprep.subr.bf16.mxu0 %v6567_v3  ;;  %1866 = vmatprep.subr.bf16.mxu1 %v6640_v62 }
 0x304   :  { %1826 = vmatpush2.bf16.msra.mxu0 %v6568_v12  ;;  %1867 = vmatpush2.bf16.msra.mxu1 %v6641_v2 }
 0x305   :  { %1827 = vmatprep.subr.bf16.mxu0 %v6569_v22  ;;  %1868 = vmatprep.subr.bf16.mxu1 %v6642_v35  ;;  %v6645_v22 = vld [vmem:[#allocation26_spill] sm:$0xff]  ;;  %v6650_v35 = vld [vmem:[#allocation33_spill] sm:$0xff] }
 0x308   :  { %1828 = vmatpush2.bf16.msra.mxu0 %v6570_v10  ;;  %1869 = vmatpush2.bf16.msra.mxu1 %v6643_v42  ;;  %v6646_v10 = vld [vmem:[#allocation29_spill] sm:$0xff]  ;;  %v6647_v42 = vld [vmem:[#allocation11_spill] sm:$0xff] }
 0x309   :  { %1977 = vmatprep.subr.bf16.mxu0 %v6571_v56  ;;  %2018 = vmatprep.subr.bf16.mxu1 %v6644_v61  ;;  %v6648_v56 = vld [vmem:[#allocation30_spill] sm:$0xff]  ;;  %v6649_v61 = vld [vmem:[#allocation12_spill] sm:$0xff] }
 0x30b   :  { %1830 = vmatmul.mubr.bf16.vlgmr.msra.gmra.mxu0 %v5181_v53  ;;  %1871 = vmatmul.mubr.bf16.vlgmr.msra.gmra.mxu1 %v5181_v53  ;;  %v6651_v53 = vld [vmem:[#allocation13_spill] sm:$0xff] }
 0x30c   :  { %1978 = vmatpush1.bf16.msra.mxu0 %v6572_v33  ;;  %2019 = vmatpush1.bf16.msra.mxu1 %v4277_v16  ;;  %v6652_v33 = vld [vmem:[#allocation34_spill] sm:$0xff] }
 0x30d   :  { %1979 = vmatprep.subr.bf16.mxu0 %v6573_v8  ;;  %2020 = vmatprep.subr.bf16.mxu1 %v6645_v22  ;;  %v6653_v16 = vld [vmem:[#allocation14_spill] sm:$0xff]  ;;  %v6654_v8 = vld [vmem:[#allocation37_spill] sm:$0xff]  ;;  %v6655_v22 = vld [vmem:[#allocation15_spill] sm:$0xff] }
 0x310   :  { %1980 = vmatpush1.bf16.msra.mxu0 %v6574_v15  ;;  %2021 = vmatpush1.bf16.msra.mxu1 %v6646_v10  ;;  %v6656_v15 = vld [vmem:[#allocation38_spill] sm:$0xff]  ;;  %v6657_v10 = vld [vmem:[#allocation16_spill] sm:$0xff] }
 0x311   :  { %1981 = vmatprep.subr.bf16.mxu0 %v6647_v42  ;;  %2022 = vmatprep.subr.bf16.mxu1 %v6648_v56  ;;  %v6658_v42 = vld [vmem:[#allocation41_spill] sm:$0xff] }
 0x312   :  { %v6659_v56 = vld [vmem:[#allocation17_spill] sm:$0xff] }
 0x314   :  { %1982 = vmatpush1.bf16.msra.mxu0 %v6649_v61  ;;  %2023 = vmatpush1.bf16.msra.mxu1 %v6650_v35  ;;  %v6660_v61 = vld [vmem:[#allocation42_spill] sm:$0xff] }
 0x315   :  { %1983 = vmatprep.subr.bf16.mxu0 %v6651_v53  ;;  %2024 = vmatprep.subr.bf16.mxu1 %v6652_v33  ;;  %v6661_v35 = vld [vmem:[#allocation18_spill] sm:$0xff]  ;;  %v6662_v53 = vld [vmem:[#allocation45_spill] sm:$0xff]  ;;  %v6663_v33 = vld [vmem:[#allocation19_spill] sm:$0xff] }
 0x318   :  { %1984 = vmatpush1.bf16.msra.mxu0 %v6653_v16  ;;  %2025 = vmatpush1.bf16.msra.mxu1 %v6654_v8  ;;  %v6664_v16 = vld [vmem:[#allocation46_spill] sm:$0xff]  ;;  %v6665_v8 = vld [vmem:[#allocation20_spill] sm:$0xff] }
 0x319   :  { %1985 = vmatprep.subr.bf16.mxu0 %v6655_v22  ;;  %2026 = vmatprep.subr.bf16.mxu1 %v6656_v15  ;;  %v6666_v22 = vld [vmem:[#allocation49_spill] sm:$0xff] }
 0x31a   :  { %v6667_v15 = vld [vmem:[#allocation21_spill] sm:$0xff] }
 0x31c   :  { %1986 = vmatpush1.bf16.msra.mxu0 %v6657_v10  ;;  %2027 = vmatpush1.bf16.msra.mxu1 %v6658_v42  ;;  %v6668_v10 = vld [vmem:[#allocation50_spill] sm:$0xff] }
 0x31d   :  { %1987 = vmatprep.subr.bf16.mxu0 %v6659_v56  ;;  %2028 = vmatprep.subr.bf16.mxu1 %v6660_v61  ;;  %v6669_v42 = vld [vmem:[#allocation22_spill] sm:$0xff]  ;;  %v6670_v56 = vld [vmem:[#allocation53_spill] sm:$0xff] }
 0x31e   :  { %v6671_v61 = vld [vmem:[#allocation25_spill] sm:$0xff] }
 0x320   :  { %1988 = vmatpush1.bf16.msra.mxu0 %v6661_v35  ;;  %2029 = vmatpush1.bf16.msra.mxu1 %v6662_v53  ;;  %v6672_v35 = vld [vmem:[#allocation54_spill] sm:$0xff]  ;;  %v6673_v53 = vld [vmem:[#allocation27_spill] sm:$0xff] }
 0x321   :  { %1989 = vmatprep.subr.bf16.mxu0 %v6663_v33  ;;  %2030 = vmatprep.subr.bf16.mxu1 %v6664_v16  ;;  %v6674_v33 = vld [vmem:[#allocation57_spill] sm:$0xff]  ;;  %v6675_v16 = vld [vmem:[#allocation28_spill] sm:$0xff] }
 0x324   :  { %1990 = vmatpush1.bf16.msra.mxu0 %v6665_v8  ;;  %2031 = vmatpush1.bf16.msra.mxu1 %v6666_v22  ;;  %v6676_v8 = vld [vmem:[#allocation58_spill] sm:$0xff]  ;;  %v6677_v22 = vld [vmem:[#allocation31_spill] sm:$0xff] }
 0x325   :  { %1991 = vmatprep.subr.bf16.mxu0 %v6667_v15  ;;  %2032 = vmatprep.subr.bf16.mxu1 %v6668_v10  ;;  %v6678_v15 = vld [vmem:[#allocation61_spill] sm:$0xff]  ;;  %v6679_v10 = vld [vmem:[#allocation32_spill] sm:$0xff] }
 0x328   :  { %1992 = vmatpush1.bf16.msra.mxu0 %v6669_v42  ;;  %2033 = vmatpush1.bf16.msra.mxu1 %v6670_v56  ;;  %v6680_v42 = vld [vmem:[#allocation62_spill] sm:$0xff]  ;;  %v6681_v56 = vld [vmem:[#allocation35_spill] sm:$0xff] }
 0x329   :  { %1993 = vmatprep.subr.bf16.mxu0 %v6671_v61  ;;  %2034 = vmatprep.subr.bf16.mxu1 %v6672_v35  ;;  %v6682_v61 = vld [vmem:[#allocation65_spill] sm:$0xff]  ;;  %v6683_v35 = vld [vmem:[#allocation36_spill] sm:$0xff] }
 0x32c   :  { %1994 = vmatpush2.bf16.msra.mxu0 %v6673_v53  ;;  %2035 = vmatpush2.bf16.msra.mxu1 %v6674_v33  ;;  %v6684_v53 = vld [vmem:[#allocation66_spill] sm:$0xff]  ;;  %v6685_v33 = vld [vmem:[#allocation39_spill] sm:$0xff] }
 0x32d   :  { %1995 = vmatprep.subr.bf16.mxu0 %v6675_v16  ;;  %2036 = vmatprep.subr.bf16.mxu1 %v6676_v8  ;;  %v6686_v16 = vld [vmem:[#allocation69_spill] sm:$0xff]  ;;  %v6687_v8 = vld [vmem:[#allocation40_spill] sm:$0xff] }
 0x330   :  { %1996 = vmatpush2.bf16.msra.mxu0 %v6677_v22  ;;  %2037 = vmatpush2.bf16.msra.mxu1 %v6678_v15  ;;  %v6688_v22 = vld [vmem:[#allocation70_spill] sm:$0xff]  ;;  %v6689_v15 = vld [vmem:[#allocation43_spill] sm:$0xff] }
 0x331   :  { %1997 = vmatprep.subr.bf16.mxu0 %v6679_v10  ;;  %2038 = vmatprep.subr.bf16.mxu1 %v6680_v42  ;;  %v6690_v10 = vld [vmem:[#allocation73_spill] sm:$0xff]  ;;  %v6691_v42 = vld [vmem:[#allocation44_spill] sm:$0xff] }
 0x334   :  { %1998 = vmatpush2.bf16.msra.mxu0 %v6681_v56  ;;  %2039 = vmatpush2.bf16.msra.mxu1 %v6682_v61  ;;  %v6692_v56 = vld [vmem:[#allocation74_spill] sm:$0xff]  ;;  %v6693_v61 = vld [vmem:[#allocation47_spill] sm:$0xff] }
 0x335   :  { %1999 = vmatprep.subr.bf16.mxu0 %v6683_v35  ;;  %2040 = vmatprep.subr.bf16.mxu1 %v6684_v53  ;;  %v6694_v35 = vld [vmem:[#allocation77_spill] sm:$0xff]  ;;  %v6695_v53 = vld [vmem:[#allocation48_spill] sm:$0xff] }
 0x338   :  { %2000 = vmatpush2.bf16.msra.mxu0 %v6685_v33  ;;  %2041 = vmatpush2.bf16.msra.mxu1 %v6686_v16  ;;  %v6696_v33 = vld [vmem:[#allocation78_spill] sm:$0xff]  ;;  %v6697_v16 = vld [vmem:[#allocation51_spill] sm:$0xff] }
 0x339   :  { %2001 = vmatprep.subr.bf16.mxu0 %v6687_v8  ;;  %2042 = vmatprep.subr.bf16.mxu1 %v6688_v22  ;;  %v6698_v8 = vld [vmem:[#allocation81_spill] sm:$0xff]  ;;  %v6699_v22 = vld [vmem:[#allocation52_spill] sm:$0xff] }
 0x33c   :  { %2002 = vmatpush2.bf16.msra.mxu0 %v6689_v15  ;;  %2043 = vmatpush2.bf16.msra.mxu1 %v6690_v10  ;;  %v6700_v15 = vld [vmem:[#allocation82_spill] sm:$0xff]  ;;  %v6701_v10 = vld [vmem:[#allocation55_spill] sm:$0xff] }
 0x33d   :  { %2003 = vmatprep.subr.bf16.mxu0 %v6691_v42  ;;  %2044 = vmatprep.subr.bf16.mxu1 %v6692_v56  ;;  %v6702_v42 = vld [vmem:[#allocation85_spill] sm:$0xff]  ;;  %v6703_v56 = vld [vmem:[#allocation56_spill] sm:$0xff] }
 0x340   :  { %2004 = vmatpush2.bf16.msra.mxu0 %v6693_v61  ;;  %2045 = vmatpush2.bf16.msra.mxu1 %v6694_v35  ;;  %v6704_v61 = vld [vmem:[#allocation86_spill] sm:$0xff]  ;;  %v1879_v35 = vld [vmem:[#allocation2 + $0x30] sm:$0x30] }
 0x341   :  { %2005 = vmatprep.subr.bf16.mxu0 %v6695_v53  ;;  %2046 = vmatprep.subr.bf16.mxu1 %v6696_v33  ;;  %v1880_v53 = vld [vmem:[#allocation2] sm:$0x30]  ;;  %v1887_v2 = vrot.slane %v1879_v35, 4 }
 0x342   :  { %v1888_v62 = vrot.slane %v1880_v53, 4 }
 0x344   :  { %2006 = vmatpush2.bf16.msra.mxu0 %v6697_v16  ;;  %2047 = vmatpush2.bf16.msra.mxu1 %v6698_v8 }
 0x345   :  { %2007 = vmatprep.subr.bf16.mxu0 %v6699_v22  ;;  %2048 = vmatprep.subr.bf16.mxu1 %v6700_v15 }
 0x348   :  { %2008 = vmatpush2.bf16.msra.mxu0 %v6701_v10  ;;  %2049 = vmatpush2.bf16.msra.mxu1 %v6702_v42 }
 0x349   :  { %2059 = vmatprep.subr.bf16.mxu0 %v6703_v56  ;;  %2100 = vmatprep.subr.bf16.mxu1 %v6704_v61  ;;  %v1881_v56 = vld [vmem:[#allocation2 + $0x58] sm:$0x30] }
 0x34a   :  { %v1889_v61 = vrot.slane %v1881_v56, 4 }
 0x38b   :  { %v1749_v33 = vpop.f32.mrf.mxu0  ;;  %v1790_v12 = vpop.f32.mrf.mxu1 }
 0x38c   :  { %v1895_v16 = vadd.f32 %v1887_v2, %v1749_v33  ;;  %v1897_v13 = vadd.f32 %v1889_v61, %v1790_v12 }
 0x38d   :  { %v1751_v8 = vpop.f32.mrf.mxu0  ;;  %v1792_v3 = vpop.f32.mrf.mxu1 }
 0x38e   :  { %v3614_v22 = vmul.f32 -1.442695, %v1895_v16  ;;  %v1896_v7 = vadd.f32 %v1888_v62, %v1751_v8  ;;  %v3616_v35 = vmul.f32 -1.442695, %v1897_v13  ;;  %v1898_v2 = vadd.f32 %v1890_v0, %v1792_v3  ;;  %v1899_v0 = vld [vmem:[#allocation2 + $0x60] sm:$0xc] }
 0x38f   :  { %v1753_v15 = vpop.f32.mrf.mxu0  ;;  %v1794_v45 = vpop.f32.mrf.mxu1  ;;  %v1907_v13 = vrot.slane %v1899_v0, 2 }
 0x390   :  { %3766 = vpow2.f32 %v3614_v22  ;;  %v3615_v10 = vmul.f32 -1.442695, %v1896_v7 }
 0x391   :  { %v1754_v42 = vpop.f32.mrf.mxu0  ;;  %v1795_v47 = vpop.f32.mrf.mxu1 }
 0x392   :  { %3768 = vpow2.f32 %v3615_v10  ;;  %v6705_v10 = vld [vmem:[#allocation59_spill] sm:$0xff] }
 0x393   :  { %3770 = vpow2.f32 %v3616_v35 }
 0x39d   :  { %v3767_v51 = vpop.eup %3766 }
 0x39e   :  { %v1928_v33 = vadd.f32 1.0, %v3767_v51 }
 0x39f   :  { %v3769_v53 = vpop.eup %3768 }
 0x3a0   :  { %3772 = vrcp.f32 %v1928_v33  ;;  %v1929_v16 = vadd.f32 1.0, %v3769_v53  ;;  %v3771_v45 = vpop.eup %3770  ;;  %v1908_v33 = vrot.slane %v1900_v60, 2 }
 0x3a1   :  { %3774 = vtanh.f32 %v1898_v2  ;;  %v1930_v7 = vadd.f32 1.0, %v3771_v45 }
 0x3a2   :  { %3776 = vrcp.f32 %v1929_v16 }
 0x3a3   :  { %3778 = vrcp.f32 %v1930_v7 }
 0x3ad   :  { %v3773_v62 = vpop.eup %3772 }
 0x3ae   :  { %v3775_v42 = vpop.eup %3774 }
 0x3af   :  { %v3777_v22 = vpop.eup %3776  ;;  %v1939_v61 = vmul.f32 %v3775_v42, %v3773_v62 }
 0x3b0   :  { %v1938_v56 = vmul.f32 %v3777_v22, %v6705_v10  ;;  %v3779_v51 = vpop.eup %3778 }
 0x3b2   :  { %v5316_v12 = vadd.f32 %v1939_v61, %v1938_v56  ;;  %v1901_v61 = vld [vmem:[#allocation2 + $0x78] sm:$0xc] }
 0x3b4   :  { %6706 = vst [vmem:[#allocation89_spill] sm:$0xff] %v5316_v12  ;;  %3780 = vtanh.f32 %v5316_v12 }
 0x3c1   :  { %v3781_v3 = vpop.eup %3780 }
 0x3c2   :  { %v1942_v8 = vmul.f32 %v3781_v3, %v3779_v51  ;;  %v1909_v51 = vrot.slane %v1901_v61, 2 }
 0x3c4   :  { %v1968_v15 = vrot.slane %v1942_v8, 4  ;;  %v5323_v61 = vpack.c.bf16 %v1942_v8, %v1942_v8  ;;  %v6708_v8 = vld [vmem:[#allocation124_spill] sm:$0xff] }
 0x3c6   :  { %1970 = vst [vmem:[#allocation3 + $0x18] sm:$0x30] %v1968_v15  ;;  %v1902_v15 = vld [vmem:[#allocation2 + $0x28] sm:$0xc] }
 0x3c7   :  { %v1910_v12 = vrot.slane %v1902_v15, 2  ;;  %v6711_v15 = vld [vmem:[#allocation103_spill] sm:$0xff] }
 0x3cb   :  { %v1831_v47 = vpop.f32.mrf.mxu0  ;;  %v1872_v35 = vpop.f32.mrf.mxu1 }
 0x3cc   :  { %v1915_v2 = vadd.f32 %v1907_v13, %v1831_v47  ;;  %v1917_v3 = vadd.f32 %v1909_v51, %v1872_v35  ;;  %v6709_v51 = vld [vmem:[#allocation100_spill] sm:$0xff] }
 0x3cd   :  { %v1833_v53 = vpop.f32.mrf.mxu0  ;;  %v1874_v16 = vpop.f32.mrf.mxu1 }
 0x3ce   :  { %v3617_v45 = vmul.f32 -1.442695, %v1915_v2  ;;  %v1916_v62 = vadd.f32 %v1908_v33, %v1833_v53  ;;  %v3619_v0 = vmul.f32 -1.442695, %v1917_v3  ;;  %v1918_v13 = vadd.f32 %v1910_v12, %v1874_v16  ;;  %v6710_v3 = vld [vmem:[#allocation125_spill] sm:$0xff] }
 0x3cf   :  { %v1835_v42 = vpop.f32.mrf.mxu0  ;;  %v1876_v22 = vpop.f32.mrf.mxu1 }
 0x3d0   :  { %3782 = vpow2.f32 %v3617_v45  ;;  %v3618_v7 = vmul.f32 -1.442695, %v1916_v62 }
 0x3d1   :  { %v1836_v10 = vpop.f32.mrf.mxu0  ;;  %v1877_v56 = vpop.f32.mrf.mxu1 }
 0x3d2   :  { %3784 = vpow2.f32 %v3618_v7 }
 0x3d3   :  { %3786 = vpow2.f32 %v3619_v0  ;;  %v6712_v0 = vld [vmem:[#allocation126_spill] sm:$0xff] }
 0x3dd   :  { %v3783_v30 = vpop.eup %3782 }
 0x3de   :  { %v1952_v60 = vadd.f32 1.0, %v3783_v30 }
 0x3df   :  { %v3785_v47 = vpop.eup %3784 }
 0x3e0   :  { %3788 = vrcp.f32 %v1952_v60  ;;  %v1953_v2 = vadd.f32 1.0, %v3785_v47  ;;  %v3787_v33 = vpop.eup %3786  ;;  %v6714_v60 = vld [vmem:[#allocation127_spill] sm:$0xff] }
 0x3e1   :  { %3790 = vtanh.f32 %v1918_v13  ;;  %v1954_v42 = vadd.f32 1.0, %v3787_v33  ;;  %v6713_v13 = vld [vmem:[#allocation104_spill] sm:$0xff]  ;;  %v6715_v47 = vld [vmem:[#allocation107_spill] sm:$0xff] }
 0x3e2   :  { %3792 = vrcp.f32 %v1953_v2  ;;  %v6716_v2 = vld [vmem:[#allocation128_spill] sm:$0xff] }
 0x3e3   :  { %3794 = vrcp.f32 %v1954_v42  ;;  %v6717_v33 = vld [vmem:[#allocation108_spill] sm:$0xff] }
 0x3e4   :  { %v6721_v42 = vld [vmem:[#allocation112_spill] sm:$0xff] }
 0x3ed   :  { %v3789_v53 = vpop.eup %3788 }
 0x3ee   :  { %v3791_v45 = vpop.eup %3790 }
 0x3ef   :  { %v3793_v62 = vpop.eup %3792  ;;  %v1963_v35 = vmul.f32 %v3791_v45, %v3789_v53  ;;  %v6718_v53 = vld [vmem:[#allocation129_spill] sm:$0xff]  ;;  %v6719_v45 = vld [vmem:[#allocation111_spill] sm:$0xff] }
 0x3f0   :  { %v1962_v22 = vmul.f32 %v3793_v62, %v5178_v59  ;;  %v3795_v30 = vpop.eup %3794  ;;  %v6707_v59 = vld [vmem:[#allocation99_spill] sm:$0xff]  ;;  %v6720_v62 = vld [vmem:[#allocation130_spill] sm:$0xff] }
 0x3f2   :  { %v5320_v7 = vadd.f32 %v1963_v35, %v1962_v22  ;;  %v6722_v22 = vld [vmem:[#allocation131_spill] sm:$0xff] }
 0x3f3   :  { %v6723_v35 = vld [vmem:[#allocation115_spill] sm:$0xff] }
 0x3f4   :  { %3796 = vtanh.f32 %v5320_v7 }
 0x401   :  { %v3797_v12 = vpop.eup %3796 }
 0x402   :  { %v1966_v16 = vmul.f32 %v3797_v12, %v3795_v30  ;;  %v6724_v30 = vld [vmem:[#allocation132_spill] sm:$0xff] }
 0x403   :  { %v6725_v12 = vld [vmem:[#allocation116_spill] sm:$0xff] }
 0x404   :  { %v1972_v10 = vrot.slane %v1966_v16, 6  ;;  %v1976_v56 = vpack.c.bf16 %v1966_v16, %v1966_v16  ;;  %v6726_v16 = vld [vmem:[#allocation133_spill] sm:$0xff] }
 0x406   :  { %1974 = vst [vmem:[#allocation3] sm:$0xc] %v1972_v10  ;;  %2009 = vmatprep.mubr.bf16.mxu0 %v1976_v56  ;;  %2050 = vmatprep.mubr.bf16.mxu1 %v1976_v56  ;;  %v6727_v10 = vld [vmem:[#allocation119_spill] sm:$0xff] }
 0x407   :  { %2010 = vmatmul.mubr.bf16.vlgmr.msra.gmra.mxu0 %v5323_v61  ;;  %2051 = vmatmul.mubr.bf16.vlgmr.msra.gmra.mxu1 %v5323_v61 }
 0x408   :  { %2060 = vmatpush1.bf16.msra.mxu0 %v6528_v27  ;;  %2101 = vmatpush1.bf16.msra.mxu1 %v6529_v21 }
 0x409   :  { %2091 = vmatprep.mubr.bf16.mxu0 %v1976_v56  ;;  %2132 = vmatprep.mubr.bf16.mxu1 %v1976_v56  ;;  %v6728_v56 = vld [vmem:[#allocation134_spill] sm:$0xff] }
 0x40a   :  { %2061 = vmatprep.subr.bf16.mxu0 %v6530_v29  ;;  %2102 = vmatprep.subr.bf16.mxu1 %v6531_v38 }
 0x40c   :  { %2062 = vmatpush1.bf16.msra.mxu0 %v6532_v48  ;;  %2103 = vmatpush1.bf16.msra.mxu1 %v6533_v4 }
 0x40d   :  { %2063 = vmatprep.subr.bf16.mxu0 %v6534_v28  ;;  %2104 = vmatprep.subr.bf16.mxu1 %v6535_v1 }
 0x410   :  { %2064 = vmatpush1.bf16.msra.mxu0 %v6536_v57  ;;  %2105 = vmatpush1.bf16.msra.mxu1 %v6537_v19 }
 0x411   :  { %2065 = vmatprep.subr.bf16.mxu0 %v6617_v26  ;;  %2106 = vmatprep.subr.bf16.mxu1 %v6618_v20 }
 0x414   :  { %2066 = vmatpush1.bf16.msra.mxu0 %v6619_v39  ;;  %2107 = vmatpush1.bf16.msra.mxu1 %v6620_v14 }
 0x415   :  { %2067 = vmatprep.subr.bf16.mxu0 %v6542_v34  ;;  %2108 = vmatprep.subr.bf16.mxu1 %v6621_v40 }
 0x418   :  { %2068 = vmatpush1.bf16.msra.mxu0 %v6544_v9  ;;  %2109 = vmatpush1.bf16.msra.mxu1 %v6622_v49 }
 0x419   :  { %2069 = vmatprep.subr.bf16.mxu0 %v6546_v54  ;;  %2110 = vmatprep.subr.bf16.mxu1 %v6623_v37 }
 0x41c   :  { %2070 = vmatpush1.bf16.msra.mxu0 %v6548_v17  ;;  %2111 = vmatpush1.bf16.msra.mxu1 %v6624_v32 }
 0x41d   :  { %2071 = vmatprep.subr.bf16.mxu0 %v6550_v11  ;;  %2112 = vmatprep.subr.bf16.mxu1 %v6625_v58 }
 0x420   :  { %2072 = vmatpush1.bf16.msra.mxu0 %v6552_v41  ;;  %2113 = vmatpush1.bf16.msra.mxu1 %v6626_v44 }
 0x421   :  { %2073 = vmatprep.subr.bf16.mxu0 %v6553_v24  ;;  %2114 = vmatprep.subr.bf16.mxu1 %v6627_v55 }
 0x424   :  { %2074 = vmatpush1.bf16.msra.mxu0 %v6554_v18  ;;  %2115 = vmatpush1.bf16.msra.mxu1 %v6628_v5 }
 0x425   :  { %2075 = vmatprep.subr.bf16.mxu0 %v6555_v50  ;;  %2116 = vmatprep.subr.bf16.mxu1 %v6629_v63 }
 0x428   :  { %2076 = vmatpush2.bf16.msra.mxu0 %v6556_v46  ;;  %2117 = vmatpush2.bf16.msra.mxu1 %v6630_v36 }
 0x429   :  { %2077 = vmatprep.subr.bf16.mxu0 %v6557_v31  ;;  %2118 = vmatprep.subr.bf16.mxu1 %v6631_v23 }
 0x42c   :  { %2078 = vmatpush2.bf16.msra.mxu0 %v6558_v6  ;;  %2119 = vmatpush2.bf16.msra.mxu1 %v6632_v43 }
 0x42d   :  { %2079 = vmatprep.subr.bf16.mxu0 %v6559_v25  ;;  %2120 = vmatprep.subr.bf16.mxu1 %v6633_v52 }
 0x430   :  { %2080 = vmatpush2.bf16.msra.mxu0 %v6707_v59  ;;  %2121 = vmatpush2.bf16.msra.mxu1 %v6708_v8 }
 0x431   :  { %2081 = vmatprep.subr.bf16.mxu0 %v6709_v51  ;;  %2122 = vmatprep.subr.bf16.mxu1 %v6710_v3  ;;  %v2144_v3 = vld [vmem:[#allocation2 + $0x18] sm:$0xc0] }
 0x432   :  { %v2152_v51 = vrot.slane %v2144_v3, 6 }
 0x434   :  { %2082 = vmatpush2.bf16.msra.mxu0 %v6711_v15  ;;  %2123 = vmatpush2.bf16.msra.mxu1 %v6712_v0 }
 0x435   :  { %2083 = vmatprep.subr.bf16.mxu0 %v6713_v13  ;;  %2124 = vmatprep.subr.bf16.mxu1 %v6714_v60 }
 0x438   :  { %2084 = vmatpush2.bf16.msra.mxu0 %v6715_v47  ;;  %2125 = vmatpush2.bf16.msra.mxu1 %v6716_v2 }
 0x439   :  { %2085 = vmatprep.subr.bf16.mxu0 %v6717_v33  ;;  %2126 = vmatprep.subr.bf16.mxu1 %v6718_v53  ;;  %v6729_v53 = vld [vmem:[#allocation7_spill] sm:$0xff] }
 0x43c   :  { %2086 = vmatpush2.bf16.msra.mxu0 %v6719_v45  ;;  %2127 = vmatpush2.bf16.msra.mxu1 %v6720_v62  ;;  %v6730_v45 = vld [vmem:[#allocation23_spill] sm:$0xff] }
 0x43d   :  { %2087 = vmatprep.subr.bf16.mxu0 %v6721_v42  ;;  %2128 = vmatprep.subr.bf16.mxu1 %v6722_v22  ;;  %v6731_v22 = vld [vmem:[#allocation8_spill] sm:$0xff]  ;;  %v6740_v42 = vld [vmem:[#allocation33_spill] sm:$0xff] }
 0x440   :  { %2088 = vmatpush2.bf16.msra.mxu0 %v6723_v35  ;;  %2129 = vmatpush2.bf16.msra.mxu1 %v6724_v30  ;;  %v6732_v35 = vld [vmem:[#allocation24_spill] sm:$0xff]  ;;  %v6733_v30 = vld [vmem:[#allocation9_spill] sm:$0xff] }
 0x441   :  { %2089 = vmatprep.subr.bf16.mxu0 %v6725_v12  ;;  %2130 = vmatprep.subr.bf16.mxu1 %v6726_v16  ;;  %v6734_v12 = vld [vmem:[#allocation26_spill] sm:$0xff] }
 0x442   :  { %v6735_v16 = vld [vmem:[#allocation10_spill] sm:$0xff] }
 0x444   :  { %2090 = vmatpush2.bf16.msra.mxu0 %v6727_v10  ;;  %2131 = vmatpush2.bf16.msra.mxu1 %v6728_v56  ;;  %v6736_v10 = vld [vmem:[#allocation29_spill] sm:$0xff]  ;;  %v6737_v56 = vld [vmem:[#allocation11_spill] sm:$0xff] }
 0x445   :  { %2224 = vmatprep.subr.bf16.mxu0 %v6729_v53  ;;  %2265 = vmatprep.subr.bf16.mxu1 %v6730_v45  ;;  %v6738_v53 = vld [vmem:[#allocation30_spill] sm:$0xff]  ;;  %v6739_v45 = vld [vmem:[#allocation12_spill] sm:$0xff] }
 0x447   :  { %2092 = vmatmul.mubr.bf16.vlgmr.msra.gmra.mxu0 %v5323_v61  ;;  %2133 = vmatmul.mubr.bf16.vlgmr.msra.gmra.mxu1 %v5323_v61  ;;  %v6741_v61 = vld [vmem:[#allocation13_spill] sm:$0xff] }
 0x448   :  { %2225 = vmatpush1.bf16.msra.mxu0 %v6731_v22  ;;  %2266 = vmatpush1.bf16.msra.mxu1 %v6732_v35  ;;  %v6742_v22 = vld [vmem:[#allocation34_spill] sm:$0xff] }
 0x449   :  { %2226 = vmatprep.subr.bf16.mxu0 %v6733_v30  ;;  %2267 = vmatprep.subr.bf16.mxu1 %v6734_v12  ;;  %v6743_v35 = vld [vmem:[#allocation14_spill] sm:$0xff]  ;;  %v6744_v30 = vld [vmem:[#allocation37_spill] sm:$0xff]  ;;  %v6745_v12 = vld [vmem:[#allocation15_spill] sm:$0xff] }
 0x44c   :  { %2227 = vmatpush1.bf16.msra.mxu0 %v6735_v16  ;;  %2268 = vmatpush1.bf16.msra.mxu1 %v6736_v10  ;;  %v6746_v16 = vld [vmem:[#allocation38_spill] sm:$0xff]  ;;  %v6747_v10 = vld [vmem:[#allocation16_spill] sm:$0xff] }
 0x44d   :  { %2228 = vmatprep.subr.bf16.mxu0 %v6737_v56  ;;  %2269 = vmatprep.subr.bf16.mxu1 %v6738_v53  ;;  %v6748_v56 = vld [vmem:[#allocation41_spill] sm:$0xff] }
 0x44e   :  { %v6749_v53 = vld [vmem:[#allocation17_spill] sm:$0xff] }
 0x450   :  { %2229 = vmatpush1.bf16.msra.mxu0 %v6739_v45  ;;  %2270 = vmatpush1.bf16.msra.mxu1 %v6740_v42  ;;  %v6750_v45 = vld [vmem:[#allocation42_spill] sm:$0xff] }
 0x451   :  { %2230 = vmatprep.subr.bf16.mxu0 %v6741_v61  ;;  %2271 = vmatprep.subr.bf16.mxu1 %v6742_v22  ;;  %v6751_v42 = vld [vmem:[#allocation18_spill] sm:$0xff]  ;;  %v6752_v61 = vld [vmem:[#allocation45_spill] sm:$0xff]  ;;  %v6753_v22 = vld [vmem:[#allocation19_spill] sm:$0xff] }
 0x454   :  { %2231 = vmatpush1.bf16.msra.mxu0 %v6743_v35  ;;  %2272 = vmatpush1.bf16.msra.mxu1 %v6744_v30  ;;  %v6754_v35 = vld [vmem:[#allocation46_spill] sm:$0xff]  ;;  %v6755_v30 = vld [vmem:[#allocation20_spill] sm:$0xff] }
 0x455   :  { %2232 = vmatprep.subr.bf16.mxu0 %v6745_v12  ;;  %2273 = vmatprep.subr.bf16.mxu1 %v6746_v16  ;;  %v6756_v12 = vld [vmem:[#allocation49_spill] sm:$0xff] }
 0x456   :  { %v6757_v16 = vld [vmem:[#allocation21_spill] sm:$0xff] }
 0x458   :  { %2233 = vmatpush1.bf16.msra.mxu0 %v6747_v10  ;;  %2274 = vmatpush1.bf16.msra.mxu1 %v6748_v56  ;;  %v6758_v10 = vld [vmem:[#allocation50_spill] sm:$0xff] }
 0x459   :  { %2234 = vmatprep.subr.bf16.mxu0 %v6749_v53  ;;  %2275 = vmatprep.subr.bf16.mxu1 %v6750_v45  ;;  %v6759_v56 = vld [vmem:[#allocation22_spill] sm:$0xff]  ;;  %v6760_v53 = vld [vmem:[#allocation53_spill] sm:$0xff] }
 0x45a   :  { %v6761_v45 = vld [vmem:[#allocation25_spill] sm:$0xff] }
 0x45c   :  { %2235 = vmatpush1.bf16.msra.mxu0 %v6751_v42  ;;  %2276 = vmatpush1.bf16.msra.mxu1 %v6752_v61  ;;  %v6762_v42 = vld [vmem:[#allocation54_spill] sm:$0xff]  ;;  %v6763_v61 = vld [vmem:[#allocation27_spill] sm:$0xff] }
 0x45d   :  { %2236 = vmatprep.subr.bf16.mxu0 %v6753_v22  ;;  %2277 = vmatprep.subr.bf16.mxu1 %v6754_v35  ;;  %v6764_v22 = vld [vmem:[#allocation57_spill] sm:$0xff]  ;;  %v6765_v35 = vld [vmem:[#allocation28_spill] sm:$0xff] }
 0x460   :  { %2237 = vmatpush1.bf16.msra.mxu0 %v6755_v30  ;;  %2278 = vmatpush1.bf16.msra.mxu1 %v6756_v12  ;;  %v6766_v30 = vld [vmem:[#allocation58_spill] sm:$0xff]  ;;  %v6767_v12 = vld [vmem:[#allocation31_spill] sm:$0xff] }
 0x461   :  { %2238 = vmatprep.subr.bf16.mxu0 %v6757_v16  ;;  %2279 = vmatprep.subr.bf16.mxu1 %v6758_v10  ;;  %v6768_v16 = vld [vmem:[#allocation61_spill] sm:$0xff]  ;;  %v6769_v10 = vld [vmem:[#allocation32_spill] sm:$0xff] }
 0x464   :  { %2239 = vmatpush1.bf16.msra.mxu0 %v6759_v56  ;;  %2280 = vmatpush1.bf16.msra.mxu1 %v6760_v53  ;;  %v6770_v56 = vld [vmem:[#allocation62_spill] sm:$0xff]  ;;  %v6771_v53 = vld [vmem:[#allocation35_spill] sm:$0xff] }
 0x465   :  { %2240 = vmatprep.subr.bf16.mxu0 %v6761_v45  ;;  %2281 = vmatprep.subr.bf16.mxu1 %v6762_v42  ;;  %v6772_v45 = vld [vmem:[#allocation65_spill] sm:$0xff]  ;;  %v6773_v42 = vld [vmem:[#allocation36_spill] sm:$0xff] }
 0x468   :  { %2241 = vmatpush2.bf16.msra.mxu0 %v6763_v61  ;;  %2282 = vmatpush2.bf16.msra.mxu1 %v6764_v22  ;;  %v6774_v61 = vld [vmem:[#allocation66_spill] sm:$0xff]  ;;  %v6775_v22 = vld [vmem:[#allocation39_spill] sm:$0xff] }
 0x469   :  { %2242 = vmatprep.subr.bf16.mxu0 %v6765_v35  ;;  %2283 = vmatprep.subr.bf16.mxu1 %v6766_v30  ;;  %v6776_v35 = vld [vmem:[#allocation69_spill] sm:$0xff]  ;;  %v6777_v30 = vld [vmem:[#allocation40_spill] sm:$0xff] }
 0x46c   :  { %2243 = vmatpush2.bf16.msra.mxu0 %v6767_v12  ;;  %2284 = vmatpush2.bf16.msra.mxu1 %v6768_v16  ;;  %v6778_v12 = vld [vmem:[#allocation70_spill] sm:$0xff]  ;;  %v6779_v16 = vld [vmem:[#allocation43_spill] sm:$0xff] }
 0x46d   :  { %2244 = vmatprep.subr.bf16.mxu0 %v6769_v10  ;;  %2285 = vmatprep.subr.bf16.mxu1 %v6770_v56  ;;  %v6780_v10 = vld [vmem:[#allocation73_spill] sm:$0xff]  ;;  %v6781_v56 = vld [vmem:[#allocation44_spill] sm:$0xff] }
 0x470   :  { %2245 = vmatpush2.bf16.msra.mxu0 %v6771_v53  ;;  %2286 = vmatpush2.bf16.msra.mxu1 %v6772_v45  ;;  %v6782_v53 = vld [vmem:[#allocation74_spill] sm:$0xff]  ;;  %v6783_v45 = vld [vmem:[#allocation47_spill] sm:$0xff] }
 0x471   :  { %2246 = vmatprep.subr.bf16.mxu0 %v6773_v42  ;;  %2287 = vmatprep.subr.bf16.mxu1 %v6774_v61  ;;  %v6784_v42 = vld [vmem:[#allocation77_spill] sm:$0xff]  ;;  %v6785_v61 = vld [vmem:[#allocation48_spill] sm:$0xff] }
 0x474   :  { %2247 = vmatpush2.bf16.msra.mxu0 %v6775_v22  ;;  %2288 = vmatpush2.bf16.msra.mxu1 %v6776_v35  ;;  %v6786_v22 = vld [vmem:[#allocation78_spill] sm:$0xff]  ;;  %v6787_v35 = vld [vmem:[#allocation51_spill] sm:$0xff] }
 0x475   :  { %2248 = vmatprep.subr.bf16.mxu0 %v6777_v30  ;;  %2289 = vmatprep.subr.bf16.mxu1 %v6778_v12  ;;  %v6788_v30 = vld [vmem:[#allocation81_spill] sm:$0xff]  ;;  %v6789_v12 = vld [vmem:[#allocation52_spill] sm:$0xff] }
 0x478   :  { %2249 = vmatpush2.bf16.msra.mxu0 %v6779_v16  ;;  %2290 = vmatpush2.bf16.msra.mxu1 %v6780_v10  ;;  %v6790_v16 = vld [vmem:[#allocation82_spill] sm:$0xff]  ;;  %v6791_v10 = vld [vmem:[#allocation55_spill] sm:$0xff] }
 0x479   :  { %2250 = vmatprep.subr.bf16.mxu0 %v6781_v56  ;;  %2291 = vmatprep.subr.bf16.mxu1 %v6782_v53  ;;  %v6792_v56 = vld [vmem:[#allocation85_spill] sm:$0xff]  ;;  %v6793_v53 = vld [vmem:[#allocation56_spill] sm:$0xff] }
 0x47c   :  { %2251 = vmatpush2.bf16.msra.mxu0 %v6783_v45  ;;  %2292 = vmatpush2.bf16.msra.mxu1 %v6784_v42  ;;  %v6794_v45 = vld [vmem:[#allocation86_spill] sm:$0xff]  ;;  %v2141_v42 = vld [vmem:[#allocation2 + $0x30] sm:$0xc0] }
 0x47d   :  { %2252 = vmatprep.subr.bf16.mxu0 %v6785_v61  ;;  %2293 = vmatprep.subr.bf16.mxu1 %v6786_v22  ;;  %v2142_v61 = vld [vmem:[#allocation2] sm:$0xc0]  ;;  %v2149_v62 = vrot.slane %v2141_v42, 6 }
 0x47e   :  { %v2150_v2 = vrot.slane %v2142_v61, 6 }
 0x480   :  { %2253 = vmatpush2.bf16.msra.mxu0 %v6787_v35  ;;  %2294 = vmatpush2.bf16.msra.mxu1 %v6788_v30 }
 0x481   :  { %2254 = vmatprep.subr.bf16.mxu0 %v6789_v12  ;;  %2295 = vmatprep.subr.bf16.mxu1 %v6790_v16 }
 0x484   :  { %2255 = vmatpush2.bf16.msra.mxu0 %v6791_v10  ;;  %2296 = vmatpush2.bf16.msra.mxu1 %v6792_v56 }
 0x485   :  { %2306 = vmatprep.subr.bf16.mxu0 %v6793_v53  ;;  %2347 = vmatprep.subr.bf16.mxu1 %v6794_v45  ;;  %v2143_v53 = vld [vmem:[#allocation2 + $0x58] sm:$0xc0] }
 0x486   :  { %v2151_v45 = vrot.slane %v2143_v53, 6 }
 0x4c7   :  { %v2011_v22 = vpop.f32.mrf.mxu0  ;;  %v2052_v33 = vpop.f32.mrf.mxu1 }
 0x4c8   :  { %v2157_v35 = vadd.f32 %v2149_v62, %v2011_v22  ;;  %v2159_v15 = vadd.f32 %v2151_v45, %v2052_v33 }
 0x4c9   :  { %v2013_v30 = vpop.f32.mrf.mxu0  ;;  %v2054_v47 = vpop.f32.mrf.mxu1 }
 0x4ca   :  { %v3620_v12 = vmul.f32 -1.442695, %v2157_v35  ;;  %v2158_v60 = vadd.f32 %v2150_v2, %v2013_v30  ;;  %v3622_v42 = vmul.f32 -1.442695, %v2159_v15  ;;  %v2160_v62 = vadd.f32 %v2152_v51, %v2054_v47 }
 0x4cb   :  { %v2015_v16 = vpop.f32.mrf.mxu0  ;;  %v2056_v13 = vpop.f32.mrf.mxu1 }
 0x4cc   :  { %3798 = vpow2.f32 %v3620_v12  ;;  %v3621_v10 = vmul.f32 -1.442695, %v2158_v60  ;;  %v6795_v12 = vld [vmem:[#allocation89_spill] sm:$0xff]  ;;  %v2161_v16 = vld [vmem:[#allocation2 + $0x60] sm:$0x3] }
 0x4cd   :  { %v2016_v56 = vpop.f32.mrf.mxu0  ;;  %v2057_v0 = vpop.f32.mrf.mxu1 }
 0x4ce   :  { %3800 = vpow2.f32 %v3621_v10 }
 0x4cf   :  { %3802 = vpow2.f32 %v3622_v42 }
 0x4d9   :  { %v3799_v8 = vpop.eup %3798 }
 0x4da   :  { %v2178_v22 = vadd.f32 1.0, %v3799_v8 }
 0x4db   :  { %v3801_v61 = vpop.eup %3800 }
 0x4dc   :  { %3804 = vrcp.f32 %v2178_v22  ;;  %v2179_v2 = vadd.f32 1.0, %v3801_v61  ;;  %v3803_v13 = vpop.eup %3802 }
 0x4dd   :  { %3806 = vtanh.f32 %v2160_v62  ;;  %v2180_v30 = vadd.f32 1.0, %v3803_v13  ;;  %v2162_v62 = vld [vmem:[#allocation2 + $0x70] sm:$0x3] }
 0x4de   :  { %3808 = vrcp.f32 %v2179_v2 }
 0x4df   :  { %3810 = vrcp.f32 %v2180_v30 }
 0x4e9   :  { %v3805_v60 = vpop.eup %3804 }
 0x4ea   :  { %v3807_v35 = vpop.eup %3806 }
 0x4eb   :  { %v3809_v0 = vpop.eup %3808  ;;  %v2189_v33 = vmul.f32 %v3807_v35, %v3805_v60 }
 0x4ec   :  { %v2188_v53 = vmul.f32 %v3809_v0, %v6795_v12  ;;  %v3811_v8 = vpop.eup %3810  ;;  %v2163_v12 = vld [vmem:[#allocation2 + $0x78] sm:$0x3] }
 0x4ee   :  { %v5458_v45 = vadd.f32 %v2189_v33, %v2188_v53 }
 0x4f0   :  { %6796 = vst [vmem:[#allocation60_spill] sm:$0xff] %v5458_v45  ;;  %3812 = vtanh.f32 %v5458_v45 }
 0x4fd   :  { %v3813_v51 = vpop.eup %3812 }
 0x4fe   :  { %v2192_v3 = vmul.f32 %v3813_v51, %v3811_v8  ;;  %v2164_v8 = vld [vmem:[#allocation2 + $0x28] sm:$0x3] }
 0x500   :  { %v2218_v15 = vrot.slane %v2192_v3, 2 }
 0x502   :  { %2220 = vst [vmem:[#allocation3 + $0x18] sm:$0xc0] %v2218_v15 }
 0x507   :  { %v2093_v47 = vpop.f32.mrf.mxu0  ;;  %v2134_v10 = vpop.f32.mrf.mxu1 }
 0x508   :  { %v2165_v56 = vadd.f32 %v2161_v16, %v2093_v47  ;;  %v2167_v53 = vadd.f32 %v2163_v12, %v2134_v10  ;;  %v6799_v12 = vld [vmem:[#allocation125_spill] sm:$0xff] }
 0x509   :  { %v2095_v42 = vpop.f32.mrf.mxu0  ;;  %v2136_v22 = vpop.f32.mrf.mxu1 }
 0x50a   :  { %v3623_v61 = vmul.f32 -1.442695, %v2165_v56  ;;  %v2166_v2 = vadd.f32 %v2162_v62, %v2095_v42  ;;  %v3625_v33 = vmul.f32 -1.442695, %v2167_v53  ;;  %v2168_v15 = vadd.f32 %v2164_v8, %v2136_v22  ;;  %v6800_v53 = vld [vmem:[#allocation103_spill] sm:$0xff]  ;;  %v6802_v8 = vld [vmem:[#allocation104_spill] sm:$0xff] }
 0x50b   :  { %v2097_v13 = vpop.f32.mrf.mxu0  ;;  %v2138_v60 = vpop.f32.mrf.mxu1 }
 0x50c   :  { %3814 = vpow2.f32 %v3623_v61  ;;  %v3624_v35 = vmul.f32 -1.442695, %v2166_v2 }
 0x50d   :  { %v2098_v0 = vpop.f32.mrf.mxu0  ;;  %v2139_v30 = vpop.f32.mrf.mxu1 }
 0x50e   :  { %3816 = vpow2.f32 %v3624_v35  ;;  %v5465_v30 = vpack.c.bf16 %v2192_v3, %v2192_v3  ;;  %v6798_v3 = vld [vmem:[#allocation100_spill] sm:$0xff] }
 0x50f   :  { %3818 = vpow2.f32 %v3625_v33  ;;  %v6801_v33 = vld [vmem:[#allocation126_spill] sm:$0xff] }
 0x519   :  { %v3815_v51 = vpop.eup %3814 }
 0x51a   :  { %v2202_v45 = vadd.f32 1.0, %v3815_v51  ;;  %v6803_v51 = vld [vmem:[#allocation127_spill] sm:$0xff] }
 0x51b   :  { %v3817_v47 = vpop.eup %3816 }
 0x51c   :  { %3820 = vrcp.f32 %v2202_v45  ;;  %v2203_v16 = vadd.f32 1.0, %v3817_v47  ;;  %v3819_v56 = vpop.eup %3818  ;;  %v6805_v47 = vld [vmem:[#allocation128_spill] sm:$0xff] }
 0x51d   :  { %3822 = vtanh.f32 %v2168_v15  ;;  %v2204_v2 = vadd.f32 1.0, %v3819_v56  ;;  %v6804_v15 = vld [vmem:[#allocation107_spill] sm:$0xff]  ;;  %v6807_v56 = vld [vmem:[#allocation129_spill] sm:$0xff] }
 0x51e   :  { %3824 = vrcp.f32 %v2203_v16  ;;  %v6806_v16 = vld [vmem:[#allocation108_spill] sm:$0xff] }
 0x51f   :  { %3826 = vrcp.f32 %v2204_v2  ;;  %v6811_v2 = vld [vmem:[#allocation131_spill] sm:$0xff] }
 0x529   :  { %v3821_v42 = vpop.eup %3820 }
 0x52a   :  { %v3823_v62 = vpop.eup %3822 }
 0x52b   :  { %v3825_v61 = vpop.eup %3824  ;;  %v2213_v60 = vmul.f32 %v3823_v62, %v3821_v42  ;;  %v6808_v42 = vld [vmem:[#allocation111_spill] sm:$0xff]  ;;  %v6809_v62 = vld [vmem:[#allocation130_spill] sm:$0xff] }
 0x52c   :  { %v2212_v13 = vmul.f32 %v3825_v61, %v5320_v7  ;;  %v3827_v22 = vpop.eup %3826  ;;  %v6797_v7 = vld [vmem:[#allocation124_spill] sm:$0xff] }
 0x52d   :  { %v6810_v61 = vld [vmem:[#allocation112_spill] sm:$0xff] }
 0x52e   :  { %v5462_v10 = vadd.f32 %v2213_v60, %v2212_v13  ;;  %v6812_v13 = vld [vmem:[#allocation115_spill] sm:$0xff]  ;;  %v6813_v60 = vld [vmem:[#allocation132_spill] sm:$0xff] }
 0x530   :  { %3828 = vtanh.f32 %v5462_v10 }
 0x53d   :  { %v3829_v35 = vpop.eup %3828 }
 0x53e   :  { %v2216_v0 = vmul.f32 %v3829_v35, %v3827_v22  ;;  %v6814_v22 = vld [vmem:[#allocation116_spill] sm:$0xff]  ;;  %v6815_v35 = vld [vmem:[#allocation133_spill] sm:$0xff] }
 0x540   :  { %2221 = vst [vmem:[#allocation3] sm:$0x3] %v2216_v0  ;;  %v2223_v45 = vpack.c.bf16 %v2216_v0, %v2216_v0  ;;  %v6816_v0 = vld [vmem:[#allocation119_spill] sm:$0xff] }
 0x542   :  { %2256 = vmatprep.mubr.bf16.mxu0 %v2223_v45  ;;  %2297 = vmatprep.mubr.bf16.mxu1 %v2223_v45 }
 0x543   :  { %2257 = vmatmul.mubr.bf16.vlgmr.msra.gmra.mxu0 %v5465_v30  ;;  %2298 = vmatmul.mubr.bf16.vlgmr.msra.gmra.mxu1 %v5465_v30 }
 0x544   :  { %2307 = vmatpush1.bf16.msra.mxu0 %v6528_v27  ;;  %2348 = vmatpush1.bf16.msra.mxu1 %v6529_v21 }
 0x545   :  { %2338 = vmatprep.mubr.bf16.mxu0 %v2223_v45  ;;  %2379 = vmatprep.mubr.bf16.mxu1 %v2223_v45  ;;  %v6817_v45 = vld [vmem:[#allocation134_spill] sm:$0xff] }
 0x546   :  { %2308 = vmatprep.subr.bf16.mxu0 %v6530_v29  ;;  %2349 = vmatprep.subr.bf16.mxu1 %v6531_v38 }
 0x548   :  { %2309 = vmatpush1.bf16.msra.mxu0 %v6532_v48  ;;  %2350 = vmatpush1.bf16.msra.mxu1 %v6533_v4 }
 0x549   :  { %2310 = vmatprep.subr.bf16.mxu0 %v6534_v28  ;;  %2351 = vmatprep.subr.bf16.mxu1 %v6535_v1 }
 0x54c   :  { %2311 = vmatpush1.bf16.msra.mxu0 %v6536_v57  ;;  %2352 = vmatpush1.bf16.msra.mxu1 %v6537_v19 }
 0x54d   :  { %2312 = vmatprep.subr.bf16.mxu0 %v6617_v26  ;;  %2353 = vmatprep.subr.bf16.mxu1 %v6618_v20 }
 0x550   :  { %2313 = vmatpush1.bf16.msra.mxu0 %v6619_v39  ;;  %2354 = vmatpush1.bf16.msra.mxu1 %v6620_v14 }
 0x551   :  { %2314 = vmatprep.subr.bf16.mxu0 %v6542_v34  ;;  %2355 = vmatprep.subr.bf16.mxu1 %v6621_v40 }
 0x554   :  { %2315 = vmatpush1.bf16.msra.mxu0 %v6544_v9  ;;  %2356 = vmatpush1.bf16.msra.mxu1 %v6622_v49 }
 0x555   :  { %2316 = vmatprep.subr.bf16.mxu0 %v6546_v54  ;;  %2357 = vmatprep.subr.bf16.mxu1 %v6623_v37 }
 0x558   :  { %2317 = vmatpush1.bf16.msra.mxu0 %v6548_v17  ;;  %2358 = vmatpush1.bf16.msra.mxu1 %v6624_v32 }
 0x559   :  { %2318 = vmatprep.subr.bf16.mxu0 %v6550_v11  ;;  %2359 = vmatprep.subr.bf16.mxu1 %v6625_v58 }
 0x55c   :  { %2319 = vmatpush1.bf16.msra.mxu0 %v6552_v41  ;;  %2360 = vmatpush1.bf16.msra.mxu1 %v6626_v44 }
 0x55d   :  { %2320 = vmatprep.subr.bf16.mxu0 %v6553_v24  ;;  %2361 = vmatprep.subr.bf16.mxu1 %v6627_v55 }
 0x560   :  { %2321 = vmatpush1.bf16.msra.mxu0 %v6554_v18  ;;  %2362 = vmatpush1.bf16.msra.mxu1 %v6628_v5 }
 0x561   :  { %2322 = vmatprep.subr.bf16.mxu0 %v6555_v50  ;;  %2363 = vmatprep.subr.bf16.mxu1 %v6629_v63 }
 0x564   :  { %2323 = vmatpush2.bf16.msra.mxu0 %v6556_v46  ;;  %2364 = vmatpush2.bf16.msra.mxu1 %v6630_v36 }
 0x565   :  { %2324 = vmatprep.subr.bf16.mxu0 %v6557_v31  ;;  %2365 = vmatprep.subr.bf16.mxu1 %v6631_v23 }
 0x568   :  { %2325 = vmatpush2.bf16.msra.mxu0 %v6558_v6  ;;  %2366 = vmatpush2.bf16.msra.mxu1 %v6632_v43 }
 0x569   :  { %2326 = vmatprep.subr.bf16.mxu0 %v6559_v25  ;;  %2367 = vmatprep.subr.bf16.mxu1 %v6633_v52 }
 0x56c   :  { %2327 = vmatpush2.bf16.msra.mxu0 %v6707_v59  ;;  %2368 = vmatpush2.bf16.msra.mxu1 %v6797_v7 }
 0x56d   :  { %2328 = vmatprep.subr.bf16.mxu0 %v6798_v3  ;;  %2369 = vmatprep.subr.bf16.mxu1 %v6799_v12 }
 0x570   :  { %2329 = vmatpush2.bf16.msra.mxu0 %v6800_v53  ;;  %2370 = vmatpush2.bf16.msra.mxu1 %v6801_v33 }
 0x571   :  { %2330 = vmatprep.subr.bf16.mxu0 %v6802_v8  ;;  %2371 = vmatprep.subr.bf16.mxu1 %v6803_v51 }
 0x574   :  { %2331 = vmatpush2.bf16.msra.mxu0 %v6804_v15  ;;  %2372 = vmatpush2.bf16.msra.mxu1 %v6805_v47 }
 0x575   :  { %2332 = vmatprep.subr.bf16.mxu0 %v6806_v16  ;;  %2373 = vmatprep.subr.bf16.mxu1 %v6807_v56  ;;  %v6818_v56 = vld [vmem:[#allocation7_spill] sm:$0xff] }
 0x578   :  { %2333 = vmatpush2.bf16.msra.mxu0 %v6808_v42  ;;  %2374 = vmatpush2.bf16.msra.mxu1 %v6809_v62  ;;  %v6819_v42 = vld [vmem:[#allocation23_spill] sm:$0xff] }
 0x579   :  { %2334 = vmatprep.subr.bf16.mxu0 %v6810_v61  ;;  %2375 = vmatprep.subr.bf16.mxu1 %v6811_v2  ;;  %v6820_v2 = vld [vmem:[#allocation8_spill] sm:$0xff]  ;;  %v6829_v61 = vld [vmem:[#allocation33_spill] sm:$0xff] }
 0x57c   :  { %2335 = vmatpush2.bf16.msra.mxu0 %v6812_v13  ;;  %2376 = vmatpush2.bf16.msra.mxu1 %v6813_v60  ;;  %v6821_v13 = vld [vmem:[#allocation24_spill] sm:$0xff]  ;;  %v6822_v60 = vld [vmem:[#allocation9_spill] sm:$0xff] }
 0x57d   :  { %2336 = vmatprep.subr.bf16.mxu0 %v6814_v22  ;;  %2377 = vmatprep.subr.bf16.mxu1 %v6815_v35  ;;  %v6823_v22 = vld [vmem:[#allocation26_spill] sm:$0xff] }
 0x57e   :  { %v6824_v35 = vld [vmem:[#allocation10_spill] sm:$0xff] }
 0x580   :  { %2337 = vmatpush2.bf16.msra.mxu0 %v6816_v0  ;;  %2378 = vmatpush2.bf16.msra.mxu1 %v6817_v45  ;;  %v6825_v0 = vld [vmem:[#allocation29_spill] sm:$0xff]  ;;  %v6826_v45 = vld [vmem:[#allocation11_spill] sm:$0xff] }
 0x581   :  { %2471 = vmatprep.subr.bf16.mxu0 %v6818_v56  ;;  %2512 = vmatprep.subr.bf16.mxu1 %v6819_v42  ;;  %v6827_v56 = vld [vmem:[#allocation30_spill] sm:$0xff]  ;;  %v6828_v42 = vld [vmem:[#allocation12_spill] sm:$0xff] }
 0x583   :  { %2339 = vmatmul.mubr.bf16.vlgmr.msra.gmra.mxu0 %v5465_v30  ;;  %2380 = vmatmul.mubr.bf16.vlgmr.msra.gmra.mxu1 %v5465_v30  ;;  %v6830_v30 = vld [vmem:[#allocation13_spill] sm:$0xff] }
 0x584   :  { %2472 = vmatpush1.bf16.msra.mxu0 %v6820_v2  ;;  %2513 = vmatpush1.bf16.msra.mxu1 %v6821_v13  ;;  %v6831_v2 = vld [vmem:[#allocation34_spill] sm:$0xff] }
 0x585   :  { %2473 = vmatprep.subr.bf16.mxu0 %v6822_v60  ;;  %2514 = vmatprep.subr.bf16.mxu1 %v6823_v22  ;;  %v6832_v13 = vld [vmem:[#allocation14_spill] sm:$0xff]  ;;  %v6833_v60 = vld [vmem:[#allocation37_spill] sm:$0xff]  ;;  %v6834_v22 = vld [vmem:[#allocation15_spill] sm:$0xff] }
 0x588   :  { %2474 = vmatpush1.bf16.msra.mxu0 %v6824_v35  ;;  %2515 = vmatpush1.bf16.msra.mxu1 %v6825_v0  ;;  %v6835_v35 = vld [vmem:[#allocation38_spill] sm:$0xff]  ;;  %v6836_v0 = vld [vmem:[#allocation16_spill] sm:$0xff] }
 0x589   :  { %2475 = vmatprep.subr.bf16.mxu0 %v6826_v45  ;;  %2516 = vmatprep.subr.bf16.mxu1 %v6827_v56  ;;  %v6837_v45 = vld [vmem:[#allocation41_spill] sm:$0xff] }
 0x58a   :  { %v6838_v56 = vld [vmem:[#allocation17_spill] sm:$0xff] }
 0x58c   :  { %2476 = vmatpush1.bf16.msra.mxu0 %v6828_v42  ;;  %2517 = vmatpush1.bf16.msra.mxu1 %v6829_v61  ;;  %v6839_v42 = vld [vmem:[#allocation42_spill] sm:$0xff] }
 0x58d   :  { %2477 = vmatprep.subr.bf16.mxu0 %v6830_v30  ;;  %2518 = vmatprep.subr.bf16.mxu1 %v6831_v2  ;;  %v6840_v61 = vld [vmem:[#allocation18_spill] sm:$0xff]  ;;  %v6841_v30 = vld [vmem:[#allocation45_spill] sm:$0xff]  ;;  %v6842_v2 = vld [vmem:[#allocation19_spill] sm:$0xff] }
 0x590   :  { %2478 = vmatpush1.bf16.msra.mxu0 %v6832_v13  ;;  %2519 = vmatpush1.bf16.msra.mxu1 %v6833_v60  ;;  %v6843_v13 = vld [vmem:[#allocation46_spill] sm:$0xff]  ;;  %v6844_v60 = vld [vmem:[#allocation20_spill] sm:$0xff] }
 0x591   :  { %2479 = vmatprep.subr.bf16.mxu0 %v6834_v22  ;;  %2520 = vmatprep.subr.bf16.mxu1 %v6835_v35  ;;  %v6845_v22 = vld [vmem:[#allocation49_spill] sm:$0xff] }
 0x592   :  { %v6846_v35 = vld [vmem:[#allocation21_spill] sm:$0xff] }
 0x594   :  { %2480 = vmatpush1.bf16.msra.mxu0 %v6836_v0  ;;  %2521 = vmatpush1.bf16.msra.mxu1 %v6837_v45  ;;  %v6847_v0 = vld [vmem:[#allocation50_spill] sm:$0xff] }
 0x595   :  { %2481 = vmatprep.subr.bf16.mxu0 %v6838_v56  ;;  %2522 = vmatprep.subr.bf16.mxu1 %v6839_v42  ;;  %v6848_v45 = vld [vmem:[#allocation22_spill] sm:$0xff]  ;;  %v6849_v56 = vld [vmem:[#allocation53_spill] sm:$0xff] }
 0x596   :  { %v6850_v42 = vld [vmem:[#allocation25_spill] sm:$0xff] }
 0x598   :  { %2482 = vmatpush1.bf16.msra.mxu0 %v6840_v61  ;;  %2523 = vmatpush1.bf16.msra.mxu1 %v6841_v30  ;;  %v6851_v61 = vld [vmem:[#allocation54_spill] sm:$0xff]  ;;  %v6852_v30 = vld [vmem:[#allocation27_spill] sm:$0xff] }
 0x599   :  { %2483 = vmatprep.subr.bf16.mxu0 %v6842_v2  ;;  %2524 = vmatprep.subr.bf16.mxu1 %v6843_v13  ;;  %v6853_v2 = vld [vmem:[#allocation57_spill] sm:$0xff]  ;;  %v6854_v13 = vld [vmem:[#allocation28_spill] sm:$0xff] }
 0x59c   :  { %2484 = vmatpush1.bf16.msra.mxu0 %v6844_v60  ;;  %2525 = vmatpush1.bf16.msra.mxu1 %v6845_v22  ;;  %v6855_v60 = vld [vmem:[#allocation58_spill] sm:$0xff]  ;;  %v6856_v22 = vld [vmem:[#allocation31_spill] sm:$0xff] }
 0x59d   :  { %2485 = vmatprep.subr.bf16.mxu0 %v6846_v35  ;;  %2526 = vmatprep.subr.bf16.mxu1 %v6847_v0  ;;  %v6857_v35 = vld [vmem:[#allocation61_spill] sm:$0xff]  ;;  %v6858_v0 = vld [vmem:[#allocation32_spill] sm:$0xff] }
 0x5a0   :  { %2486 = vmatpush1.bf16.msra.mxu0 %v6848_v45  ;;  %2527 = vmatpush1.bf16.msra.mxu1 %v6849_v56  ;;  %v6859_v45 = vld [vmem:[#allocation62_spill] sm:$0xff]  ;;  %v6860_v56 = vld [vmem:[#allocation35_spill] sm:$0xff] }
 0x5a1   :  { %2487 = vmatprep.subr.bf16.mxu0 %v6850_v42  ;;  %2528 = vmatprep.subr.bf16.mxu1 %v6851_v61  ;;  %v6861_v42 = vld [vmem:[#allocation65_spill] sm:$0xff]  ;;  %v6862_v61 = vld [vmem:[#allocation36_spill] sm:$0xff] }
 0x5a4   :  { %2488 = vmatpush2.bf16.msra.mxu0 %v6852_v30  ;;  %2529 = vmatpush2.bf16.msra.mxu1 %v6853_v2  ;;  %v6863_v30 = vld [vmem:[#allocation66_spill] sm:$0xff]  ;;  %v6864_v2 = vld [vmem:[#allocation39_spill] sm:$0xff] }
 0x5a5   :  { %2489 = vmatprep.subr.bf16.mxu0 %v6854_v13  ;;  %2530 = vmatprep.subr.bf16.mxu1 %v6855_v60  ;;  %v6865_v13 = vld [vmem:[#allocation69_spill] sm:$0xff]  ;;  %v6866_v60 = vld [vmem:[#allocation40_spill] sm:$0xff] }
 0x5a8   :  { %2490 = vmatpush2.bf16.msra.mxu0 %v6856_v22  ;;  %2531 = vmatpush2.bf16.msra.mxu1 %v6857_v35  ;;  %v6867_v22 = vld [vmem:[#allocation70_spill] sm:$0xff]  ;;  %v6868_v35 = vld [vmem:[#allocation43_spill] sm:$0xff] }
 0x5a9   :  { %2491 = vmatprep.subr.bf16.mxu0 %v6858_v0  ;;  %2532 = vmatprep.subr.bf16.mxu1 %v6859_v45  ;;  %v6869_v0 = vld [vmem:[#allocation73_spill] sm:$0xff]  ;;  %v6870_v45 = vld [vmem:[#allocation44_spill] sm:$0xff] }
 0x5ac   :  { %2492 = vmatpush2.bf16.msra.mxu0 %v6860_v56  ;;  %2533 = vmatpush2.bf16.msra.mxu1 %v6861_v42  ;;  %v6871_v56 = vld [vmem:[#allocation74_spill] sm:$0xff]  ;;  %v6872_v42 = vld [vmem:[#allocation47_spill] sm:$0xff] }
 0x5ad   :  { %2493 = vmatprep.subr.bf16.mxu0 %v6862_v61  ;;  %2534 = vmatprep.subr.bf16.mxu1 %v6863_v30  ;;  %v6873_v61 = vld [vmem:[#allocation77_spill] sm:$0xff]  ;;  %v6874_v30 = vld [vmem:[#allocation48_spill] sm:$0xff] }
 0x5b0   :  { %2494 = vmatpush2.bf16.msra.mxu0 %v6864_v2  ;;  %2535 = vmatpush2.bf16.msra.mxu1 %v6865_v13  ;;  %v6875_v2 = vld [vmem:[#allocation78_spill] sm:$0xff]  ;;  %v6876_v13 = vld [vmem:[#allocation51_spill] sm:$0xff] }
 0x5b1   :  { %2495 = vmatprep.subr.bf16.mxu0 %v6866_v60  ;;  %2536 = vmatprep.subr.bf16.mxu1 %v6867_v22  ;;  %v6877_v60 = vld [vmem:[#allocation81_spill] sm:$0xff]  ;;  %v6878_v22 = vld [vmem:[#allocation52_spill] sm:$0xff] }
 0x5b4   :  { %2496 = vmatpush2.bf16.msra.mxu0 %v6868_v35  ;;  %2537 = vmatpush2.bf16.msra.mxu1 %v6869_v0  ;;  %v6879_v35 = vld [vmem:[#allocation82_spill] sm:$0xff]  ;;  %v6880_v0 = vld [vmem:[#allocation55_spill] sm:$0xff] }
 0x5b5   :  { %2497 = vmatprep.subr.bf16.mxu0 %v6870_v45  ;;  %2538 = vmatprep.subr.bf16.mxu1 %v6871_v56  ;;  %v6881_v45 = vld [vmem:[#allocation85_spill] sm:$0xff]  ;;  %v6882_v56 = vld [vmem:[#allocation56_spill] sm:$0xff] }
 0x5b8   :  { %2498 = vmatpush2.bf16.msra.mxu0 %v6872_v42  ;;  %2539 = vmatpush2.bf16.msra.mxu1 %v6873_v61  ;;  %v6883_v42 = vld [vmem:[#allocation86_spill] sm:$0xff] }
 0x5b9   :  { %2499 = vmatprep.subr.bf16.mxu0 %v6874_v30  ;;  %2540 = vmatprep.subr.bf16.mxu1 %v6875_v2  ;;  %v2388_v30 = vld [vmem:[#allocation2 + $0x40] sm:$0x3] }
 0x5bc   :  { %2500 = vmatpush2.bf16.msra.mxu0 %v6876_v13  ;;  %2541 = vmatpush2.bf16.msra.mxu1 %v6877_v60  ;;  %v2389_v13 = vld [vmem:[#allocation2 + $0x20] sm:$0x3] }
 0x5bd   :  { %2501 = vmatprep.subr.bf16.mxu0 %v6878_v22  ;;  %2542 = vmatprep.subr.bf16.mxu1 %v6879_v35 }
 0x5c0   :  { %2502 = vmatpush2.bf16.msra.mxu0 %v6880_v0  ;;  %2543 = vmatpush2.bf16.msra.mxu1 %v6881_v45  ;;  %v2390_v45 = vld [vmem:[#allocation2 + $0x10] sm:$0x3] }
 0x5c1   :  { %2553 = vmatprep.subr.bf16.mxu0 %v6882_v56  ;;  %2594 = vmatprep.subr.bf16.mxu1 %v6883_v42  ;;  %v2391_v42 = vld [vmem:[#allocation2 + $0x38] sm:$0x3] }
 0x603   :  { %v2258_v61 = vpop.f32.mrf.mxu0  ;;  %v2299_v62 = vpop.f32.mrf.mxu1 }
 0x604   :  { %v2392_v2 = vadd.f32 %v2388_v30, %v2258_v61  ;;  %v2394_v56 = vadd.f32 %v2390_v45, %v2299_v62 }
 0x605   :  { %v2260_v16 = vpop.f32.mrf.mxu0  ;;  %v2301_v47 = vpop.f32.mrf.mxu1 }
 0x606   :  { %v3626_v60 = vmul.f32 -1.442695, %v2392_v2  ;;  %v2393_v15 = vadd.f32 %v2389_v13, %v2260_v16  ;;  %v3628_v33 = vmul.f32 -1.442695, %v2394_v56  ;;  %v2395_v12 = vadd.f32 %v2391_v42, %v2301_v47 }
 0x607   :  { %v2262_v22 = vpop.f32.mrf.mxu0  ;;  %v2303_v51 = vpop.f32.mrf.mxu1 }
 0x608   :  { %3830 = vpow2.f32 %v3626_v60  ;;  %v3627_v35 = vmul.f32 -1.442695, %v2393_v15 }
 0x609   :  { %v2263_v0 = vpop.f32.mrf.mxu0  ;;  %v2304_v8 = vpop.f32.mrf.mxu1 }
 0x60a   :  { %3832 = vpow2.f32 %v3627_v35  ;;  %v6884_v8 = vld [vmem:[#allocation60_spill] sm:$0xff] }
 0x60b   :  { %3834 = vpow2.f32 %v3628_v33 }
 0x615   :  { %v3831_v53 = vpop.eup %3830 }
 0x616   :  { %v2425_v3 = vadd.f32 1.0, %v3831_v53 }
 0x617   :  { %v3833_v61 = vpop.eup %3832 }
 0x618   :  { %3836 = vrcp.f32 %v2425_v3  ;;  %v2426_v30 = vadd.f32 1.0, %v3833_v61  ;;  %v3835_v16 = vpop.eup %3834  ;;  %v2396_v3 = vld [vmem:[#allocation2 + $0x50] sm:$0xc0] }
 0x619   :  { %3838 = vtanh.f32 %v2395_v12  ;;  %v2427_v13 = vadd.f32 1.0, %v3835_v16  ;;  %v2397_v12 = vld [vmem:[#allocation2 + $0x68] sm:$0xc0]  ;;  %v2404_v56 = vrot.slane %v2396_v3, 6 }
 0x61a   :  { %3840 = vrcp.f32 %v2426_v30  ;;  %v2405_v45 = vrot.slane %v2397_v12, 6 }
 0x61b   :  { %3842 = vrcp.f32 %v2427_v13 }
 0x625   :  { %v3837_v51 = vpop.eup %3836 }
 0x626   :  { %v3839_v2 = vpop.eup %3838 }
 0x627   :  { %v3841_v15 = vpop.eup %3840  ;;  %v2436_v22 = vmul.f32 %v3839_v2, %v3837_v51 }
 0x628   :  { %v2435_v60 = vmul.f32 %v3841_v15, %v6884_v8  ;;  %v3843_v53 = vpop.eup %3842 }
 0x62a   :  { %v5600_v62 = vadd.f32 %v2436_v22, %v2435_v60  ;;  %v2398_v22 = vld [vmem:[#allocation2 + $0x8] sm:$0xc0] }
 0x62c   :  { %6885 = vst [vmem:[#allocation90_spill] sm:$0xff] %v5600_v62  ;;  %3844 = vtanh.f32 %v5600_v62  ;;  %v2399_v62 = vld [vmem:[#allocation2 + $0x48] sm:$0xc0] }
 0x62d   :  { %v2407_v7 = vrot.slane %v2399_v62, 6 }
 0x639   :  { %v3845_v47 = vpop.eup %3844 }
 0x63a   :  { %v2439_v33 = vmul.f32 %v3845_v47, %v3843_v53  ;;  %v2406_v53 = vrot.slane %v2398_v22, 6  ;;  %v6888_v22 = vld [vmem:[#allocation100_spill] sm:$0xff] }
 0x63c   :  { %2464 = vst [vmem:[#allocation3 + $0x10] sm:$0x3] %v2439_v33 }
 0x643   :  { %v2340_v42 = vpop.f32.mrf.mxu0  ;;  %v2381_v35 = vpop.f32.mrf.mxu1 }
 0x644   :  { %v2412_v0 = vadd.f32 %v2404_v56, %v2340_v42  ;;  %v2414_v47 = vadd.f32 %v2406_v53, %v2381_v35  ;;  %v6889_v53 = vld [vmem:[#allocation125_spill] sm:$0xff] }
 0x645   :  { %v2342_v61 = vpop.f32.mrf.mxu0  ;;  %v2383_v30 = vpop.f32.mrf.mxu1 }
 0x646   :  { %v3629_v16 = vmul.f32 -1.442695, %v2412_v0  ;;  %v2413_v51 = vadd.f32 %v2405_v45, %v2342_v61  ;;  %v3631_v3 = vmul.f32 -1.442695, %v2414_v47  ;;  %v2415_v56 = vadd.f32 %v2407_v7, %v2383_v30  ;;  %v6890_v47 = vld [vmem:[#allocation103_spill] sm:$0xff] }
 0x647   :  { %v2344_v2 = vpop.f32.mrf.mxu0  ;;  %v2385_v15 = vpop.f32.mrf.mxu1 }
 0x648   :  { %3846 = vpow2.f32 %v3629_v16  ;;  %v3630_v13 = vmul.f32 -1.442695, %v2413_v51 }
 0x649   :  { %v2345_v8 = vpop.f32.mrf.mxu0  ;;  %v2386_v60 = vpop.f32.mrf.mxu1 }
 0x64a   :  { %3848 = vpow2.f32 %v3630_v13  ;;  %v5607_v60 = vpack.c.bf16 %v2439_v33, %v2439_v33  ;;  %v6887_v33 = vld [vmem:[#allocation124_spill] sm:$0xff] }
 0x64b   :  { %3850 = vpow2.f32 %v3631_v3  ;;  %v6891_v3 = vld [vmem:[#allocation126_spill] sm:$0xff] }
 0x655   :  { %v3847_v59 = vpop.eup %3846 }
 0x656   :  { %v2449_v12 = vadd.f32 1.0, %v3847_v59 }
 0x657   :  { %v3849_v42 = vpop.eup %3848 }
 0x658   :  { %3852 = vrcp.f32 %v2449_v12  ;;  %v2450_v0 = vadd.f32 1.0, %v3849_v42  ;;  %v3851_v45 = vpop.eup %3850  ;;  %v6893_v12 = vld [vmem:[#allocation127_spill] sm:$0xff] }
 0x659   :  { %3854 = vtanh.f32 %v2415_v56  ;;  %v2451_v2 = vadd.f32 1.0, %v3851_v45  ;;  %v6892_v56 = vld [vmem:[#allocation104_spill] sm:$0xff]  ;;  %v6894_v42 = vld [vmem:[#allocation107_spill] sm:$0xff] }
 0x65a   :  { %3856 = vrcp.f32 %v2450_v0  ;;  %v6895_v0 = vld [vmem:[#allocation128_spill] sm:$0xff] }
 0x65b   :  { %3858 = vrcp.f32 %v2451_v2  ;;  %v6896_v45 = vld [vmem:[#allocation108_spill] sm:$0xff] }
 0x65c   :  { %v6900_v2 = vld [vmem:[#allocation112_spill] sm:$0xff] }
 0x665   :  { %v3853_v61 = vpop.eup %3852 }
 0x666   :  { %v3855_v16 = vpop.eup %3854 }
 0x667   :  { %v3857_v51 = vpop.eup %3856  ;;  %v2460_v35 = vmul.f32 %v3855_v16, %v3853_v61  ;;  %v6897_v61 = vld [vmem:[#allocation129_spill] sm:$0xff]  ;;  %v6898_v16 = vld [vmem:[#allocation111_spill] sm:$0xff] }
 0x668   :  { %v2459_v15 = vmul.f32 %v3857_v51, %v5462_v10  ;;  %v3859_v59 = vpop.eup %3858  ;;  %v6886_v10 = vld [vmem:[#allocation99_spill] sm:$0xff]  ;;  %v6899_v51 = vld [vmem:[#allocation130_spill] sm:$0xff] }
 0x66a   :  { %v5604_v13 = vadd.f32 %v2460_v35, %v2459_v15  ;;  %v6901_v15 = vld [vmem:[#allocation131_spill] sm:$0xff] }
 0x66b   :  { %v6902_v35 = vld [vmem:[#allocation115_spill] sm:$0xff] }
 0x66c   :  { %3860 = vtanh.f32 %v5604_v13 }
 0x679   :  { %v3861_v7 = vpop.eup %3860 }
 0x67a   :  { %v2463_v62 = vmul.f32 %v3861_v7, %v3859_v59  ;;  %v6903_v59 = vld [vmem:[#allocation132_spill] sm:$0xff] }
 0x67b   :  { %v6904_v7 = vld [vmem:[#allocation116_spill] sm:$0xff] }
 0x67c   :  { %v2466_v30 = vrot.slane %v2463_v62, 2  ;;  %v2470_v8 = vpack.c.bf16 %v2463_v62, %v2463_v62  ;;  %v6905_v62 = vld [vmem:[#allocation133_spill] sm:$0xff] }
 0x67e   :  { %2468 = vst [vmem:[#allocation3 + $0x8] sm:$0xc0] %v2466_v30  ;;  %2503 = vmatprep.mubr.bf16.mxu0 %v2470_v8  ;;  %2544 = vmatprep.mubr.bf16.mxu1 %v2470_v8  ;;  %v6906_v30 = vld [vmem:[#allocation119_spill] sm:$0xff] }
 0x67f   :  { %2504 = vmatmul.mubr.bf16.vlgmr.msra.gmra.mxu0 %v5607_v60  ;;  %2545 = vmatmul.mubr.bf16.vlgmr.msra.gmra.mxu1 %v5607_v60 }
 0x680   :  { %2554 = vmatpush1.bf16.msra.mxu0 %v6528_v27  ;;  %2595 = vmatpush1.bf16.msra.mxu1 %v6529_v21 }
 0x681   :  { %2585 = vmatprep.mubr.bf16.mxu0 %v2470_v8  ;;  %2626 = vmatprep.mubr.bf16.mxu1 %v2470_v8  ;;  %v6907_v8 = vld [vmem:[#allocation134_spill] sm:$0xff] }
 0x682   :  { %2555 = vmatprep.subr.bf16.mxu0 %v6530_v29  ;;  %2596 = vmatprep.subr.bf16.mxu1 %v6531_v38 }
 0x684   :  { %2556 = vmatpush1.bf16.msra.mxu0 %v6532_v48  ;;  %2597 = vmatpush1.bf16.msra.mxu1 %v6533_v4 }
 0x685   :  { %2557 = vmatprep.subr.bf16.mxu0 %v6534_v28  ;;  %2598 = vmatprep.subr.bf16.mxu1 %v6535_v1 }
 0x688   :  { %2558 = vmatpush1.bf16.msra.mxu0 %v6536_v57  ;;  %2599 = vmatpush1.bf16.msra.mxu1 %v6537_v19 }
 0x689   :  { %2559 = vmatprep.subr.bf16.mxu0 %v6617_v26  ;;  %2600 = vmatprep.subr.bf16.mxu1 %v6618_v20 }
 0x68c   :  { %2560 = vmatpush1.bf16.msra.mxu0 %v6619_v39  ;;  %2601 = vmatpush1.bf16.msra.mxu1 %v6620_v14 }
 0x68d   :  { %2561 = vmatprep.subr.bf16.mxu0 %v6542_v34  ;;  %2602 = vmatprep.subr.bf16.mxu1 %v6621_v40 }
 0x690   :  { %2562 = vmatpush1.bf16.msra.mxu0 %v6544_v9  ;;  %2603 = vmatpush1.bf16.msra.mxu1 %v6622_v49 }
 0x691   :  { %2563 = vmatprep.subr.bf16.mxu0 %v6546_v54  ;;  %2604 = vmatprep.subr.bf16.mxu1 %v6623_v37 }
 0x694   :  { %2564 = vmatpush1.bf16.msra.mxu0 %v6548_v17  ;;  %2605 = vmatpush1.bf16.msra.mxu1 %v6624_v32 }
 0x695   :  { %2565 = vmatprep.subr.bf16.mxu0 %v6550_v11  ;;  %2606 = vmatprep.subr.bf16.mxu1 %v6625_v58 }
 0x698   :  { %2566 = vmatpush1.bf16.msra.mxu0 %v6552_v41  ;;  %2607 = vmatpush1.bf16.msra.mxu1 %v6626_v44 }
 0x699   :  { %2567 = vmatprep.subr.bf16.mxu0 %v6553_v24  ;;  %2608 = vmatprep.subr.bf16.mxu1 %v6627_v55 }
 0x69c   :  { %2568 = vmatpush1.bf16.msra.mxu0 %v6554_v18  ;;  %2609 = vmatpush1.bf16.msra.mxu1 %v6628_v5 }
 0x69d   :  { %2569 = vmatprep.subr.bf16.mxu0 %v6555_v50  ;;  %2610 = vmatprep.subr.bf16.mxu1 %v6629_v63 }
 0x6a0   :  { %2570 = vmatpush2.bf16.msra.mxu0 %v6556_v46  ;;  %2611 = vmatpush2.bf16.msra.mxu1 %v6630_v36 }
 0x6a1   :  { %2571 = vmatprep.subr.bf16.mxu0 %v6557_v31  ;;  %2612 = vmatprep.subr.bf16.mxu1 %v6631_v23 }
 0x6a4   :  { %2572 = vmatpush2.bf16.msra.mxu0 %v6558_v6  ;;  %2613 = vmatpush2.bf16.msra.mxu1 %v6632_v43 }
 0x6a5   :  { %2573 = vmatprep.subr.bf16.mxu0 %v6559_v25  ;;  %2614 = vmatprep.subr.bf16.mxu1 %v6633_v52 }
 0x6a8   :  { %2574 = vmatpush2.bf16.msra.mxu0 %v6886_v10  ;;  %2615 = vmatpush2.bf16.msra.mxu1 %v6887_v33 }
 0x6a9   :  { %2575 = vmatprep.subr.bf16.mxu0 %v6888_v22  ;;  %2616 = vmatprep.subr.bf16.mxu1 %v6889_v53  ;;  %v2638_v53 = vld [vmem:[#allocation2 + $0x38] sm:$0xc] }
 0x6aa   :  { %v2646_v22 = vrot.slane %v2638_v53, 2 }
 0x6ac   :  { %2576 = vmatpush2.bf16.msra.mxu0 %v6890_v47  ;;  %2617 = vmatpush2.bf16.msra.mxu1 %v6891_v3 }
 0x6ad   :  { %2577 = vmatprep.subr.bf16.mxu0 %v6892_v56  ;;  %2618 = vmatprep.subr.bf16.mxu1 %v6893_v12 }
 0x6b0   :  { %2578 = vmatpush2.bf16.msra.mxu0 %v6894_v42  ;;  %2619 = vmatpush2.bf16.msra.mxu1 %v6895_v0 }
 0x6b1   :  { %2579 = vmatprep.subr.bf16.mxu0 %v6896_v45  ;;  %2620 = vmatprep.subr.bf16.mxu1 %v6897_v61  ;;  %v6908_v61 = vld [vmem:[#allocation7_spill] sm:$0xff] }
 0x6b4   :  { %2580 = vmatpush2.bf16.msra.mxu0 %v6898_v16  ;;  %2621 = vmatpush2.bf16.msra.mxu1 %v6899_v51  ;;  %v6909_v16 = vld [vmem:[#allocation23_spill] sm:$0xff] }
 0x6b5   :  { %2581 = vmatprep.subr.bf16.mxu0 %v6900_v2  ;;  %2622 = vmatprep.subr.bf16.mxu1 %v6901_v15  ;;  %v6910_v15 = vld [vmem:[#allocation8_spill] sm:$0xff]  ;;  %v6919_v2 = vld [vmem:[#allocation33_spill] sm:$0xff] }
 0x6b8   :  { %2582 = vmatpush2.bf16.msra.mxu0 %v6902_v35  ;;  %2623 = vmatpush2.bf16.msra.mxu1 %v6903_v59  ;;  %v6911_v35 = vld [vmem:[#allocation24_spill] sm:$0xff]  ;;  %v6912_v59 = vld [vmem:[#allocation9_spill] sm:$0xff] }
 0x6b9   :  { %2583 = vmatprep.subr.bf16.mxu0 %v6904_v7  ;;  %2624 = vmatprep.subr.bf16.mxu1 %v6905_v62  ;;  %v6913_v7 = vld [vmem:[#allocation26_spill] sm:$0xff] }
 0x6ba   :  { %v6914_v62 = vld [vmem:[#allocation10_spill] sm:$0xff] }
 0x6bc   :  { %2584 = vmatpush2.bf16.msra.mxu0 %v6906_v30  ;;  %2625 = vmatpush2.bf16.msra.mxu1 %v6907_v8  ;;  %v6915_v30 = vld [vmem:[#allocation29_spill] sm:$0xff]  ;;  %v6916_v8 = vld [vmem:[#allocation11_spill] sm:$0xff] }
 0x6bd   :  { %2733 = vmatprep.subr.bf16.mxu0 %v6908_v61  ;;  %2774 = vmatprep.subr.bf16.mxu1 %v6909_v16  ;;  %v6917_v61 = vld [vmem:[#allocation30_spill] sm:$0xff]  ;;  %v6918_v16 = vld [vmem:[#allocation12_spill] sm:$0xff] }
 0x6bf   :  { %2586 = vmatmul.mubr.bf16.vlgmr.msra.gmra.mxu0 %v5607_v60  ;;  %2627 = vmatmul.mubr.bf16.vlgmr.msra.gmra.mxu1 %v5607_v60  ;;  %v6920_v60 = vld [vmem:[#allocation13_spill] sm:$0xff] }
 0x6c0   :  { %2734 = vmatpush1.bf16.msra.mxu0 %v6910_v15  ;;  %2775 = vmatpush1.bf16.msra.mxu1 %v6911_v35  ;;  %v6921_v15 = vld [vmem:[#allocation34_spill] sm:$0xff] }
 0x6c1   :  { %2735 = vmatprep.subr.bf16.mxu0 %v6912_v59  ;;  %2776 = vmatprep.subr.bf16.mxu1 %v6913_v7  ;;  %v6922_v35 = vld [vmem:[#allocation14_spill] sm:$0xff]  ;;  %v6923_v59 = vld [vmem:[#allocation37_spill] sm:$0xff]  ;;  %v6924_v7 = vld [vmem:[#allocation15_spill] sm:$0xff] }
 0x6c4   :  { %2736 = vmatpush1.bf16.msra.mxu0 %v6914_v62  ;;  %2777 = vmatpush1.bf16.msra.mxu1 %v6915_v30  ;;  %v6925_v62 = vld [vmem:[#allocation38_spill] sm:$0xff]  ;;  %v6926_v30 = vld [vmem:[#allocation16_spill] sm:$0xff] }
 0x6c5   :  { %2737 = vmatprep.subr.bf16.mxu0 %v6916_v8  ;;  %2778 = vmatprep.subr.bf16.mxu1 %v6917_v61  ;;  %v6927_v8 = vld [vmem:[#allocation41_spill] sm:$0xff] }
 0x6c6   :  { %v6928_v61 = vld [vmem:[#allocation17_spill] sm:$0xff] }
 0x6c8   :  { %2738 = vmatpush1.bf16.msra.mxu0 %v6918_v16  ;;  %2779 = vmatpush1.bf16.msra.mxu1 %v6919_v2  ;;  %v6929_v16 = vld [vmem:[#allocation42_spill] sm:$0xff] }
 0x6c9   :  { %2739 = vmatprep.subr.bf16.mxu0 %v6920_v60  ;;  %2780 = vmatprep.subr.bf16.mxu1 %v6921_v15  ;;  %v6930_v2 = vld [vmem:[#allocation18_spill] sm:$0xff]  ;;  %v6931_v60 = vld [vmem:[#allocation45_spill] sm:$0xff]  ;;  %v6932_v15 = vld [vmem:[#allocation19_spill] sm:$0xff] }
 0x6cc   :  { %2740 = vmatpush1.bf16.msra.mxu0 %v6922_v35  ;;  %2781 = vmatpush1.bf16.msra.mxu1 %v6923_v59  ;;  %v6933_v35 = vld [vmem:[#allocation46_spill] sm:$0xff]  ;;  %v6934_v59 = vld [vmem:[#allocation20_spill] sm:$0xff] }
 0x6cd   :  { %2741 = vmatprep.subr.bf16.mxu0 %v6924_v7  ;;  %2782 = vmatprep.subr.bf16.mxu1 %v6925_v62  ;;  %v6935_v7 = vld [vmem:[#allocation49_spill] sm:$0xff] }
 0x6ce   :  { %v6936_v62 = vld [vmem:[#allocation21_spill] sm:$0xff] }
 0x6d0   :  { %2742 = vmatpush1.bf16.msra.mxu0 %v6926_v30  ;;  %2783 = vmatpush1.bf16.msra.mxu1 %v6927_v8  ;;  %v6937_v30 = vld [vmem:[#allocation50_spill] sm:$0xff] }
 0x6d1   :  { %2743 = vmatprep.subr.bf16.mxu0 %v6928_v61  ;;  %2784 = vmatprep.subr.bf16.mxu1 %v6929_v16  ;;  %v6938_v8 = vld [vmem:[#allocation22_spill] sm:$0xff]  ;;  %v6939_v61 = vld [vmem:[#allocation53_spill] sm:$0xff] }
 0x6d2   :  { %v6940_v16 = vld [vmem:[#allocation25_spill] sm:$0xff] }
 0x6d4   :  { %2744 = vmatpush1.bf16.msra.mxu0 %v6930_v2  ;;  %2785 = vmatpush1.bf16.msra.mxu1 %v6931_v60  ;;  %v6941_v2 = vld [vmem:[#allocation54_spill] sm:$0xff]  ;;  %v6942_v60 = vld [vmem:[#allocation27_spill] sm:$0xff] }
 0x6d5   :  { %2745 = vmatprep.subr.bf16.mxu0 %v6932_v15  ;;  %2786 = vmatprep.subr.bf16.mxu1 %v6933_v35  ;;  %v6943_v15 = vld [vmem:[#allocation57_spill] sm:$0xff]  ;;  %v6944_v35 = vld [vmem:[#allocation28_spill] sm:$0xff] }
 0x6d8   :  { %2746 = vmatpush1.bf16.msra.mxu0 %v6934_v59  ;;  %2787 = vmatpush1.bf16.msra.mxu1 %v6935_v7  ;;  %v6945_v59 = vld [vmem:[#allocation58_spill] sm:$0xff]  ;;  %v6946_v7 = vld [vmem:[#allocation31_spill] sm:$0xff] }
 0x6d9   :  { %2747 = vmatprep.subr.bf16.mxu0 %v6936_v62  ;;  %2788 = vmatprep.subr.bf16.mxu1 %v6937_v30  ;;  %v6947_v62 = vld [vmem:[#allocation61_spill] sm:$0xff]  ;;  %v6948_v30 = vld [vmem:[#allocation32_spill] sm:$0xff] }
 0x6dc   :  { %2748 = vmatpush1.bf16.msra.mxu0 %v6938_v8  ;;  %2789 = vmatpush1.bf16.msra.mxu1 %v6939_v61  ;;  %v6949_v8 = vld [vmem:[#allocation62_spill] sm:$0xff]  ;;  %v6950_v61 = vld [vmem:[#allocation35_spill] sm:$0xff] }
 0x6dd   :  { %2749 = vmatprep.subr.bf16.mxu0 %v6940_v16  ;;  %2790 = vmatprep.subr.bf16.mxu1 %v6941_v2  ;;  %v6951_v16 = vld [vmem:[#allocation65_spill] sm:$0xff]  ;;  %v6952_v2 = vld [vmem:[#allocation36_spill] sm:$0xff] }
 0x6e0   :  { %2750 = vmatpush2.bf16.msra.mxu0 %v6942_v60  ;;  %2791 = vmatpush2.bf16.msra.mxu1 %v6943_v15  ;;  %v6953_v60 = vld [vmem:[#allocation66_spill] sm:$0xff]  ;;  %v6954_v15 = vld [vmem:[#allocation39_spill] sm:$0xff] }
 0x6e1   :  { %2751 = vmatprep.subr.bf16.mxu0 %v6944_v35  ;;  %2792 = vmatprep.subr.bf16.mxu1 %v6945_v59  ;;  %v6955_v35 = vld [vmem:[#allocation69_spill] sm:$0xff]  ;;  %v6956_v59 = vld [vmem:[#allocation40_spill] sm:$0xff] }
 0x6e4   :  { %2752 = vmatpush2.bf16.msra.mxu0 %v6946_v7  ;;  %2793 = vmatpush2.bf16.msra.mxu1 %v6947_v62  ;;  %v6957_v7 = vld [vmem:[#allocation70_spill] sm:$0xff]  ;;  %v6958_v62 = vld [vmem:[#allocation43_spill] sm:$0xff] }
 0x6e5   :  { %2753 = vmatprep.subr.bf16.mxu0 %v6948_v30  ;;  %2794 = vmatprep.subr.bf16.mxu1 %v6949_v8  ;;  %v6959_v30 = vld [vmem:[#allocation73_spill] sm:$0xff]  ;;  %v6960_v8 = vld [vmem:[#allocation44_spill] sm:$0xff] }
 0x6e8   :  { %2754 = vmatpush2.bf16.msra.mxu0 %v6950_v61  ;;  %2795 = vmatpush2.bf16.msra.mxu1 %v6951_v16  ;;  %v6961_v61 = vld [vmem:[#allocation74_spill] sm:$0xff]  ;;  %v6962_v16 = vld [vmem:[#allocation47_spill] sm:$0xff] }
 0x6e9   :  { %2755 = vmatprep.subr.bf16.mxu0 %v6952_v2  ;;  %2796 = vmatprep.subr.bf16.mxu1 %v6953_v60  ;;  %v6963_v2 = vld [vmem:[#allocation77_spill] sm:$0xff]  ;;  %v6964_v60 = vld [vmem:[#allocation48_spill] sm:$0xff] }
 0x6ec   :  { %2756 = vmatpush2.bf16.msra.mxu0 %v6954_v15  ;;  %2797 = vmatpush2.bf16.msra.mxu1 %v6955_v35  ;;  %v6965_v15 = vld [vmem:[#allocation78_spill] sm:$0xff]  ;;  %v6966_v35 = vld [vmem:[#allocation51_spill] sm:$0xff] }
 0x6ed   :  { %2757 = vmatprep.subr.bf16.mxu0 %v6956_v59  ;;  %2798 = vmatprep.subr.bf16.mxu1 %v6957_v7  ;;  %v6967_v59 = vld [vmem:[#allocation81_spill] sm:$0xff]  ;;  %v6968_v7 = vld [vmem:[#allocation52_spill] sm:$0xff] }
 0x6f0   :  { %2758 = vmatpush2.bf16.msra.mxu0 %v6958_v62  ;;  %2799 = vmatpush2.bf16.msra.mxu1 %v6959_v30  ;;  %v6969_v62 = vld [vmem:[#allocation82_spill] sm:$0xff]  ;;  %v6970_v30 = vld [vmem:[#allocation55_spill] sm:$0xff] }
 0x6f1   :  { %2759 = vmatprep.subr.bf16.mxu0 %v6960_v8  ;;  %2800 = vmatprep.subr.bf16.mxu1 %v6961_v61  ;;  %v6971_v8 = vld [vmem:[#allocation85_spill] sm:$0xff]  ;;  %v6972_v61 = vld [vmem:[#allocation56_spill] sm:$0xff] }
 0x6f4   :  { %2760 = vmatpush2.bf16.msra.mxu0 %v6962_v16  ;;  %2801 = vmatpush2.bf16.msra.mxu1 %v6963_v2  ;;  %v6973_v16 = vld [vmem:[#allocation86_spill] sm:$0xff]  ;;  %v2635_v2 = vld [vmem:[#allocation2 + $0x40] sm:$0xc] }
 0x6f5   :  { %2761 = vmatprep.subr.bf16.mxu0 %v6964_v60  ;;  %2802 = vmatprep.subr.bf16.mxu1 %v6965_v15  ;;  %v2636_v60 = vld [vmem:[#allocation2 + $0x20] sm:$0xc]  ;;  %v2643_v51 = vrot.slane %v2635_v2, 2 }
 0x6f6   :  { %v2644_v0 = vrot.slane %v2636_v60, 2 }
 0x6f8   :  { %2762 = vmatpush2.bf16.msra.mxu0 %v6966_v35  ;;  %2803 = vmatpush2.bf16.msra.mxu1 %v6967_v59 }
 0x6f9   :  { %2763 = vmatprep.subr.bf16.mxu0 %v6968_v7  ;;  %2804 = vmatprep.subr.bf16.mxu1 %v6969_v62 }
 0x6fc   :  { %2764 = vmatpush2.bf16.msra.mxu0 %v6970_v30  ;;  %2805 = vmatpush2.bf16.msra.mxu1 %v6971_v8 }
 0x6fd   :  { %2815 = vmatprep.subr.bf16.mxu0 %v6972_v61  ;;  %2856 = vmatprep.subr.bf16.mxu1 %v6973_v16  ;;  %v2637_v61 = vld [vmem:[#allocation2 + $0x10] sm:$0xc] }
 0x6fe   :  { %v2645_v16 = vrot.slane %v2637_v61, 2 }
 0x73f   :  { %v2505_v15 = vpop.f32.mrf.mxu0  ;;  %v2546_v45 = vpop.f32.mrf.mxu1 }
 0x740   :  { %v2651_v35 = vadd.f32 %v2643_v51, %v2505_v15  ;;  %v2653_v47 = vadd.f32 %v2645_v16, %v2546_v45 }
 0x741   :  { %v2507_v59 = vpop.f32.mrf.mxu0  ;;  %v2548_v42 = vpop.f32.mrf.mxu1 }
 0x742   :  { %v3632_v7 = vmul.f32 -1.442695, %v2651_v35  ;;  %v2652_v12 = vadd.f32 %v2644_v0, %v2507_v59  ;;  %v3634_v2 = vmul.f32 -1.442695, %v2653_v47  ;;  %v2654_v51 = vadd.f32 %v2646_v22, %v2548_v42  ;;  %v2655_v42 = vld [vmem:[#allocation2 + $0x50] sm:$0x30] }
 0x743   :  { %v2509_v62 = vpop.f32.mrf.mxu0  ;;  %v2550_v56 = vpop.f32.mrf.mxu1 }
 0x744   :  { %3862 = vpow2.f32 %v3632_v7  ;;  %v3633_v30 = vmul.f32 -1.442695, %v2652_v12  ;;  %v6974_v7 = vld [vmem:[#allocation90_spill] sm:$0xff]  ;;  %v2656_v62 = vld [vmem:[#allocation2 + $0x68] sm:$0x30] }
 0x745   :  { %v2510_v8 = vpop.f32.mrf.mxu0  ;;  %v2551_v3 = vpop.f32.mrf.mxu1 }
 0x746   :  { %3864 = vpow2.f32 %v3633_v30  ;;  %v2663_v30 = vrot.slane %v2655_v42, 4 }
 0x747   :  { %3866 = vpow2.f32 %v3634_v2 }
 0x751   :  { %v3863_v33 = vpop.eup %3862 }
 0x752   :  { %v2684_v15 = vadd.f32 1.0, %v3863_v33 }
 0x753   :  { %v3865_v60 = vpop.eup %3864 }
 0x754   :  { %3868 = vrcp.f32 %v2684_v15  ;;  %v2685_v0 = vadd.f32 1.0, %v3865_v60  ;;  %v3867_v56 = vpop.eup %3866  ;;  %v2664_v15 = vrot.slane %v2656_v62, 4 }
 0x755   :  { %3870 = vtanh.f32 %v2654_v51  ;;  %v2686_v59 = vadd.f32 1.0, %v3867_v56 }
 0x756   :  { %3872 = vrcp.f32 %v2685_v0 }
 0x757   :  { %3874 = vrcp.f32 %v2686_v59 }
 0x761   :  { %v3869_v12 = vpop.eup %3868 }
 0x762   :  { %v3871_v35 = vpop.eup %3870 }
 0x763   :  { %v3873_v3 = vpop.eup %3872  ;;  %v2695_v45 = vmul.f32 %v3871_v35, %v3869_v12 }
 0x764   :  { %v2694_v61 = vmul.f32 %v3873_v3, %v6974_v7  ;;  %v3875_v33 = vpop.eup %3874 }
 0x766   :  { %v5742_v16 = vadd.f32 %v2695_v45, %v2694_v61  ;;  %v2657_v45 = vld [vmem:[#allocation2 + $0x8] sm:$0x30] }
 0x768   :  { %6975 = vst [vmem:[#allocation63_spill] sm:$0xff] %v5742_v16  ;;  %3876 = vtanh.f32 %v5742_v16 }
 0x775   :  { %v3877_v22 = vpop.eup %3876 }
 0x776   :  { %v2698_v53 = vmul.f32 %v3877_v22, %v3875_v33  ;;  %v2665_v33 = vrot.slane %v2657_v45, 4 }
 0x778   :  { %v2724_v47 = vrot.slane %v2698_v53, 6  ;;  %v5749_v45 = vpack.c.bf16 %v2698_v53, %v2698_v53  ;;  %v6977_v53 = vld [vmem:[#allocation124_spill] sm:$0xff] }
 0x77a   :  { %2726 = vst [vmem:[#allocation3 + $0x10] sm:$0xc] %v2724_v47  ;;  %v2658_v47 = vld [vmem:[#allocation2 + $0x48] sm:$0x30] }
 0x77b   :  { %v2666_v16 = vrot.slane %v2658_v47, 4  ;;  %v6980_v47 = vld [vmem:[#allocation103_spill] sm:$0xff] }
 0x77f   :  { %v2587_v8 = vpop.f32.mrf.mxu0  ;;  %v2628_v2 = vpop.f32.mrf.mxu1 }
 0x780   :  { %v2671_v51 = vadd.f32 %v2663_v30, %v2587_v8  ;;  %v2673_v22 = vadd.f32 %v2665_v33, %v2628_v2  ;;  %v6978_v33 = vld [vmem:[#allocation100_spill] sm:$0xff] }
 0x781   :  { %v2589_v60 = vpop.f32.mrf.mxu0  ;;  %v2630_v0 = vpop.f32.mrf.mxu1 }
 0x782   :  { %v3635_v56 = vmul.f32 -1.442695, %v2671_v51  ;;  %v2672_v12 = vadd.f32 %v2664_v15, %v2589_v60  ;;  %v3637_v42 = vmul.f32 -1.442695, %v2673_v22  ;;  %v2674_v30 = vadd.f32 %v2666_v16, %v2630_v0  ;;  %v6979_v22 = vld [vmem:[#allocation125_spill] sm:$0xff] }
 0x783   :  { %v2591_v35 = vpop.f32.mrf.mxu0  ;;  %v2632_v3 = vpop.f32.mrf.mxu1 }
 0x784   :  { %3878 = vpow2.f32 %v3635_v56  ;;  %v3636_v59 = vmul.f32 -1.442695, %v2672_v12 }
 0x785   :  { %v2592_v7 = vpop.f32.mrf.mxu0  ;;  %v2633_v61 = vpop.f32.mrf.mxu1 }
 0x786   :  { %3880 = vpow2.f32 %v3636_v59 }
 0x787   :  { %3882 = vpow2.f32 %v3637_v42  ;;  %v6981_v42 = vld [vmem:[#allocation126_spill] sm:$0xff] }
 0x791   :  { %v3879_v10 = vpop.eup %3878 }
 0x792   :  { %v2708_v62 = vadd.f32 1.0, %v3879_v10 }
 0x793   :  { %v3881_v8 = vpop.eup %3880 }
 0x794   :  { %3884 = vrcp.f32 %v2708_v62  ;;  %v2709_v51 = vadd.f32 1.0, %v3881_v8  ;;  %v3883_v15 = vpop.eup %3882  ;;  %v6983_v62 = vld [vmem:[#allocation127_spill] sm:$0xff] }
 0x795   :  { %3886 = vtanh.f32 %v2674_v30  ;;  %v2710_v35 = vadd.f32 1.0, %v3883_v15  ;;  %v6982_v30 = vld [vmem:[#allocation104_spill] sm:$0xff]  ;;  %v6984_v8 = vld [vmem:[#allocation107_spill] sm:$0xff] }
 0x796   :  { %3888 = vrcp.f32 %v2709_v51  ;;  %v6985_v51 = vld [vmem:[#allocation128_spill] sm:$0xff] }
 0x797   :  { %3890 = vrcp.f32 %v2710_v35  ;;  %v6986_v15 = vld [vmem:[#allocation108_spill] sm:$0xff] }
 0x798   :  { %v6990_v35 = vld [vmem:[#allocation112_spill] sm:$0xff] }
 0x7a1   :  { %v3885_v60 = vpop.eup %3884 }
 0x7a2   :  { %v3887_v56 = vpop.eup %3886 }
 0x7a3   :  { %v3889_v12 = vpop.eup %3888  ;;  %v2719_v2 = vmul.f32 %v3887_v56, %v3885_v60  ;;  %v6987_v60 = vld [vmem:[#allocation129_spill] sm:$0xff]  ;;  %v6988_v56 = vld [vmem:[#allocation111_spill] sm:$0xff] }
 0x7a4   :  { %v2718_v3 = vmul.f32 %v3889_v12, %v5604_v13  ;;  %v3891_v10 = vpop.eup %3890  ;;  %v6976_v13 = vld [vmem:[#allocation99_spill] sm:$0xff]  ;;  %v6989_v12 = vld [vmem:[#allocation130_spill] sm:$0xff] }
 0x7a6   :  { %v5746_v59 = vadd.f32 %v2719_v2, %v2718_v3  ;;  %v6991_v3 = vld [vmem:[#allocation131_spill] sm:$0xff] }
 0x7a7   :  { %v6992_v2 = vld [vmem:[#allocation115_spill] sm:$0xff] }
 0x7a8   :  { %3892 = vtanh.f32 %v5746_v59 }
 0x7b5   :  { %v3893_v16 = vpop.eup %3892 }
 0x7b6   :  { %v2722_v0 = vmul.f32 %v3893_v16, %v3891_v10  ;;  %v6993_v10 = vld [vmem:[#allocation132_spill] sm:$0xff] }
 0x7b7   :  { %v6994_v16 = vld [vmem:[#allocation116_spill] sm:$0xff] }
 0x7b8   :  { %v2728_v7 = vrot.slane %v2722_v0, 4  ;;  %v2732_v61 = vpack.c.bf16 %v2722_v0, %v2722_v0  ;;  %v6995_v0 = vld [vmem:[#allocation133_spill] sm:$0xff] }
 0x7ba   :  { %2730 = vst [vmem:[#allocation3 + $0x8] sm:$0x30] %v2728_v7  ;;  %2765 = vmatprep.mubr.bf16.mxu0 %v2732_v61  ;;  %2806 = vmatprep.mubr.bf16.mxu1 %v2732_v61  ;;  %v6996_v7 = vld [vmem:[#allocation119_spill] sm:$0xff] }
 0x7bb   :  { %2766 = vmatmul.mubr.bf16.vlgmr.msra.gmra.mxu0 %v5749_v45  ;;  %2807 = vmatmul.mubr.bf16.vlgmr.msra.gmra.mxu1 %v5749_v45 }
 0x7bc   :  { %2816 = vmatpush1.bf16.msra.mxu0 %v6528_v27  ;;  %2857 = vmatpush1.bf16.msra.mxu1 %v6529_v21 }
 0x7bd   :  { %2847 = vmatprep.mubr.bf16.mxu0 %v2732_v61  ;;  %2888 = vmatprep.mubr.bf16.mxu1 %v2732_v61  ;;  %v6997_v61 = vld [vmem:[#allocation134_spill] sm:$0xff] }
 0x7be   :  { %2817 = vmatprep.subr.bf16.mxu0 %v6530_v29  ;;  %2858 = vmatprep.subr.bf16.mxu1 %v6531_v38 }
 0x7c0   :  { %2818 = vmatpush1.bf16.msra.mxu0 %v6532_v48  ;;  %2859 = vmatpush1.bf16.msra.mxu1 %v6533_v4 }
 0x7c1   :  { %2819 = vmatprep.subr.bf16.mxu0 %v6534_v28  ;;  %2860 = vmatprep.subr.bf16.mxu1 %v6535_v1 }
 0x7c4   :  { %2820 = vmatpush1.bf16.msra.mxu0 %v6536_v57  ;;  %2861 = vmatpush1.bf16.msra.mxu1 %v6537_v19 }
 0x7c5   :  { %2821 = vmatprep.subr.bf16.mxu0 %v6617_v26  ;;  %2862 = vmatprep.subr.bf16.mxu1 %v6618_v20 }
 0x7c8   :  { %2822 = vmatpush1.bf16.msra.mxu0 %v6619_v39  ;;  %2863 = vmatpush1.bf16.msra.mxu1 %v6620_v14 }
 0x7c9   :  { %2823 = vmatprep.subr.bf16.mxu0 %v6542_v34  ;;  %2864 = vmatprep.subr.bf16.mxu1 %v6621_v40 }
 0x7cc   :  { %2824 = vmatpush1.bf16.msra.mxu0 %v6544_v9  ;;  %2865 = vmatpush1.bf16.msra.mxu1 %v6622_v49 }
 0x7cd   :  { %2825 = vmatprep.subr.bf16.mxu0 %v6546_v54  ;;  %2866 = vmatprep.subr.bf16.mxu1 %v6623_v37 }
 0x7d0   :  { %2826 = vmatpush1.bf16.msra.mxu0 %v6548_v17  ;;  %2867 = vmatpush1.bf16.msra.mxu1 %v6624_v32 }
 0x7d1   :  { %2827 = vmatprep.subr.bf16.mxu0 %v6550_v11  ;;  %2868 = vmatprep.subr.bf16.mxu1 %v6625_v58 }
 0x7d4   :  { %2828 = vmatpush1.bf16.msra.mxu0 %v6552_v41  ;;  %2869 = vmatpush1.bf16.msra.mxu1 %v6626_v44 }
 0x7d5   :  { %2829 = vmatprep.subr.bf16.mxu0 %v6553_v24  ;;  %2870 = vmatprep.subr.bf16.mxu1 %v6627_v55 }
 0x7d8   :  { %2830 = vmatpush1.bf16.msra.mxu0 %v6554_v18  ;;  %2871 = vmatpush1.bf16.msra.mxu1 %v6628_v5 }
 0x7d9   :  { %2831 = vmatprep.subr.bf16.mxu0 %v6555_v50  ;;  %2872 = vmatprep.subr.bf16.mxu1 %v6629_v63 }
 0x7dc   :  { %2832 = vmatpush2.bf16.msra.mxu0 %v6556_v46  ;;  %2873 = vmatpush2.bf16.msra.mxu1 %v6630_v36 }
 0x7dd   :  { %2833 = vmatprep.subr.bf16.mxu0 %v6557_v31  ;;  %2874 = vmatprep.subr.bf16.mxu1 %v6631_v23 }
 0x7e0   :  { %2834 = vmatpush2.bf16.msra.mxu0 %v6558_v6  ;;  %2875 = vmatpush2.bf16.msra.mxu1 %v6632_v43 }
 0x7e1   :  { %2835 = vmatprep.subr.bf16.mxu0 %v6559_v25  ;;  %2876 = vmatprep.subr.bf16.mxu1 %v6633_v52 }
 0x7e4   :  { %2836 = vmatpush2.bf16.msra.mxu0 %v6976_v13  ;;  %2877 = vmatpush2.bf16.msra.mxu1 %v6977_v53 }
 0x7e5   :  { %2837 = vmatprep.subr.bf16.mxu0 %v6978_v33  ;;  %2878 = vmatprep.subr.bf16.mxu1 %v6979_v22  ;;  %v2900_v22 = vld [vmem:[#allocation2 + $0x38] sm:$0x30] }
 0x7e6   :  { %v2908_v33 = vrot.slane %v2900_v22, 4 }
 0x7e8   :  { %2838 = vmatpush2.bf16.msra.mxu0 %v6980_v47  ;;  %2879 = vmatpush2.bf16.msra.mxu1 %v6981_v42 }
 0x7e9   :  { %2839 = vmatprep.subr.bf16.mxu0 %v6982_v30  ;;  %2880 = vmatprep.subr.bf16.mxu1 %v6983_v62 }
 0x7ec   :  { %2840 = vmatpush2.bf16.msra.mxu0 %v6984_v8  ;;  %2881 = vmatpush2.bf16.msra.mxu1 %v6985_v51 }
 0x7ed   :  { %2841 = vmatprep.subr.bf16.mxu0 %v6986_v15  ;;  %2882 = vmatprep.subr.bf16.mxu1 %v6987_v60  ;;  %v6998_v60 = vld [vmem:[#allocation7_spill] sm:$0xff] }
 0x7f0   :  { %2842 = vmatpush2.bf16.msra.mxu0 %v6988_v56  ;;  %2883 = vmatpush2.bf16.msra.mxu1 %v6989_v12  ;;  %v6999_v56 = vld [vmem:[#allocation23_spill] sm:$0xff] }
 0x7f1   :  { %2843 = vmatprep.subr.bf16.mxu0 %v6990_v35  ;;  %2884 = vmatprep.subr.bf16.mxu1 %v6991_v3  ;;  %v7000_v3 = vld [vmem:[#allocation8_spill] sm:$0xff]  ;;  %v7009_v35 = vld [vmem:[#allocation33_spill] sm:$0xff] }
 0x7f4   :  { %2844 = vmatpush2.bf16.msra.mxu0 %v6992_v2  ;;  %2885 = vmatpush2.bf16.msra.mxu1 %v6993_v10  ;;  %v7001_v2 = vld [vmem:[#allocation24_spill] sm:$0xff]  ;;  %v7002_v10 = vld [vmem:[#allocation9_spill] sm:$0xff] }
 0x7f5   :  { %2845 = vmatprep.subr.bf16.mxu0 %v6994_v16  ;;  %2886 = vmatprep.subr.bf16.mxu1 %v6995_v0  ;;  %v7003_v16 = vld [vmem:[#allocation26_spill] sm:$0xff] }
 0x7f6   :  { %v7004_v0 = vld [vmem:[#allocation10_spill] sm:$0xff] }
 0x7f8   :  { %2846 = vmatpush2.bf16.msra.mxu0 %v6996_v7  ;;  %2887 = vmatpush2.bf16.msra.mxu1 %v6997_v61  ;;  %v7005_v7 = vld [vmem:[#allocation29_spill] sm:$0xff]  ;;  %v7006_v61 = vld [vmem:[#allocation11_spill] sm:$0xff] }
 0x7f9   :  { %2995 = vmatprep.subr.bf16.mxu0 %v6998_v60  ;;  %3036 = vmatprep.subr.bf16.mxu1 %v6999_v56  ;;  %v7007_v60 = vld [vmem:[#allocation30_spill] sm:$0xff]  ;;  %v7008_v56 = vld [vmem:[#allocation12_spill] sm:$0xff] }
 0x7fb   :  { %2848 = vmatmul.mubr.bf16.vlgmr.msra.gmra.mxu0 %v5749_v45  ;;  %2889 = vmatmul.mubr.bf16.vlgmr.msra.gmra.mxu1 %v5749_v45  ;;  %v7010_v45 = vld [vmem:[#allocation13_spill] sm:$0xff] }
 0x7fc   :  { %2996 = vmatpush1.bf16.msra.mxu0 %v7000_v3  ;;  %3037 = vmatpush1.bf16.msra.mxu1 %v7001_v2  ;;  %v7011_v3 = vld [vmem:[#allocation34_spill] sm:$0xff] }
 0x7fd   :  { %2997 = vmatprep.subr.bf16.mxu0 %v7002_v10  ;;  %3038 = vmatprep.subr.bf16.mxu1 %v7003_v16  ;;  %v7012_v2 = vld [vmem:[#allocation14_spill] sm:$0xff]  ;;  %v7013_v10 = vld [vmem:[#allocation37_spill] sm:$0xff]  ;;  %v7014_v16 = vld [vmem:[#allocation15_spill] sm:$0xff] }
 0x800   :  { %2998 = vmatpush1.bf16.msra.mxu0 %v7004_v0  ;;  %3039 = vmatpush1.bf16.msra.mxu1 %v7005_v7  ;;  %v7015_v0 = vld [vmem:[#allocation38_spill] sm:$0xff]  ;;  %v7016_v7 = vld [vmem:[#allocation16_spill] sm:$0xff] }
 0x801   :  { %2999 = vmatprep.subr.bf16.mxu0 %v7006_v61  ;;  %3040 = vmatprep.subr.bf16.mxu1 %v7007_v60  ;;  %v7017_v61 = vld [vmem:[#allocation41_spill] sm:$0xff] }
 0x802   :  { %v7018_v60 = vld [vmem:[#allocation17_spill] sm:$0xff] }
 0x804   :  { %3000 = vmatpush1.bf16.msra.mxu0 %v7008_v56  ;;  %3041 = vmatpush1.bf16.msra.mxu1 %v7009_v35  ;;  %v7019_v56 = vld [vmem:[#allocation42_spill] sm:$0xff] }
 0x805   :  { %3001 = vmatprep.subr.bf16.mxu0 %v7010_v45  ;;  %3042 = vmatprep.subr.bf16.mxu1 %v7011_v3  ;;  %v7020_v35 = vld [vmem:[#allocation18_spill] sm:$0xff]  ;;  %v7021_v45 = vld [vmem:[#allocation45_spill] sm:$0xff]  ;;  %v7022_v3 = vld [vmem:[#allocation19_spill] sm:$0xff] }
 0x808   :  { %3002 = vmatpush1.bf16.msra.mxu0 %v7012_v2  ;;  %3043 = vmatpush1.bf16.msra.mxu1 %v7013_v10  ;;  %v7023_v2 = vld [vmem:[#allocation46_spill] sm:$0xff]  ;;  %v7024_v10 = vld [vmem:[#allocation20_spill] sm:$0xff] }
 0x809   :  { %3003 = vmatprep.subr.bf16.mxu0 %v7014_v16  ;;  %3044 = vmatprep.subr.bf16.mxu1 %v7015_v0  ;;  %v7025_v16 = vld [vmem:[#allocation49_spill] sm:$0xff] }
 0x80a   :  { %v7026_v0 = vld [vmem:[#allocation21_spill] sm:$0xff] }
 0x80c   :  { %3004 = vmatpush1.bf16.msra.mxu0 %v7016_v7  ;;  %3045 = vmatpush1.bf16.msra.mxu1 %v7017_v61  ;;  %v7027_v7 = vld [vmem:[#allocation50_spill] sm:$0xff] }
 0x80d   :  { %3005 = vmatprep.subr.bf16.mxu0 %v7018_v60  ;;  %3046 = vmatprep.subr.bf16.mxu1 %v7019_v56  ;;  %v7028_v61 = vld [vmem:[#allocation22_spill] sm:$0xff]  ;;  %v7029_v60 = vld [vmem:[#allocation53_spill] sm:$0xff] }
 0x80e   :  { %v7030_v56 = vld [vmem:[#allocation25_spill] sm:$0xff] }
 0x810   :  { %3006 = vmatpush1.bf16.msra.mxu0 %v7020_v35  ;;  %3047 = vmatpush1.bf16.msra.mxu1 %v7021_v45  ;;  %v7031_v35 = vld [vmem:[#allocation54_spill] sm:$0xff]  ;;  %v7032_v45 = vld [vmem:[#allocation27_spill] sm:$0xff] }
 0x811   :  { %3007 = vmatprep.subr.bf16.mxu0 %v7022_v3  ;;  %3048 = vmatprep.subr.bf16.mxu1 %v7023_v2  ;;  %v7033_v3 = vld [vmem:[#allocation57_spill] sm:$0xff]  ;;  %v7034_v2 = vld [vmem:[#allocation28_spill] sm:$0xff] }
 0x814   :  { %3008 = vmatpush1.bf16.msra.mxu0 %v7024_v10  ;;  %3049 = vmatpush1.bf16.msra.mxu1 %v7025_v16  ;;  %v7035_v10 = vld [vmem:[#allocation58_spill] sm:$0xff]  ;;  %v7036_v16 = vld [vmem:[#allocation31_spill] sm:$0xff] }
 0x815   :  { %3009 = vmatprep.subr.bf16.mxu0 %v7026_v0  ;;  %3050 = vmatprep.subr.bf16.mxu1 %v7027_v7  ;;  %v7037_v0 = vld [vmem:[#allocation61_spill] sm:$0xff]  ;;  %v7038_v7 = vld [vmem:[#allocation32_spill] sm:$0xff] }
 0x818   :  { %3010 = vmatpush1.bf16.msra.mxu0 %v7028_v61  ;;  %3051 = vmatpush1.bf16.msra.mxu1 %v7029_v60  ;;  %v7039_v61 = vld [vmem:[#allocation62_spill] sm:$0xff]  ;;  %v7040_v60 = vld [vmem:[#allocation35_spill] sm:$0xff] }
 0x819   :  { %3011 = vmatprep.subr.bf16.mxu0 %v7030_v56  ;;  %3052 = vmatprep.subr.bf16.mxu1 %v7031_v35  ;;  %v7041_v56 = vld [vmem:[#allocation65_spill] sm:$0xff]  ;;  %v7042_v35 = vld [vmem:[#allocation36_spill] sm:$0xff] }
 0x81c   :  { %3012 = vmatpush2.bf16.msra.mxu0 %v7032_v45  ;;  %3053 = vmatpush2.bf16.msra.mxu1 %v7033_v3  ;;  %v7043_v45 = vld [vmem:[#allocation66_spill] sm:$0xff]  ;;  %v7044_v3 = vld [vmem:[#allocation39_spill] sm:$0xff] }
 0x81d   :  { %3013 = vmatprep.subr.bf16.mxu0 %v7034_v2  ;;  %3054 = vmatprep.subr.bf16.mxu1 %v7035_v10  ;;  %v7045_v2 = vld [vmem:[#allocation69_spill] sm:$0xff]  ;;  %v7046_v10 = vld [vmem:[#allocation40_spill] sm:$0xff] }
 0x820   :  { %3014 = vmatpush2.bf16.msra.mxu0 %v7036_v16  ;;  %3055 = vmatpush2.bf16.msra.mxu1 %v7037_v0  ;;  %v7047_v16 = vld [vmem:[#allocation70_spill] sm:$0xff]  ;;  %v7048_v0 = vld [vmem:[#allocation43_spill] sm:$0xff] }
 0x821   :  { %3015 = vmatprep.subr.bf16.mxu0 %v7038_v7  ;;  %3056 = vmatprep.subr.bf16.mxu1 %v7039_v61  ;;  %v7049_v7 = vld [vmem:[#allocation73_spill] sm:$0xff]  ;;  %v7050_v61 = vld [vmem:[#allocation44_spill] sm:$0xff] }
 0x824   :  { %3016 = vmatpush2.bf16.msra.mxu0 %v7040_v60  ;;  %3057 = vmatpush2.bf16.msra.mxu1 %v7041_v56  ;;  %v7051_v60 = vld [vmem:[#allocation74_spill] sm:$0xff]  ;;  %v7052_v56 = vld [vmem:[#allocation47_spill] sm:$0xff] }
 0x825   :  { %3017 = vmatprep.subr.bf16.mxu0 %v7042_v35  ;;  %3058 = vmatprep.subr.bf16.mxu1 %v7043_v45  ;;  %v7053_v35 = vld [vmem:[#allocation77_spill] sm:$0xff]  ;;  %v7054_v45 = vld [vmem:[#allocation48_spill] sm:$0xff] }
 0x828   :  { %3018 = vmatpush2.bf16.msra.mxu0 %v7044_v3  ;;  %3059 = vmatpush2.bf16.msra.mxu1 %v7045_v2  ;;  %v7055_v3 = vld [vmem:[#allocation78_spill] sm:$0xff]  ;;  %v7056_v2 = vld [vmem:[#allocation51_spill] sm:$0xff] }
 0x829   :  { %3019 = vmatprep.subr.bf16.mxu0 %v7046_v10  ;;  %3060 = vmatprep.subr.bf16.mxu1 %v7047_v16  ;;  %v7057_v10 = vld [vmem:[#allocation81_spill] sm:$0xff]  ;;  %v7058_v16 = vld [vmem:[#allocation52_spill] sm:$0xff] }
 0x82c   :  { %3020 = vmatpush2.bf16.msra.mxu0 %v7048_v0  ;;  %3061 = vmatpush2.bf16.msra.mxu1 %v7049_v7  ;;  %v7059_v0 = vld [vmem:[#allocation82_spill] sm:$0xff]  ;;  %v7060_v7 = vld [vmem:[#allocation55_spill] sm:$0xff] }
 0x82d   :  { %3021 = vmatprep.subr.bf16.mxu0 %v7050_v61  ;;  %3062 = vmatprep.subr.bf16.mxu1 %v7051_v60  ;;  %v7061_v61 = vld [vmem:[#allocation85_spill] sm:$0xff]  ;;  %v7062_v60 = vld [vmem:[#allocation56_spill] sm:$0xff] }
 0x830   :  { %3022 = vmatpush2.bf16.msra.mxu0 %v7052_v56  ;;  %3063 = vmatpush2.bf16.msra.mxu1 %v7053_v35  ;;  %v7063_v56 = vld [vmem:[#allocation86_spill] sm:$0xff]  ;;  %v2897_v35 = vld [vmem:[#allocation2 + $0x40] sm:$0x30] }
 0x831   :  { %3023 = vmatprep.subr.bf16.mxu0 %v7054_v45  ;;  %3064 = vmatprep.subr.bf16.mxu1 %v7055_v3  ;;  %v2898_v45 = vld [vmem:[#allocation2 + $0x20] sm:$0x30]  ;;  %v2905_v12 = vrot.slane %v2897_v35, 4 }
 0x832   :  { %v2906_v51 = vrot.slane %v2898_v45, 4 }
 0x834   :  { %3024 = vmatpush2.bf16.msra.mxu0 %v7056_v2  ;;  %3065 = vmatpush2.bf16.msra.mxu1 %v7057_v10 }
 0x835   :  { %3025 = vmatprep.subr.bf16.mxu0 %v7058_v16  ;;  %3066 = vmatprep.subr.bf16.mxu1 %v7059_v0 }
 0x838   :  { %3026 = vmatpush2.bf16.msra.mxu0 %v7060_v7  ;;  %3067 = vmatpush2.bf16.msra.mxu1 %v7061_v61 }
 0x839   :  { %3077 = vmatprep.subr.bf16.mxu0 %v7062_v60  ;;  %3118 = vmatprep.subr.bf16.mxu1 %v7063_v56  ;;  %v2899_v60 = vld [vmem:[#allocation2 + $0x10] sm:$0x30] }
 0x83a   :  { %v2907_v56 = vrot.slane %v2899_v60, 4 }
 0x87b   :  { %v2767_v3 = vpop.f32.mrf.mxu0  ;;  %v2808_v15 = vpop.f32.mrf.mxu1 }
 0x87c   :  { %v2913_v2 = vadd.f32 %v2905_v12, %v2767_v3  ;;  %v2915_v47 = vadd.f32 %v2907_v56, %v2808_v15 }
 0x87d   :  { %v2769_v10 = vpop.f32.mrf.mxu0  ;;  %v2810_v8 = vpop.f32.mrf.mxu1 }
 0x87e   :  { %v3638_v16 = vmul.f32 -1.442695, %v2913_v2  ;;  %v2914_v62 = vadd.f32 %v2906_v51, %v2769_v10  ;;  %v3640_v35 = vmul.f32 -1.442695, %v2915_v47  ;;  %v2916_v12 = vadd.f32 %v2908_v33, %v2810_v8  ;;  %v2917_v8 = vld [vmem:[#allocation2 + $0x50] sm:$0xc] }
 0x87f   :  { %v2771_v0 = vpop.f32.mrf.mxu0  ;;  %v2812_v30 = vpop.f32.mrf.mxu1  ;;  %v2925_v60 = vrot.slane %v2917_v8, 2 }
 0x880   :  { %3894 = vpow2.f32 %v3638_v16  ;;  %v3639_v7 = vmul.f32 -1.442695, %v2914_v62  ;;  %v7064_v16 = vld [vmem:[#allocation63_spill] sm:$0xff] }
 0x881   :  { %v2772_v61 = vpop.f32.mrf.mxu0  ;;  %v2813_v42 = vpop.f32.mrf.mxu1 }
 0x882   :  { %3896 = vpow2.f32 %v3639_v7  ;;  %v2918_v61 = vld [vmem:[#allocation2 + $0x68] sm:$0xc] }
 0x883   :  { %3898 = vpow2.f32 %v3640_v35 }
 0x88d   :  { %v3895_v53 = vpop.eup %3894 }
 0x88e   :  { %v2946_v45 = vadd.f32 1.0, %v3895_v53 }
 0x88f   :  { %v3897_v3 = vpop.eup %3896 }
 0x890   :  { %3900 = vrcp.f32 %v2946_v45  ;;  %v2947_v51 = vadd.f32 1.0, %v3897_v3  ;;  %v3899_v30 = vpop.eup %3898  ;;  %v2926_v45 = vrot.slane %v2918_v61, 2 }
 0x891   :  { %3902 = vtanh.f32 %v2916_v12  ;;  %v2948_v10 = vadd.f32 1.0, %v3899_v30 }
 0x892   :  { %3904 = vrcp.f32 %v2947_v51 }
 0x893   :  { %3906 = vrcp.f32 %v2948_v10 }
 0x89d   :  { %v3901_v62 = vpop.eup %3900 }
 0x89e   :  { %v3903_v2 = vpop.eup %3902 }
 0x89f   :  { %v3905_v42 = vpop.eup %3904  ;;  %v2957_v15 = vmul.f32 %v3903_v2, %v3901_v62 }
 0x8a0   :  { %v2956_v0 = vmul.f32 %v3905_v42, %v7064_v16  ;;  %v3907_v53 = vpop.eup %3906 }
 0x8a2   :  { %v5884_v7 = vadd.f32 %v2957_v15, %v2956_v0  ;;  %v2919_v15 = vld [vmem:[#allocation2 + $0x8] sm:$0xc] }
 0x8a4   :  { %7065 = vst [vmem:[#allocation93_spill] sm:$0xff] %v5884_v7  ;;  %3908 = vtanh.f32 %v5884_v7 }
 0x8b1   :  { %v3909_v33 = vpop.eup %3908 }
 0x8b2   :  { %v2960_v22 = vmul.f32 %v3909_v33, %v3907_v53  ;;  %v2927_v53 = vrot.slane %v2919_v15, 2 }
 0x8b4   :  { %v2986_v47 = vrot.slane %v2960_v22, 4  ;;  %v5891_v15 = vpack.c.bf16 %v2960_v22, %v2960_v22  ;;  %v3250_v22 = vld [vmem:[%s6093_s6 + $0x30] sm:$0xff] }
 0x8b6   :  { %2988 = vst [vmem:[#allocation3 + $0x10] sm:$0x30] %v2986_v47  ;;  %v2920_v47 = vld [vmem:[#allocation2 + $0x48] sm:$0xc] }
 0x8b7   :  { %v2928_v7 = vrot.slane %v2920_v47, 2  ;;  %v3264_v47 = vld [vmem:[%s6093_s6 + $0xa0] sm:$0xff] }
 0x8bb   :  { %v2849_v56 = vpop.f32.mrf.mxu0  ;;  %v2890_v35 = vpop.f32.mrf.mxu1 }
 0x8bc   :  { %v2933_v12 = vadd.f32 %v2925_v60, %v2849_v56  ;;  %v2935_v33 = vadd.f32 %v2927_v53, %v2890_v35  ;;  %v3265_v53 = vld [vmem:[%s6093_s6 + $0xa8] sm:$0xff] }
 0x8bd   :  { %v2851_v3 = vpop.f32.mrf.mxu0  ;;  %v2892_v51 = vpop.f32.mrf.mxu1 }
 0x8be   :  { %v3641_v30 = vmul.f32 -1.442695, %v2933_v12  ;;  %v2934_v62 = vadd.f32 %v2926_v45, %v2851_v3  ;;  %v3643_v8 = vmul.f32 -1.442695, %v2935_v33  ;;  %v2936_v60 = vadd.f32 %v2928_v7, %v2892_v51  ;;  %v3249_v33 = vld [vmem:[%s6093_s6 + $0x28] sm:$0xff] }
 0x8bf   :  { %v2853_v2 = vpop.f32.mrf.mxu0  ;;  %v2894_v42 = vpop.f32.mrf.mxu1 }
 0x8c0   :  { %3910 = vpow2.f32 %v3641_v30  ;;  %v3642_v10 = vmul.f32 -1.442695, %v2934_v62 }
 0x8c1   :  { %v2854_v16 = vpop.f32.mrf.mxu0  ;;  %v2895_v0 = vpop.f32.mrf.mxu1 }
 0x8c2   :  { %3912 = vpow2.f32 %v3642_v10 }
 0x8c3   :  { %3914 = vpow2.f32 %v3643_v8  ;;  %v3248_v8 = vld [vmem:[%s6093_s6 + $0x20] sm:$0xff] }
 0x8cd   :  { %v3911_v13 = vpop.eup %3910 }
 0x8ce   :  { %v2970_v61 = vadd.f32 1.0, %v3911_v13 }
 0x8cf   :  { %v3913_v56 = vpop.eup %3912 }
 0x8d0   :  { %3916 = vrcp.f32 %v2970_v61  ;;  %v2971_v12 = vadd.f32 1.0, %v3913_v56  ;;  %v3915_v45 = vpop.eup %3914  ;;  %v3247_v61 = vld [vmem:[%s6093_s6 + $0x18] sm:$0xff]  ;;  %v3159_v56 = vld [vmem:[#allocation2 + $0x40] sm:$0xc0] }
 0x8d1   :  { %3918 = vtanh.f32 %v2936_v60  ;;  %v2972_v2 = vadd.f32 1.0, %v3915_v45  ;;  %v3263_v60 = vld [vmem:[%s6093_s6 + $0x98] sm:$0xff]  ;;  %v3246_v45 = vld [vmem:[%s6093_s6 + $0x10] sm:$0xff] }
 0x8d2   :  { %3920 = vrcp.f32 %v2971_v12  ;;  %v3262_v12 = vld [vmem:[%s6093_s6 + $0x90] sm:$0xff] }
 0x8d3   :  { %3922 = vrcp.f32 %v2972_v2  ;;  %v3245_v2 = vld [vmem:[%s6093_s6 + $0x8] sm:$0xff] }
 0x8dd   :  { %v3917_v3 = vpop.eup %3916 }
 0x8de   :  { %v3919_v30 = vpop.eup %3918 }
 0x8df   :  { %v3921_v62 = vpop.eup %3920  ;;  %v2981_v35 = vmul.f32 %v3919_v30, %v3917_v3  ;;  %v3160_v3 = vld [vmem:[#allocation2 + $0x20] sm:$0xc0]  ;;  %v3261_v30 = vld [vmem:[%s6093_s6 + $0x88] sm:$0xff] }
 0x8e0   :  { %v2980_v42 = vmul.f32 %v3921_v62, %v5746_v59  ;;  %v3923_v13 = vpop.eup %3922  ;;  %v3266_v59 = vld [vmem:[%s6093_s6 + $0xb0] sm:$0xff]  ;;  %v3167_v62 = vrot.slane %v3159_v56, 6 }
 0x8e2   :  { %v5888_v10 = vadd.f32 %v2981_v35, %v2980_v42 }
 0x8e4   :  { %3924 = vtanh.f32 %v5888_v10 }
 0x8f1   :  { %v3925_v7 = vpop.eup %3924 }
 0x8f2   :  { %v2984_v51 = vmul.f32 %v3925_v7, %v3923_v13  ;;  %v3260_v13 = vld [vmem:[%s6093_s6 + $0x80] sm:$0xff] }
 0x8f4   :  { %v2990_v16 = vrot.slane %v2984_v51, 6  ;;  %v2994_v0 = vpack.c.bf16 %v2984_v51, %v2984_v51  ;;  %v3168_v51 = vrot.slane %v3160_v3, 6 }
 0x8f6   :  { %2992 = vst [vmem:[#allocation3 + $0x8] sm:$0xc] %v2990_v16  ;;  %3027 = vmatprep.mubr.bf16.mxu0 %v2994_v0  ;;  %3068 = vmatprep.mubr.bf16.mxu1 %v2994_v0  ;;  %v3244_v16 = vld [vmem:[%s6093_s6] sm:$0xff] }
 0x8f7   :  { %3028 = vmatmul.mubr.bf16.vlgmr.msra.gmra.mxu0 %v5891_v15  ;;  %3069 = vmatmul.mubr.bf16.vlgmr.msra.gmra.mxu1 %v5891_v15 }
 0x8f8   :  { %3078 = vmatpush1.bf16.msra.mxu0 %v6528_v27  ;;  %3119 = vmatpush1.bf16.msra.mxu1 %v6529_v21  ;;  %v7066_v27 = vld [vmem:[#allocation99_spill] sm:$0xff]  ;;  %v7067_v21 = vld [vmem:[#allocation124_spill] sm:$0xff] }
 0x8f9   :  { %3109 = vmatprep.mubr.bf16.mxu0 %v2994_v0  ;;  %3150 = vmatprep.mubr.bf16.mxu1 %v2994_v0 }
 0x8fa   :  { %3079 = vmatprep.subr.bf16.mxu0 %v6530_v29  ;;  %3120 = vmatprep.subr.bf16.mxu1 %v6531_v38  ;;  %v7068_v29 = vld [vmem:[#allocation100_spill] sm:$0xff]  ;;  %v7069_v38 = vld [vmem:[#allocation125_spill] sm:$0xff] }
 0x8fc   :  { %3080 = vmatpush1.bf16.msra.mxu0 %v6532_v48  ;;  %3121 = vmatpush1.bf16.msra.mxu1 %v6533_v4  ;;  %v7070_v48 = vld [vmem:[#allocation103_spill] sm:$0xff]  ;;  %v7071_v4 = vld [vmem:[#allocation126_spill] sm:$0xff] }
 0x8fd   :  { %3081 = vmatprep.subr.bf16.mxu0 %v6534_v28  ;;  %3122 = vmatprep.subr.bf16.mxu1 %v6535_v1  ;;  %v7072_v28 = vld [vmem:[#allocation104_spill] sm:$0xff]  ;;  %v7074_v1 = vld [vmem:[#allocation107_spill] sm:$0xff] }
 0x900   :  { %3082 = vmatpush1.bf16.msra.mxu0 %v6536_v57  ;;  %3123 = vmatpush1.bf16.msra.mxu1 %v6537_v19  ;;  %v7076_v57 = vld [vmem:[#allocation108_spill] sm:$0xff]  ;;  %v7077_v19 = vld [vmem:[#allocation129_spill] sm:$0xff] }
 0x901   :  { %3083 = vmatprep.subr.bf16.mxu0 %v6617_v26  ;;  %3124 = vmatprep.subr.bf16.mxu1 %v6618_v20  ;;  %v3259_v26 = vld [vmem:[%s6093_s6 + $0x78] sm:$0xff]  ;;  %v3274_v20 = vld [vmem:[%s6093_s6 + $0xf0] sm:$0xff] }
 0x904   :  { %3084 = vmatpush1.bf16.msra.mxu0 %v6619_v39  ;;  %3125 = vmatpush1.bf16.msra.mxu1 %v6620_v14  ;;  %v3258_v39 = vld [vmem:[%s6093_s6 + $0x70] sm:$0xff]  ;;  %v3273_v14 = vld [vmem:[%s6093_s6 + $0xe8] sm:$0xff] }
 0x905   :  { %3085 = vmatprep.subr.bf16.mxu0 %v6542_v34  ;;  %3126 = vmatprep.subr.bf16.mxu1 %v6621_v40  ;;  %v7082_v34 = vld [vmem:[#allocation115_spill] sm:$0xff] }
 0x906   :  { %v3257_v40 = vld [vmem:[%s6093_s6 + $0x68] sm:$0xff] }
 0x908   :  { %3086 = vmatpush1.bf16.msra.mxu0 %v6544_v9  ;;  %3127 = vmatpush1.bf16.msra.mxu1 %v6622_v49  ;;  %v7084_v9 = vld [vmem:[#allocation116_spill] sm:$0xff]  ;;  %v3272_v49 = vld [vmem:[%s6093_s6 + $0xe0] sm:$0xff] }
 0x909   :  { %3087 = vmatprep.subr.bf16.mxu0 %v6546_v54  ;;  %3128 = vmatprep.subr.bf16.mxu1 %v6623_v37  ;;  %v7086_v54 = vld [vmem:[#allocation119_spill] sm:$0xff] }
 0x90a   :  { %v3256_v37 = vld [vmem:[%s6093_s6 + $0x60] sm:$0xff] }
 0x90c   :  { %3088 = vmatpush1.bf16.msra.mxu0 %v6548_v17  ;;  %3129 = vmatpush1.bf16.msra.mxu1 %v6624_v32  ;;  %v3275_v17 = vld [vmem:[%s6093_s6 + $0xf8] sm:$0xff] }
 0x90d   :  { %3089 = vmatprep.subr.bf16.mxu0 %v6550_v11  ;;  %3130 = vmatprep.subr.bf16.mxu1 %v6625_v58  ;;  %v7079_v11 = vld [vmem:[#allocation130_spill] sm:$0xff] }
 0x90e   :  { %v3271_v32 = vld [vmem:[%s6093_s6 + $0xd8] sm:$0xff] }
 0x90f   :  { %v3255_v58 = vld [vmem:[%s6093_s6 + $0x58] sm:$0xff] }
 0x910   :  { %3090 = vmatpush1.bf16.msra.mxu0 %v6552_v41  ;;  %3131 = vmatpush1.bf16.msra.mxu1 %v6626_v44  ;;  %v7081_v41 = vld [vmem:[#allocation131_spill] sm:$0xff]  ;;  %v3270_v44 = vld [vmem:[%s6093_s6 + $0xd0] sm:$0xff] }
 0x911   :  { %3091 = vmatprep.subr.bf16.mxu0 %v6553_v24  ;;  %3132 = vmatprep.subr.bf16.mxu1 %v6627_v55  ;;  %v7083_v24 = vld [vmem:[#allocation132_spill] sm:$0xff] }
 0x912   :  { %v3254_v55 = vld [vmem:[%s6093_s6 + $0x50] sm:$0xff] }
 0x914   :  { %3092 = vmatpush1.bf16.msra.mxu0 %v6554_v18  ;;  %3133 = vmatpush1.bf16.msra.mxu1 %v6628_v5  ;;  %v7085_v18 = vld [vmem:[#allocation133_spill] sm:$0xff]  ;;  %v3269_v5 = vld [vmem:[%s6093_s6 + $0xc8] sm:$0xff] }
 0x915   :  { %3093 = vmatprep.subr.bf16.mxu0 %v6555_v50  ;;  %3134 = vmatprep.subr.bf16.mxu1 %v6629_v63  ;;  %v7087_v50 = vld [vmem:[#allocation134_spill] sm:$0xff]  ;;  %v3253_v63 = vld [vmem:[%s6093_s6 + $0x48] sm:$0xff] }
 0x918   :  { %3094 = vmatpush2.bf16.msra.mxu0 %v6556_v46  ;;  %3135 = vmatpush2.bf16.msra.mxu1 %v6630_v36  ;;  %v7078_v46 = vld [vmem:[#allocation111_spill] sm:$0xff] }
 0x919   :  { %3095 = vmatprep.subr.bf16.mxu0 %v6557_v31  ;;  %3136 = vmatprep.subr.bf16.mxu1 %v6631_v23  ;;  %v7080_v31 = vld [vmem:[#allocation112_spill] sm:$0xff]  ;;  %v3268_v36 = vld [vmem:[%s6093_s6 + $0xc0] sm:$0xff] }
 0x91a   :  { %v3252_v23 = vld [vmem:[%s6093_s6 + $0x40] sm:$0xff] }
 0x91c   :  { %3096 = vmatpush2.bf16.msra.mxu0 %v6558_v6  ;;  %3137 = vmatpush2.bf16.msra.mxu1 %v6632_v43  ;;  %v7073_v6 = vld [vmem:[#allocation127_spill] sm:$0xff]  ;;  %v3267_v43 = vld [vmem:[%s6093_s6 + $0xb8] sm:$0xff] }
 0x91d   :  { %3097 = vmatprep.subr.bf16.mxu0 %v6559_v25  ;;  %3138 = vmatprep.subr.bf16.mxu1 %v6633_v52  ;;  %v7075_v25 = vld [vmem:[#allocation128_spill] sm:$0xff]  ;;  %v3251_v52 = vld [vmem:[%s6093_s6 + $0x38] sm:$0xff] }
 0x920   :  { %3098 = vmatpush2.bf16.msra.mxu0 %v7066_v27  ;;  %3139 = vmatpush2.bf16.msra.mxu1 %v7067_v21 }
 0x921   :  { %3099 = vmatprep.subr.bf16.mxu0 %v7068_v29  ;;  %3140 = vmatprep.subr.bf16.mxu1 %v7069_v38 }
 0x924   :  { %3100 = vmatpush2.bf16.msra.mxu0 %v7070_v48  ;;  %3141 = vmatpush2.bf16.msra.mxu1 %v7071_v4 }
 0x925   :  { %3101 = vmatprep.subr.bf16.mxu0 %v7072_v28  ;;  %3142 = vmatprep.subr.bf16.mxu1 %v7073_v6  ;;  %v3363_v6 = vld [vmem:[%s6088_s1] sm:$0xff] }
 0x926   :  { %vm3365_vm1 = vcmp.eq.s32.totalorder %v3363_v6, 1 }
 0x928   :  { %3102 = vmatpush2.bf16.msra.mxu0 %v7074_v1  ;;  %3143 = vmatpush2.bf16.msra.mxu1 %v7075_v25  ;;  %v3364_v1 = vld [vmem:[%s6088_s1 + $0x8] sm:$0xff]  ;;  %v3161_v25 = vld [vmem:[#allocation2 + $0x10] sm:$0xc0] }
 0x929   :  { %3103 = vmatprep.subr.bf16.mxu0 %v7076_v57  ;;  %3144 = vmatprep.subr.bf16.mxu1 %v7077_v19  ;;  %v3990_v57 = vmov 0   ;;  %vm3366_vm2 = vcmp.eq.s32.totalorder %v3364_v1, 1  ;;  %v7088_v19 = vmov 0.0  }
 0x92a   :  { %3700 = vset.pattern.permute.xlu0 %v3990_v57  ;;  %3701 = vset.pattern.permute.xlu1 %v3990_v57 }
 0x92c   :  { %3104 = vmatpush2.bf16.msra.mxu0 %v7078_v46  ;;  %3145 = vmatpush2.bf16.msra.mxu1 %v7079_v11  ;;  %v3652_v46 = vsel %vm3365_vm1, 1.0, %v7088_v19  ;;  %v3653_v11 = vsel %vm3366_vm2, 1.0, %v7088_v19 }
 0x92d   :  { %3105 = vmatprep.subr.bf16.mxu0 %v7080_v31  ;;  %3146 = vmatprep.subr.bf16.mxu1 %v7081_v41  ;;  %v3371_v31 = vmul.f32 10000.0, %v3652_v46  ;;  %v3169_v41 = vrot.slane %v3161_v25, 6 }
 0x92f   :  { %3375 = vperm.xlu0 %3700, %v3371_v31   ;;  %v3243_v31 = vld [vmem:[#allocation3] sm:$0xff] }
 0x930   :  { %3106 = vmatpush2.bf16.msra.mxu0 %v7082_v34  ;;  %3147 = vmatpush2.bf16.msra.mxu1 %v7083_v24  ;;  %v3372_v34 = vmul.f32 10000.0, %v3653_v11  ;;  %v3240_v11 = vld [vmem:[#allocation3 + $0x18] sm:$0xff] }
 0x931   :  { %3107 = vmatprep.subr.bf16.mxu0 %v7084_v9  ;;  %3148 = vmatprep.subr.bf16.mxu1 %v7085_v18  ;;  %v3162_v9 = vld [vmem:[#allocation2 + $0x38] sm:$0xc0] }
 0x933   :  { %3380 = vperm.xlu0 %3700, %v3372_v34   ;;  %v7090_v34 = vlaneseq }
 0x934   :  { %3108 = vmatpush2.bf16.msra.mxu0 %v7086_v54  ;;  %3149 = vmatpush2.bf16.msra.mxu1 %v7087_v50  ;;  %v3170_v54 = vrot.slane %v3162_v9, 6  ;;  %v3387_v50 = vld [vmem:[%s6089_s2] sm:$0xff] }
 0x935   :  { %3656 = vmatprep.subr.mxu0 %v3275_v17 }
 0x937   :  { %3110 = vmatmul.mubr.bf16.vlgmr.msra.gmra.mxu0 %v5891_v15  ;;  %3151 = vmatmul.mubr.bf16.vlgmr.msra.gmra.mxu1 %v5891_v15 }
 0x938   :  { %3657 = vmatpush3.msra.mxu0 %v3259_v26  ;;  %3390 = vperm.xlu0 %3700, %v3387_v50  }
 0x939   :  { %3658 = vmatprep.subr.mxu0 %v3274_v20 }
 0x93a   :  { %3659 = vmatpush3.msra.mxu0 %v3258_v39 }
 0x93b   :  { %3660 = vmatprep.subr.mxu0 %v3273_v14 }
 0x93c   :  { %3661 = vmatpush3.msra.mxu0 %v3257_v40 }
 0x93d   :  { %3662 = vmatprep.subr.mxu0 %v3272_v49 }
 0x93e   :  { %3663 = vmatpush3.msra.mxu0 %v3256_v37 }
 0x93f   :  { %3664 = vmatprep.subr.mxu0 %v3271_v32 }
 0x940   :  { %3665 = vmatpush3.msra.mxu0 %v3255_v58 }
 0x941   :  { %3666 = vmatprep.subr.mxu0 %v3270_v44  ;;  %v7089_v44 = vld [vmem:[#allocation93_spill] sm:$0xff] }
 0x942   :  { %3667 = vmatpush3.msra.mxu0 %v3254_v55 }
 0x943   :  { %3668 = vmatprep.subr.mxu0 %v3269_v5 }
 0x944   :  { %3669 = vmatpush3.msra.mxu0 %v3253_v63 }
 0x945   :  { %3670 = vmatprep.subr.mxu0 %v3268_v36 }
 0x946   :  { %3671 = vmatpush3.msra.mxu0 %v3252_v23 }
 0x947   :  { %3672 = vmatprep.subr.mxu0 %v3267_v43 }
 0x948   :  { %3673 = vmatpush3.msra.mxu0 %v3251_v52 }
 0x949   :  { %3674 = vmatprep.subr.mxu0 %v3266_v59 }
 0x94a   :  { %3675 = vmatpush3.msra.mxu0 %v3250_v22  ;;  %v3179_v22 = vld [vmem:[#allocation2 + $0x50] sm:$0x3] }
 0x94b   :  { %3676 = vmatprep.subr.mxu0 %v3265_v53 }
 0x94c   :  { %3677 = vmatpush3.msra.mxu0 %v3249_v33 }
 0x94d   :  { %3678 = vmatprep.subr.mxu0 %v3264_v47 }
 0x94e   :  { %3679 = vmatpush3.msra.mxu0 %v3248_v8  ;;  %v3180_v8 = vld [vmem:[#allocation2 + $0x68] sm:$0x3] }
 0x94f   :  { %3680 = vmatprep.subr.mxu0 %v3263_v60 }
 0x950   :  { %3681 = vmatpush3.msra.mxu0 %v3247_v61 }
 0x951   :  { %3682 = vmatprep.subr.mxu0 %v3262_v12 }
 0x952   :  { %3683 = vmatpush3.msra.mxu0 %v3246_v45 }
 0x953   :  { %3684 = vmatprep.subr.mxu0 %v3261_v30 }
 0x954   :  { %3685 = vmatpush3.msra.mxu0 %v3245_v2  ;;  %v3181_v2 = vld [vmem:[#allocation2 + $0x8] sm:$0x3] }
 0x955   :  { %3686 = vmatprep.subr.mxu0 %v3260_v13  ;;  %v3182_v13 = vld [vmem:[#allocation2 + $0x48] sm:$0x3] }
 0x956   :  { %3687 = vmatpush3.msra.mxu0 %v3244_v16 }
 0x9b7   :  { %v3029_v42 = vpop.f32.mrf.mxu0  ;;  %v3070_v35 = vpop.f32.mrf.mxu1 }
 0x9b8   :  { %v3175_v7 = vadd.f32 %v3167_v62, %v3029_v42  ;;  %v3177_v24 = vadd.f32 %v3169_v41, %v3070_v35 }
 0x9b9   :  { %v3031_v0 = vpop.f32.mrf.mxu0  ;;  %v3072_v15 = vpop.f32.mrf.mxu1 }
 0x9ba   :  { %v3644_v27 = vmul.f32 -1.442695, %v3175_v7  ;;  %v3176_v21 = vadd.f32 %v3168_v51, %v3031_v0  ;;  %v3646_v18 = vmul.f32 -1.442695, %v3177_v24  ;;  %v3178_v26 = vadd.f32 %v3170_v54, %v3072_v15  ;;  %v3650_v54 = vld [vmem:[%s6094_s7] ss:$0 sm:$0xff] }
 0x9bb   :  { %v3033_v29 = vpop.f32.mrf.mxu0  ;;  %v3074_v38 = vpop.f32.mrf.mxu1  ;;  %v3359_v24 = vand.u32 127, %v7090_v34 }
 0x9bc   :  { %3926 = vpow2.f32 %v3644_v27  ;;  %v3645_v48 = vmul.f32 -1.442695, %v3176_v21 }
 0x9bd   :  { %v3034_v4 = vpop.f32.mrf.mxu0  ;;  %v3075_v28 = vpop.f32.mrf.mxu1  ;;  %vm3360_vm3 = vcmp.eq.s32.totalorder %v3359_v24, 0 }
 0x9be   :  { %3928 = vpow2.f32 %v3645_v48 }
 0x9bf   :  { %3930 = vpow2.f32 %v3646_v18  ;;  %v3376_v18 = vpop.permute.xlu0 %3375 }
 0x9c9   :  { %v3927_v17 = vpop.eup %3926 }
 0x9ca   :  { %v3196_v20 = vadd.f32 1.0, %v3927_v17 }
 0x9cb   :  { %v3929_v39 = vpop.eup %3928 }
 0x9cc   :  { %3932 = vrcp.f32 %v3196_v20  ;;  %v3197_v14 = vadd.f32 1.0, %v3929_v39  ;;  %v3931_v40 = vpop.eup %3930 }
 0x9cd   :  { %3934 = vtanh.f32 %v3178_v26  ;;  %v3198_v58 = vadd.f32 1.0, %v3931_v40 }
 0x9ce   :  { %3936 = vrcp.f32 %v3197_v14 }
 0x9cf   :  { %3938 = vrcp.f32 %v3198_v58 }
 0x9d9   :  { %v3933_v49 = vpop.eup %3932 }
 0x9da   :  { %v3935_v37 = vpop.eup %3934 }
 0x9db   :  { %v3937_v32 = vpop.eup %3936  ;;  %v3207_v5 = vmul.f32 %v3935_v37, %v3933_v49  ;;  %v3381_v37 = vpop.permute.xlu0 %3380 }
 0x9dc   :  { %v3206_v55 = vmul.f32 %v3937_v32, %v7089_v44  ;;  %v3939_v36 = vpop.eup %3938 }
 0x9de   :  { %v3208_v63 = vadd.f32 %v3207_v5, %v3206_v55 }
 0x9e0   :  { %3940 = vtanh.f32 %v3208_v63  ;;  %v3388_v63 = vld [vmem:[%s6089_s2 + $0x8] sm:$0xff]  ;;  %s3991_s2 = smov [#allocation4]  }
 0x9e1   :  { %s3458_s17 = sshll.u32 %s3991_s2, 4  ;;  %s3459_s17 = int_to_ptr.vmem [resolvable:$true] %s3458_s17 }
 0x9e2   :  { %s3966_s19 = scalar_lea.vmem %s3459_s17, 16  ;;  %s3970_s20 = scalar_lea.vmem %s3459_s17, 32 }
 0x9e3   :  { %p3967_p0 = scmp.ne.s32.totalorder %s3459_s17, %s3966_s19  ;;  %p3971_p1 = scmp.lt.s32.totalorder %s3459_s17, %s3459_s17 }
 0x9e4   :  { %p3972_p2 = scmp.lt.s32.totalorder %s3970_s20, %s3966_s19 }
 0x9e6   :  { %p3973_p3 = por %p3972_p2, %p3971_p1 }
 0x9e8   :  { %p3974_p4 = pnand %p3973_p3, %p3967_p0 }
 0x9ed   :  { %v3941_v23 = vpop.eup %3940 }
 0x9ee   :  { %v3210_v43 = vmul.f32 %v3941_v23, %v3939_v36 }
 0x9f0   :  { %v3236_v52 = vrot.slane %v3210_v43, 2 }
 0x9f2   :  { %3238 = vst [vmem:[#allocation3 + $0x10] sm:$0xc0] %v3236_v52 }
 0x9f7   :  { %v3111_v59 = vpop.f32.mrf.mxu0  ;;  %v3152_v53 = vpop.f32.mrf.mxu1 }
 0x9f8   :  { %v3183_v33 = vadd.f32 %v3179_v22, %v3111_v59  ;;  %v3185_v42 = vadd.f32 %v3181_v2, %v3152_v53  ;;  %v3391_v53 = vpop.permute.xlu0 %3390 }
 0x9f9   :  { %v3113_v47 = vpop.f32.mrf.mxu0  ;;  %v3154_v60 = vpop.f32.mrf.mxu1  ;;  %v3242_v41 = vld [vmem:[#allocation3 + $0x10] sm:$0xff]  ;;  %vm3395_vm5 = vcmp.eq.s32.totalorder %v3359_v24, %v3391_v53 }
 0x9fa   :  { %v3647_v61 = vmul.f32 -1.442695, %v3183_v33  ;;  %v3184_v56 = vadd.f32 %v3180_v8, %v3113_v47  ;;  %v3649_v35 = vmul.f32 -1.442695, %v3185_v42  ;;  %v3186_v51 = vadd.f32 %v3182_v13, %v3154_v60 }
 0x9fb   :  { %v3115_v12 = vpop.f32.mrf.mxu0  ;;  %v3156_v45 = vpop.f32.mrf.mxu1  ;;  %v3654_v8 = vsel %vm3395_vm5, 1.0, %v7088_v19 }
 0x9fc   :  { %3942 = vpow2.f32 %v3647_v61  ;;  %v3648_v3 = vmul.f32 -1.442695, %v3184_v56 }
 0x9fd   :  { %v3116_v30 = vpop.f32.mrf.mxu0  ;;  %v3157_v62 = vpop.f32.mrf.mxu1 }
 0x9fe   :  { %3944 = vpow2.f32 %v3648_v3 }
 0x9ff   :  { %3946 = vpow2.f32 %v3649_v35 }
 0xa09   :  { %v3943_v7 = vpop.eup %3942 }
 0xa0a   :  { %v3220_v16 = vadd.f32 1.0, %v3943_v7 }
 0xa0b   :  { %v3945_v0 = vpop.eup %3944 }
 0xa0c   :  { %3948 = vrcp.f32 %v3220_v16  ;;  %v3221_v15 = vadd.f32 1.0, %v3945_v0  ;;  %v3947_v27 = vpop.eup %3946 }
 0xa0d   :  { %3950 = vtanh.f32 %v3186_v51  ;;  %v3222_v48 = vadd.f32 1.0, %v3947_v27 }
 0xa0e   :  { %3952 = vrcp.f32 %v3221_v15 }
 0xa0f   :  { %3954 = vrcp.f32 %v3222_v48 }
 0xa19   :  { %v3949_v21 = vpop.eup %3948 }
 0xa1a   :  { %v3951_v29 = vpop.eup %3950 }
 0xa1b   :  { %v3953_v38 = vpop.eup %3952  ;;  %v3231_v28 = vmul.f32 %v3951_v29, %v3949_v21 }
 0xa1c   :  { %v3230_v4 = vmul.f32 %v3953_v38, %v5888_v10  ;;  %v3955_v1 = vpop.eup %3954  ;;  %v3651_v10 = vsel %vm3360_vm3, 1.0, %v7088_v19 }
 0xa1d   :  { %v3383_v17 = vmul.f32 %v3651_v10, %v3376_v18  ;;  %v3384_v32 = vmul.f32 %v3651_v10, %v3381_v37 }
 0xa1e   :  { %v3232_v6 = vadd.f32 %v3231_v28, %v3230_v4 }
 0xa20   :  { %3956 = vtanh.f32 %v3232_v6 }
 0xa2d   :  { %v3957_v25 = vpop.eup %3956 }
 0xa2e   :  { %v3234_v57 = vmul.f32 %v3957_v25, %v3955_v1 }
 0xa30   :  { %3239 = vst [vmem:[#allocation3 + $0x8] sm:$0x3] %v3234_v57 }
 0xa37   :  { %v3241_v46 = vld [vmem:[#allocation3 + $0x8] sm:$0xff] }
 0xa38   :  { %3347 = vmatprep.mubr.f32.mxu0 %v3241_v46 }
 0xa39   :  { %3348 = vmatmul.mubr.f32.vlgmr.msra.gmra.mxu0 %v3240_v11 }
 0xa3a   :  { %3352 = vmatprep.mubr.f32.mxu0 %v3243_v31 }
 0xa3d   :  { %3353 = vmatmul.mubr.f32.gmra.mxu0 %v3242_v41 }
 0xaf9   :  { %v3688_v9 = vpop.f32.mrf.mxu0 }
 0xafb   :  { %v3689_v50 = vpop.f32.mrf.mxu0 }
 0xafc   :  { %v3690_v26 = vadd.f32 %v3689_v50, %v3688_v9 }
 0xafd   :  { %v3691_v20 = vpop.f32.mrf.mxu0 }
 0xafe   :  { %v3350_v39 = vadd.f32 %v3690_v26, %v3650_v54 }
 0xaff   :  { %v3692_v14 = vpop.f32.mrf.mxu0 }
 0xb00   :  { %v3693_v40 = vadd.f32 %v3692_v14, %v3691_v20  ;;  %v3385_v49 = vadd.f32 %v3383_v17, %v3350_v39 }
 0xb02   :  { %v3355_v58 = vadd.f32 %v3693_v40, %v3650_v54  ;;  %v3402_v44 = vsel %vm3401_vm4, %v3385_v49, -inf  ;;  %v3426_v61 = vmul.f32 %v3654_v8, %v3385_v49 }
 0xb03   :  { %3403 = vmax.xlane.f32.xlu1 %v3402_v44 }
 0xb04   :  { %v3386_v55 = vadd.f32 %v3384_v32, %v3355_v58  ;;  %v3428_v45 = vsel %vm3401_vm4, %v3426_v61, 0.0 }
 0xb06   :  { %v3405_v5 = vsel %vm3401_vm4, %v3386_v55, -inf }
 0xb07   :  { %3406 = vmax.xlane.f32.xlu1 %v3405_v5 }
 0xb18   :  { %3393 = vperm.xlu1 %3701, %v3388_v63  }
 0xb8c   :  { %v3404_v36 = vpop.xlane.xlu1 %3403 }
 0xb8d   :  { %v3408_v23 = vsub.f32 %v3385_v49, %v3404_v36 }
 0xb8f   :  { %v3410_v43 = vmul.f32 1.442695, %v3408_v23 }
 0xb90   :  { %v3407_v52 = vpop.xlane.xlu1 %3406 }
 0xb91   :  { %3958 = vpow2.f32 %v3410_v43  ;;  %v3409_v59 = vsub.f32 %v3386_v55, %v3407_v52 }
 0xb93   :  { %v3412_v22 = vmul.f32 1.442695, %v3409_v59 }
 0xb94   :  { %v3394_v33 = vpop.permute.xlu1 %3393 }
 0xb95   :  { %3960 = vpow2.f32 %v3412_v22  ;;  %vm3396_vm6 = vcmp.eq.s32.totalorder %v3359_v24, %v3394_v33 }
 0xb96   :  { %v3655_v56 = vsel %vm3396_vm6, 1.0, %v7088_v19 }
 0xb97   :  { %v3427_v30 = vmul.f32 %v3655_v56, %v3386_v55 }
 0xb99   :  { %v3431_v62 = vsel %vm3401_vm4, %v3427_v30, 0.0 }
 0xb9e   :  { %v3959_v47 = vpop.eup %3958 }
 0xb9f   :  { %v3414_v60 = vsel %vm3401_vm4, %v3959_v47, 0.0 }
 0xba0   :  { %3415 = vadd.xlane.f32.xlu0 %v3414_v60 }
 0xba2   :  { %v3961_v12 = vpop.eup %3960 }
 0xba3   :  { %v3417_v3 = vsel %vm3401_vm4, %v3961_v12, 0.0 }
 0xba4   :  { %3429 = vadd.xlane.f32.xlu0 %v3428_v45  ;;  %3418 = vadd.xlane.f32.xlu1 %v3417_v3 }
 0xba8   :  { %3432 = vadd.xlane.f32.xlu0 %v3431_v62 }
 0xc29   :  { %v3416_v2 = vpop.xlane.xlu0 %3415 }
 0xc2a   :  { %3962 = vlog2.f32 %v3416_v2 }
 0xc2d   :  { %v3419_v42 = vpop.xlane.xlu1 %3418  ;;  %v3430_v7 = vpop.xlane.xlu0 %3429 }
 0xc2e   :  { %3964 = vlog2.f32 %v3419_v42 }
 0xc31   :  { %v3433_v27 = vpop.xlane.xlu0 %3432 }
 0xc37   :  { %v3963_v35 = vpop.eup %3962 }
 0xc38   :  { %v3421_v13 = vmul.f32 0.6931472, %v3963_v35 }
 0xc3a   :  { %v3424_v19 = vadd.f32 %v3421_v13, %v3404_v36 }
 0xc3b   :  { %v3965_v51 = vpop.eup %3964 }
 0xc3c   :  { %v3423_v16 = vmul.f32 0.6931472, %v3965_v51  ;;  %v3434_v0 = vsub.f32 %v3424_v19, %v3430_v7 }
 0xc3e   :  { %v3425_v15 = vadd.f32 %v3423_v16, %v3407_v52  ;;  %v3437_v29 = vsel %vm3436_vm7, %v3434_v0, 0.0 }
 0xc40   :  { %v3435_v21 = vsub.f32 %v3425_v15, %v3433_v27 }
 0xc42   :  { %v3438_v38 = vsel %vm3436_vm7, %v3435_v21, 0.0 }
 0xc43   :  { %v3439_v48 = vadd.f32 %v3438_v38, %v3437_v29 }
 0xc45   :  { %3440 = vadd.xlane.f32.xlu0 %v3439_v48 }
 0xcce   :  { %v3441_v4 = vpop.xlane.xlu0 %3440 }
 0xccf   :  { %v3442_v28 = vrot.slane %v3441_v4, 4 }
 0xcd1   :  { %v3443_v6 = vadd.f32 %v3442_v28, %v3441_v4 }
 0xcd3   :  { %v3444_v1 = vrot.slane %v3443_v6, 2 }
 0xcd5   :  { %v3445_v25 = vadd.f32 %v3444_v1, %v3443_v6 }
 0xcd7   :  { %v3446_v57 = vrot.slane %v3445_v25, 1 }
 0xcd9   :  { %v3447_v46 = vadd.f32 %v3446_v57, %v3445_v25 }
 0xcdb   :  { %3694 = vpush %v3447_v46 }
 0xd0c   :  { %s3695_s18 = spop %3694 }
 0xd0d   :  { %v3449_v11 = vstv %s3695_s18 }
 0xd0e   :  { %3451 = vst.msk [vmem:[#allocation4] sm:$0x1] %vm3450_vm8, %v3449_v11 }
 0xd0f   :  { %3977 = shalt.err (!%p3974_p4)
}
 0xd10   :  { %3461 = dma.vmem_to_hbm [thread:$0]  %s3459_s17, 16, %s6095_s8, [#allocation5]  }
 0xd11   :  { %3986 = dma.done.wait [#allocation5], 16  }
 0xd12   :  { %3987 = vsyncadd [#allocation5], 4294967280 }
 0xd13   :  { %3465 = vsyncpa [#allocation5], 1 }

</bundles_post_ra>
